<compile_context>
chip_gen: v5e
topology: v5e:2x2
jax: 0.10.0
libtpu: 0.0.40
codegen_flags: <defaults>
</compile_context>

<pallas_src>
import jax
import jax.numpy as jnp
from jax.experimental import pallas as pl
from jax.experimental.pallas import tpu as pltpu


# ----------------------------------------------------------------------------
# Host-side packing: pad each of the 3 gate blocks of the last axis to Hp lanes
# ----------------------------------------------------------------------------
def _pack_gates(a, H, Hp):
    """a: (..., 3H) -> (..., 3Hp); gate g occupies lanes [g*Hp, g*Hp+H)."""
    parts = []
    for g in range(3):
        blk = a[..., g * H:(g + 1) * H]
        pad = [(0, 0)] * (a.ndim - 1) + [(0, Hp - H)]
        parts.append(jnp.pad(blk, pad))
    return jnp.concatenate(parts, axis=-1)


# ----------------------------------------------------------------------------
# Fused kernel: all GRU layers + BatchNorm1d + fc1/ReLU/fc2 in one invocation.
# ----------------------------------------------------------------------------
def _make_fused_kernel(T, B, Bp, Hp, L):
    G = 3 * Hp

    def kernel(*refs):
        # inputs : x_flat (T*Bp, D) f32, h0 (L, Bp, Hp) f32,
        #          per layer: w_ih bf16, w_hh bf16, bias_i (1,G) f32, b_hn (1,Hp) f32
        #          head: gamma, beta, w1, b1, w2, b2 (f32)
        # outputs: out_ref (B, O) f32
        # scratch: gi0_ref VMEM (T*Bp, G) f32
        x_ref, h0_ref = refs[0], refs[1]
        idx = 2
        layer_refs = []
        for _ in range(L):
            layer_refs.append(refs[idx:idx + 4])
            idx += 4
        gamma_ref, beta_ref, w1_ref, b1_ref, w2_ref, b2_ref = refs[idx:idx + 6]
        out_ref = refs[idx + 6]
        gi0_ref = refs[idx + 7]

        # ---- hoisted per-layer constants (weights bf16, biases f32) ---------
        w_ih, w_hh, bias_i, b_hn = [], [], [], []
        for l in range(L):
            wih_r, whh_r, bi_r, bhn_r = layer_refs[l]
            w_ih.append(wih_r[...])
            w_hh.append(whh_r[...])
            # broadcasts hoisted out of the time loop (JAX does not CSE them)
            bias_i.append(None if l == 0 else
                          jnp.broadcast_to(bi_r[...], (Bp, G)))
            b_hn.append(jnp.broadcast_to(bhn_r[...], (Bp, Hp)))

        # ---- layer-0 input projection for ALL timesteps (off the chain) -----
        x_bf = x_ref[...].astype(jnp.bfloat16)                       # (T*Bp, D)
        gi0 = jnp.dot(x_bf, w_ih[0], preferred_element_type=jnp.float32)
        gi0_ref[...] = gi0 + layer_refs[0][2][...]                   # + (1, G) bias

        # ---- wavefront recurrence: dependence chain is T + L - 1 steps ------
        h = [h0_ref[l] for l in range(L)]                            # (Bp, Hp) f32
        for t in range(T):
            for l in range(L):
                if l == 0:
                    # aligned leading-row slice of the staged projection
                    gi = gi0_ref[pl.ds(t * Bp, Bp), :]               # (Bp, G) f32
                else:
                    gi = jnp.dot(h[l - 1].astype(jnp.bfloat16), w_ih[l],
                                 preferred_element_type=jnp.float32) + bias_i[l]
                # single gate-fused MXU push on the serial path
                gh = jnp.dot(h[l].astype(jnp.bfloat16), w_hh[l],
                             preferred_element_type=jnp.float32)     # (Bp, G) f32
                # lane-aligned whole-vreg gate slices; elementwise math in f32
                r = jax.nn.sigmoid(gi[:, 0:Hp] + gh[:, 0:Hp])
                z = jax.nn.sigmoid(gi[:, Hp:2 * Hp] + gh[:, Hp:2 * Hp])
                n = jnp.tanh(gi[:, 2 * Hp:G] + r * (gh[:, 2 * Hp:G] + b_hn[l]))
                h[l] = (1.0 - z) * n + z * h[l]

        # ---- head: BatchNorm1d (batch stats, padded rows masked) -> fc1 -> ReLU -> fc2
        h_last = h[L - 1]                                            # (Bp, Hp) f32
        valid = (jax.lax.broadcasted_iota(jnp.int32, (Bp, 1), 0) < B
                 ).astype(jnp.float32)
        inv_b = 1.0 / B
        mean = jnp.sum(h_last * valid, axis=0, keepdims=True) * inv_b
        diff = (h_last - mean) * valid
        var = jnp.sum(diff * diff, axis=0, keepdims=True) * inv_b    # biased var
        xn = (h_last - mean) * jax.lax.rsqrt(var + 1e-5)
        xn = xn * gamma_ref[...] + beta_ref[...]

        h1 = jnp.dot(xn, w1_ref[...],
                     preferred_element_type=jnp.float32) + b1_ref[...]
        h1 = jnp.maximum(h1, 0.0)
        out = jnp.dot(h1, w2_ref[...],
                      preferred_element_type=jnp.float32) + b2_ref[...]
        out_ref[...] = out[0:B, :].astype(out_ref.dtype)             # valid rows only

    return kernel


# ----------------------------------------------------------------------------
# Parameters (PyTorch-style init, weights stored transposed: W = torch_W.T)
# ----------------------------------------------------------------------------
def init_params(key, input_dim, hidden_dim, layer_dim, output_dim,
                middle_dim=64):
    params = {}
    k = key
    scale_rnn = 1.0 / jnp.sqrt(hidden_dim)
    layers = []
    for layer in range(layer_dim):
        in_dim = input_dim if layer == 0 else hidden_dim
        k, k1, k2, k3, k4 = jax.random.split(k, 5)
        layers.append(dict(
            w_ih=jax.random.uniform(k1, (in_dim, 3 * hidden_dim),
                                    minval=-scale_rnn, maxval=scale_rnn),
            w_hh=jax.random.uniform(k2, (hidden_dim, 3 * hidden_dim),
                                    minval=-scale_rnn, maxval=scale_rnn),
            b_ih=jax.random.uniform(k3, (1, 3 * hidden_dim),
                                    minval=-scale_rnn, maxval=scale_rnn),
            b_hh=jax.random.uniform(k4, (1, 3 * hidden_dim),
                                    minval=-scale_rnn, maxval=scale_rnn),
        ))
    params["rnn"] = layers

    # BatchNorm1d(hidden_dim): gamma=1, beta=0 (fresh module defaults)
    params["bn_gamma"] = jnp.ones((1, hidden_dim), jnp.float32)
    params["bn_beta"] = jnp.zeros((1, hidden_dim), jnp.float32)

    s1 = 1.0 / jnp.sqrt(hidden_dim)
    s2 = 1.0 / jnp.sqrt(middle_dim)
    k, k1, k2, k3, k4 = jax.random.split(k, 5)
    params["fc1_w"] = jax.random.uniform(k1, (hidden_dim, middle_dim),
                                         minval=-s1, maxval=s1)
    params["fc1_b"] = jax.random.uniform(k2, (1, middle_dim),
                                         minval=-s1, maxval=s1)
    params["fc2_w"] = jax.random.uniform(k3, (middle_dim, output_dim),
                                         minval=-s2, maxval=s2)
    params["fc2_b"] = jax.random.uniform(k4, (1, output_dim),
                                         minval=-s2, maxval=s2)
    return jax.tree.map(lambda a: a.astype(jnp.float32), params)


# ----------------------------------------------------------------------------
# Forward: single fused pallas_call
# ----------------------------------------------------------------------------
@jax.jit
def gru_v3_forward(params, x, h0):
    """x: (B, T, input_dim) batch_first; h0: (layer_dim, B, hidden_dim)."""
    B, T, D = x.shape
    L = len(params["rnn"])
    H = params["rnn"][0]["w_hh"].shape[0]
    O = params["fc2_w"].shape[1]

    LANE, SUB = 128, 8
    Hp = ((H + LANE - 1) // LANE) * LANE     # hidden dim padded to lane multiple
    Bp = ((B + SUB - 1) // SUB) * SUB        # batch padded to sublane multiple

    # batch-pad, time-major flatten.  Padded hidden lanes / batch rows stay
    # inert (zero weights / masked out of BN and output).
    # TODO(synk): accept a time-major x to avoid this transpose at large sizes.
    x_p = jnp.pad(x, ((0, Bp - B), (0, 0), (0, 0)))
    x_flat = jnp.transpose(x_p, (1, 0, 2)).reshape(T * Bp, D)
    h0_p = jnp.pad(h0, ((0, 0), (0, Bp - B), (0, Hp - H)))

    inputs = [x_flat, h0_p]
    for li, lp in enumerate(params["rnn"]):
        b_ih, b_hh = lp["b_ih"], lp["b_hh"]                 # (1, 3H) each
        # Fold b_hh into the precomputed input-projection bias for r and z;
        # keep b_hh_n separate (it sits inside r * (h @ W_hn + b_hn)).
        bias_i = jnp.concatenate(
            [b_ih[:, :2 * H] + b_hh[:, :2 * H], b_ih[:, 2 * H:]], axis=1)
        w_ih = lp["w_ih"]                                   # (in, 3H)
        w_hh = lp["w_hh"]                                   # (H, 3H)
        if li > 0:
            w_ih = jnp.pad(w_ih, ((0, Hp - H), (0, 0)))     # pad contraction rows
        w_hh = jnp.pad(w_hh, ((0, Hp - H), (0, 0)))
        inputs += [
            _pack_gates(w_ih, H, Hp).astype(jnp.bfloat16),  # lane-aligned gates, bf16
            _pack_gates(w_hh, H, Hp).astype(jnp.bfloat16),
            _pack_gates(bias_i, H, Hp),                     # f32 (1, 3Hp)
            jnp.pad(b_hh[:, 2 * H:], ((0, 0), (0, Hp - H))),  # f32 (1, Hp)
        ]
    inputs += [
        jnp.pad(params["bn_gamma"], ((0, 0), (0, Hp - H)), constant_values=1.0),
        jnp.pad(params["bn_beta"], ((0, 0), (0, Hp - H))),
        jnp.pad(params["fc1_w"], ((0, Hp - H), (0, 0))),
        params["fc1_b"], params["fc2_w"], params["fc2_b"],
    ]

    vmem = pl.BlockSpec(memory_space=pltpu.MemorySpace.VMEM)
    return pl.pallas_call(
        _make_fused_kernel(T, B, Bp, Hp, L),
        out_shape=jax.ShapeDtypeStruct((B, O), jnp.float32),
        in_specs=[vmem] * len(inputs),
        out_specs=vmem,
        scratch_shapes=[pltpu.VMEM((T * Bp, 3 * Hp), jnp.float32)],
    )(*inputs)


if __name__ == "__main__":
    input_dim = 16
    hidden_dim = 32
    layer_dim = 2
    output_dim = 4
    batch = 4
    seq_len = 8

    key = jax.random.PRNGKey(0)
    kp, kx = jax.random.split(key)
    params = init_params(kp, input_dim, hidden_dim, layer_dim, output_dim)

    x = jax.random.normal(kx, (batch, seq_len, input_dim), jnp.float32)
    h0 = jnp.zeros((layer_dim, batch, hidden_dim), jnp.float32)  # init_hidden

    out = gru_v3_forward(params, x, h0)
    jax.block_until_ready(out)
    assert out.shape == (batch, output_dim)
    print("KERNEL_OK")
</pallas_src>

<mosaic_0001>
module attributes {stable_mosaic.version = 11 : i64} {
  func.func @kernel(%arg0: memref<64x16xf32, #tpu.memory_space<vmem>>, %arg1: memref<2x8x128xf32, #tpu.memory_space<vmem>>, %arg2: memref<16x384xbf16, #tpu.memory_space<vmem>>, %arg3: memref<128x384xbf16, #tpu.memory_space<vmem>>, %arg4: memref<1x384xf32, #tpu.memory_space<vmem>>, %arg5: memref<1x128xf32, #tpu.memory_space<vmem>>, %arg6: memref<128x384xbf16, #tpu.memory_space<vmem>>, %arg7: memref<128x384xbf16, #tpu.memory_space<vmem>>, %arg8: memref<1x384xf32, #tpu.memory_space<vmem>>, %arg9: memref<1x128xf32, #tpu.memory_space<vmem>>, %arg10: memref<1x128xf32, #tpu.memory_space<vmem>>, %arg11: memref<1x128xf32, #tpu.memory_space<vmem>>, %arg12: memref<128x64xf32, #tpu.memory_space<vmem>>, %arg13: memref<1x64xf32, #tpu.memory_space<vmem>>, %arg14: memref<64x4xf32, #tpu.memory_space<vmem>>, %arg15: memref<1x4xf32, #tpu.memory_space<vmem>>, %arg16: memref<4x4xf32, #tpu.memory_space<vmem>>, %arg17: memref<64x384xf32, #tpu.memory_space<vmem>>) attributes {dimension_semantics = [], scalar_prefetch = 0 : i64, scratch_operands = 1 : i64, tpu.core_type = #tpu.core_type<tc>} {
    %c0 = arith.constant 0 : index
    %c0_0 = arith.constant 0 : index
    %0 = vector.load %arg2[%c0, %c0_0] : memref<16x384xbf16, #tpu.memory_space<vmem>>, vector<16x384xbf16>
    %c0_1 = arith.constant 0 : index
    %c0_2 = arith.constant 0 : index
    %1 = vector.load %arg3[%c0_1, %c0_2] : memref<128x384xbf16, #tpu.memory_space<vmem>>, vector<128x384xbf16>
    %c0_3 = arith.constant 0 : index
    %c0_4 = arith.constant 0 : index
    %2 = vector.load %arg5[%c0_3, %c0_4] : memref<1x128xf32, #tpu.memory_space<vmem>>, vector<1x128xf32>
    %3 = vector.shape_cast %2 : vector<1x128xf32> to vector<1x128xf32>
    %4 = vector.broadcast %3 : vector<1x128xf32> to vector<8x128xf32>
    %c0_5 = arith.constant 0 : index
    %c0_6 = arith.constant 0 : index
    %5 = vector.load %arg6[%c0_5, %c0_6] : memref<128x384xbf16, #tpu.memory_space<vmem>>, vector<128x384xbf16>
    %c0_7 = arith.constant 0 : index
    %c0_8 = arith.constant 0 : index
    %6 = vector.load %arg7[%c0_7, %c0_8] : memref<128x384xbf16, #tpu.memory_space<vmem>>, vector<128x384xbf16>
    %c0_9 = arith.constant 0 : index
    %c0_10 = arith.constant 0 : index
    %7 = vector.load %arg8[%c0_9, %c0_10] : memref<1x384xf32, #tpu.memory_space<vmem>>, vector<1x384xf32>
    %8 = vector.shape_cast %7 : vector<1x384xf32> to vector<1x384xf32>
    %9 = vector.broadcast %8 : vector<1x384xf32> to vector<8x384xf32>
    %c0_11 = arith.constant 0 : index
    %c0_12 = arith.constant 0 : index
    %10 = vector.load %arg9[%c0_11, %c0_12] : memref<1x128xf32, #tpu.memory_space<vmem>>, vector<1x128xf32>
    %11 = vector.shape_cast %10 : vector<1x128xf32> to vector<1x128xf32>
    %12 = vector.broadcast %11 : vector<1x128xf32> to vector<8x128xf32>
    %c0_13 = arith.constant 0 : index
    %c0_14 = arith.constant 0 : index
    %13 = vector.load %arg0[%c0_13, %c0_14] : memref<64x16xf32, #tpu.memory_space<vmem>>, vector<64x16xf32>
    %14 = arith.truncf %13 : vector<64x16xf32> to vector<64x16xbf16>
    %cst = arith.constant dense<0.000000e+00> : vector<64x384xf32>
    %15 = tpu.matmul %14, %0, %cst {dimension_numbers = #tpu.dot_dimension_numbers<[1], [0], [0], [1], [0, 0, 1, 1], [], []>} : vector<64x16xbf16>, vector<16x384xbf16>, vector<64x384xf32> -> vector<64x384xf32>
    %c0_15 = arith.constant 0 : index
    %c0_16 = arith.constant 0 : index
    %16 = vector.load %arg4[%c0_15, %c0_16] : memref<1x384xf32, #tpu.memory_space<vmem>>, vector<1x384xf32>
    %17 = vector.broadcast %16 : vector<1x384xf32> to vector<64x384xf32>
    %18 = arith.addf %15, %17 : vector<64x384xf32>
    %c0_17 = arith.constant 0 : index
    %c0_18 = arith.constant 0 : index
    %19 = vector.load %arg17[%c0_17, %c0_18] : memref<64x384xf32, #tpu.memory_space<vmem>>, vector<64x384xf32>
    tpu.vector_store %arg17[%c0_17, %c0_18], %18 {strides = array<i32>} : memref<64x384xf32, #tpu.memory_space<vmem>>, vector<64x384xf32>,
    %c0_19 = arith.constant 0 : index
    %c0_20 = arith.constant 0 : index
    %c0_21 = arith.constant 0 : index
    %20 = vector.load %arg1[%c0_19, %c0_20, %c0_21] : memref<2x8x128xf32, #tpu.memory_space<vmem>>, vector<1x8x128xf32>
    %21 = vector.shape_cast %20 : vector<1x8x128xf32> to vector<8x128xf32>
    %c1 = arith.constant 1 : index
    %c0_22 = arith.constant 0 : index
    %c0_23 = arith.constant 0 : index
    %22 = vector.load %arg1[%c1, %c0_22, %c0_23] : memref<2x8x128xf32, #tpu.memory_space<vmem>>, vector<1x8x128xf32>
    %23 = vector.shape_cast %22 : vector<1x8x128xf32> to vector<8x128xf32>
    %c0_24 = arith.constant 0 : index
    %c0_25 = arith.constant 0 : index
    %24 = vector.load %arg17[%c0_24, %c0_25] : memref<64x384xf32, #tpu.memory_space<vmem>>, vector<8x384xf32>
    %25 = arith.truncf %21 : vector<8x128xf32> to vector<8x128xbf16>
    %cst_26 = arith.constant dense<0.000000e+00> : vector<8x384xf32>
    %26 = tpu.matmul %25, %1, %cst_26 {dimension_numbers = #tpu.dot_dimension_numbers<[1], [0], [0], [1], [0, 0, 1, 1], [], []>} : vector<8x128xbf16>, vector<128x384xbf16>, vector<8x384xf32> -> vector<8x384xf32>
    %27 = vector.extract_strided_slice %24 {offsets = [0, 0], sizes = [8, 128], strides = [1, 1]} : vector<8x384xf32> to vector<8x128xf32>
    %28 = vector.extract_strided_slice %26 {offsets = [0, 0], sizes = [8, 128], strides = [1, 1]} : vector<8x384xf32> to vector<8x128xf32>
    %29 = arith.addf %27, %28 : vector<8x128xf32>
    %30 = arith.negf %29 : vector<8x128xf32>
    %31 = math.exp %30 : vector<8x128xf32>
    %cst_27 = arith.constant 1.000000e+00 : f32
    %32 = vector.broadcast %cst_27 : f32 to vector<8x128xf32>
    %33 = arith.addf %32, %31 : vector<8x128xf32>
    %34 = arith.divf %32, %33 : vector<8x128xf32>
    %35 = vector.extract_strided_slice %24 {offsets = [0, 128], sizes = [8, 128], strides = [1, 1]} : vector<8x384xf32> to vector<8x128xf32>
    %36 = vector.extract_strided_slice %26 {offsets = [0, 128], sizes = [8, 128], strides = [1, 1]} : vector<8x384xf32> to vector<8x128xf32>
    %37 = arith.addf %35, %36 : vector<8x128xf32>
    %38 = arith.negf %37 : vector<8x128xf32>
    %39 = math.exp %38 : vector<8x128xf32>
    %cst_28 = arith.constant 1.000000e+00 : f32
    %40 = vector.broadcast %cst_28 : f32 to vector<8x128xf32>
    %41 = arith.addf %40, %39 : vector<8x128xf32>
    %42 = arith.divf %40, %41 : vector<8x128xf32>
    %43 = vector.extract_strided_slice %24 {offsets = [0, 256], sizes = [8, 128], strides = [1, 1]} : vector<8x384xf32> to vector<8x128xf32>
    %44 = vector.extract_strided_slice %26 {offsets = [0, 256], sizes = [8, 128], strides = [1, 1]} : vector<8x384xf32> to vector<8x128xf32>
    %45 = arith.addf %44, %4 : vector<8x128xf32>
    %46 = arith.mulf %34, %45 : vector<8x128xf32>
    %47 = arith.addf %43, %46 : vector<8x128xf32>
    %48 = math.tanh %47 : vector<8x128xf32>
    %cst_29 = arith.constant 1.000000e+00 : f32
    %49 = vector.broadcast %cst_29 : f32 to vector<8x128xf32>
    %50 = arith.subf %49, %42 : vector<8x128xf32>
    %51 = arith.mulf %50, %48 : vector<8x128xf32>
    %52 = arith.mulf %42, %21 : vector<8x128xf32>
    %53 = arith.addf %51, %52 : vector<8x128xf32>
    %54 = arith.truncf %53 : vector<8x128xf32> to vector<8x128xbf16>
    %cst_30 = arith.constant dense<0.000000e+00> : vector<8x384xf32>
    %55 = tpu.matmul %54, %5, %cst_30 {dimension_numbers = #tpu.dot_dimension_numbers<[1], [0], [0], [1], [0, 0, 1, 1], [], []>} : vector<8x128xbf16>, vector<128x384xbf16>, vector<8x384xf32> -> vector<8x384xf32>
    %56 = arith.addf %55, %9 : vector<8x384xf32>
    %57 = arith.truncf %23 : vector<8x128xf32> to vector<8x128xbf16>
    %cst_31 = arith.constant dense<0.000000e+00> : vector<8x384xf32>
    %58 = tpu.matmul %57, %6, %cst_31 {dimension_numbers = #tpu.dot_dimension_numbers<[1], [0], [0], [1], [0, 0, 1, 1], [], []>} : vector<8x128xbf16>, vector<128x384xbf16>, vector<8x384xf32> -> vector<8x384xf32>
    %59 = vector.extract_strided_slice %56 {offsets = [0, 0], sizes = [8, 128], strides = [1, 1]} : vector<8x384xf32> to vector<8x128xf32>
    %60 = vector.extract_strided_slice %58 {offsets = [0, 0], sizes = [8, 128], strides = [1, 1]} : vector<8x384xf32> to vector<8x128xf32>
    %61 = arith.addf %59, %60 : vector<8x128xf32>
    %62 = arith.negf %61 : vector<8x128xf32>
    %63 = math.exp %62 : vector<8x128xf32>
    %cst_32 = arith.constant 1.000000e+00 : f32
    %64 = vector.broadcast %cst_32 : f32 to vector<8x128xf32>
    %65 = arith.addf %64, %63 : vector<8x128xf32>
    %66 = arith.divf %64, %65 : vector<8x128xf32>
    %67 = vector.extract_strided_slice %56 {offsets = [0, 128], sizes = [8, 128], strides = [1, 1]} : vector<8x384xf32> to vector<8x128xf32>
    %68 = vector.extract_strided_slice %58 {offsets = [0, 128], sizes = [8, 128], strides = [1, 1]} : vector<8x384xf32> to vector<8x128xf32>
    %69 = arith.addf %67, %68 : vector<8x128xf32>
    %70 = arith.negf %69 : vector<8x128xf32>
    %71 = math.exp %70 : vector<8x128xf32>
    %cst_33 = arith.constant 1.000000e+00 : f32
    %72 = vector.broadcast %cst_33 : f32 to vector<8x128xf32>
    %73 = arith.addf %72, %71 : vector<8x128xf32>
    %74 = arith.divf %72, %73 : vector<8x128xf32>
    %75 = vector.extract_strided_slice %56 {offsets = [0, 256], sizes = [8, 128], strides = [1, 1]} : vector<8x384xf32> to vector<8x128xf32>
    %76 = vector.extract_strided_slice %58 {offsets = [0, 256], sizes = [8, 128], strides = [1, 1]} : vector<8x384xf32> to vector<8x128xf32>
    %77 = arith.addf %76, %12 : vector<8x128xf32>
    %78 = arith.mulf %66, %77 : vector<8x128xf32>
    %79 = arith.addf %75, %78 : vector<8x128xf32>
    %80 = math.tanh %79 : vector<8x128xf32>
    %cst_34 = arith.constant 1.000000e+00 : f32
    %81 = vector.broadcast %cst_34 : f32 to vector<8x128xf32>
    %82 = arith.subf %81, %74 : vector<8x128xf32>
    %83 = arith.mulf %82, %80 : vector<8x128xf32>
    %84 = arith.mulf %74, %23 : vector<8x128xf32>
    %85 = arith.addf %83, %84 : vector<8x128xf32>
    %c8 = arith.constant 8 : index
    %c0_35 = arith.constant 0 : index
    %86 = vector.load %arg17[%c8, %c0_35] : memref<64x384xf32, #tpu.memory_space<vmem>>, vector<8x384xf32>
    %87 = arith.truncf %53 : vector<8x128xf32> to vector<8x128xbf16>
    %cst_36 = arith.constant dense<0.000000e+00> : vector<8x384xf32>
    %88 = tpu.matmul %87, %1, %cst_36 {dimension_numbers = #tpu.dot_dimension_numbers<[1], [0], [0], [1], [0, 0, 1, 1], [], []>} : vector<8x128xbf16>, vector<128x384xbf16>, vector<8x384xf32> -> vector<8x384xf32>
    %89 = vector.extract_strided_slice %86 {offsets = [0, 0], sizes = [8, 128], strides = [1, 1]} : vector<8x384xf32> to vector<8x128xf32>
    %90 = vector.extract_strided_slice %88 {offsets = [0, 0], sizes = [8, 128], strides = [1, 1]} : vector<8x384xf32> to vector<8x128xf32>
    %91 = arith.addf %89, %90 : vector<8x128xf32>
    %92 = arith.negf %91 : vector<8x128xf32>
    %93 = math.exp %92 : vector<8x128xf32>
    %cst_37 = arith.constant 1.000000e+00 : f32
    %94 = vector.broadcast %cst_37 : f32 to vector<8x128xf32>
    %95 = arith.addf %94, %93 : vector<8x128xf32>
    %96 = arith.divf %94, %95 : vector<8x128xf32>
    %97 = vector.extract_strided_slice %86 {offsets = [0, 128], sizes = [8, 128], strides = [1, 1]} : vector<8x384xf32> to vector<8x128xf32>
    %98 = vector.extract_strided_slice %88 {offsets = [0, 128], sizes = [8, 128], strides = [1, 1]} : vector<8x384xf32> to vector<8x128xf32>
    %99 = arith.addf %97, %98 : vector<8x128xf32>
    %100 = arith.negf %99 : vector<8x128xf32>
    %101 = math.exp %100 : vector<8x128xf32>
    %cst_38 = arith.constant 1.000000e+00 : f32
    %102 = vector.broadcast %cst_38 : f32 to vector<8x128xf32>
    %103 = arith.addf %102, %101 : vector<8x128xf32>
    %104 = arith.divf %102, %103 : vector<8x128xf32>
    %105 = vector.extract_strided_slice %86 {offsets = [0, 256], sizes = [8, 128], strides = [1, 1]} : vector<8x384xf32> to vector<8x128xf32>
    %106 = vector.extract_strided_slice %88 {offsets = [0, 256], sizes = [8, 128], strides = [1, 1]} : vector<8x384xf32> to vector<8x128xf32>
    %107 = arith.addf %106, %4 : vector<8x128xf32>
    %108 = arith.mulf %96, %107 : vector<8x128xf32>
    %109 = arith.addf %105, %108 : vector<8x128xf32>
    %110 = math.tanh %109 : vector<8x128xf32>
    %cst_39 = arith.constant 1.000000e+00 : f32
    %111 = vector.broadcast %cst_39 : f32 to vector<8x128xf32>
    %112 = arith.subf %111, %104 : vector<8x128xf32>
    %113 = arith.mulf %112, %110 : vector<8x128xf32>
    %114 = arith.mulf %104, %53 : vector<8x128xf32>
    %115 = arith.addf %113, %114 : vector<8x128xf32>
    %116 = arith.truncf %115 : vector<8x128xf32> to vector<8x128xbf16>
    %cst_40 = arith.constant dense<0.000000e+00> : vector<8x384xf32>
    %117 = tpu.matmul %116, %5, %cst_40 {dimension_numbers = #tpu.dot_dimension_numbers<[1], [0], [0], [1], [0, 0, 1, 1], [], []>} : vector<8x128xbf16>, vector<128x384xbf16>, vector<8x384xf32> -> vector<8x384xf32>
    %118 = arith.addf %117, %9 : vector<8x384xf32>
    %119 = arith.truncf %85 : vector<8x128xf32> to vector<8x128xbf16>
    %cst_41 = arith.constant dense<0.000000e+00> : vector<8x384xf32>
    %120 = tpu.matmul %119, %6, %cst_41 {dimension_numbers = #tpu.dot_dimension_numbers<[1], [0], [0], [1], [0, 0, 1, 1], [], []>} : vector<8x128xbf16>, vector<128x384xbf16>, vector<8x384xf32> -> vector<8x384xf32>
    %121 = vector.extract_strided_slice %118 {offsets = [0, 0], sizes = [8, 128], strides = [1, 1]} : vector<8x384xf32> to vector<8x128xf32>
    %122 = vector.extract_strided_slice %120 {offsets = [0, 0], sizes = [8, 128], strides = [1, 1]} : vector<8x384xf32> to vector<8x128xf32>
    %123 = arith.addf %121, %122 : vector<8x128xf32>
    %124 = arith.negf %123 : vector<8x128xf32>
    %125 = math.exp %124 : vector<8x128xf32>
    %cst_42 = arith.constant 1.000000e+00 : f32
    %126 = vector.broadcast %cst_42 : f32 to vector<8x128xf32>
    %127 = arith.addf %126, %125 : vector<8x128xf32>
    %128 = arith.divf %126, %127 : vector<8x128xf32>
    %129 = vector.extract_strided_slice %118 {offsets = [0, 128], sizes = [8, 128], strides = [1, 1]} : vector<8x384xf32> to vector<8x128xf32>
    %130 = vector.extract_strided_slice %120 {offsets = [0, 128], sizes = [8, 128], strides = [1, 1]} : vector<8x384xf32> to vector<8x128xf32>
    %131 = arith.addf %129, %130 : vector<8x128xf32>
    %132 = arith.negf %131 : vector<8x128xf32>
    %133 = math.exp %132 : vector<8x128xf32>
    %cst_43 = arith.constant 1.000000e+00 : f32
    %134 = vector.broadcast %cst_43 : f32 to vector<8x128xf32>
    %135 = arith.addf %134, %133 : vector<8x128xf32>
    %136 = arith.divf %134, %135 : vector<8x128xf32>
    %137 = vector.extract_strided_slice %118 {offsets = [0, 256], sizes = [8, 128], strides = [1, 1]} : vector<8x384xf32> to vector<8x128xf32>
    %138 = vector.extract_strided_slice %120 {offsets = [0, 256], sizes = [8, 128], strides = [1, 1]} : vector<8x384xf32> to vector<8x128xf32>
    %139 = arith.addf %138, %12 : vector<8x128xf32>
    %140 = arith.mulf %128, %139 : vector<8x128xf32>
    %141 = arith.addf %137, %140 : vector<8x128xf32>
    %142 = math.tanh %141 : vector<8x128xf32>
    %cst_44 = arith.constant 1.000000e+00 : f32
    %143 = vector.broadcast %cst_44 : f32 to vector<8x128xf32>
    %144 = arith.subf %143, %136 : vector<8x128xf32>
    %145 = arith.mulf %144, %142 : vector<8x128xf32>
    %146 = arith.mulf %136, %85 : vector<8x128xf32>
    %147 = arith.addf %145, %146 : vector<8x128xf32>
    %c16 = arith.constant 16 : index
    %c0_45 = arith.constant 0 : index
    %148 = vector.load %arg17[%c16, %c0_45] : memref<64x384xf32, #tpu.memory_space<vmem>>, vector<8x384xf32>
    %149 = arith.truncf %115 : vector<8x128xf32> to vector<8x128xbf16>
    %cst_46 = arith.constant dense<0.000000e+00> : vector<8x384xf32>
    %150 = tpu.matmul %149, %1, %cst_46 {dimension_numbers = #tpu.dot_dimension_numbers<[1], [0], [0], [1], [0, 0, 1, 1], [], []>} : vector<8x128xbf16>, vector<128x384xbf16>, vector<8x384xf32> -> vector<8x384xf32>
    %151 = vector.extract_strided_slice %148 {offsets = [0, 0], sizes = [8, 128], strides = [1, 1]} : vector<8x384xf32> to vector<8x128xf32>
    %152 = vector.extract_strided_slice %150 {offsets = [0, 0], sizes = [8, 128], strides = [1, 1]} : vector<8x384xf32> to vector<8x128xf32>
    %153 = arith.addf %151, %152 : vector<8x128xf32>
    %154 = arith.negf %153 : vector<8x128xf32>
    %155 = math.exp %154 : vector<8x128xf32>
    %cst_47 = arith.constant 1.000000e+00 : f32
    %156 = vector.broadcast %cst_47 : f32 to vector<8x128xf32>
    %157 = arith.addf %156, %155 : vector<8x128xf32>
    %158 = arith.divf %156, %157 : vector<8x128xf32>
    %159 = vector.extract_strided_slice %148 {offsets = [0, 128], sizes = [8, 128], strides = [1, 1]} : vector<8x384xf32> to vector<8x128xf32>
    %160 = vector.extract_strided_slice %150 {offsets = [0, 128], sizes = [8, 128], strides = [1, 1]} : vector<8x384xf32> to vector<8x128xf32>
    %161 = arith.addf %159, %160 : vector<8x128xf32>
    %162 = arith.negf %161 : vector<8x128xf32>
    %163 = math.exp %162 : vector<8x128xf32>
    %cst_48 = arith.constant 1.000000e+00 : f32
    %164 = vector.broadcast %cst_48 : f32 to vector<8x128xf32>
    %165 = arith.addf %164, %163 : vector<8x128xf32>
    %166 = arith.divf %164, %165 : vector<8x128xf32>
    %167 = vector.extract_strided_slice %148 {offsets = [0, 256], sizes = [8, 128], strides = [1, 1]} : vector<8x384xf32> to vector<8x128xf32>
    %168 = vector.extract_strided_slice %150 {offsets = [0, 256], sizes = [8, 128], strides = [1, 1]} : vector<8x384xf32> to vector<8x128xf32>
    %169 = arith.addf %168, %4 : vector<8x128xf32>
    %170 = arith.mulf %158, %169 : vector<8x128xf32>
    %171 = arith.addf %167, %170 : vector<8x128xf32>
    %172 = math.tanh %171 : vector<8x128xf32>
    %cst_49 = arith.constant 1.000000e+00 : f32
    %173 = vector.broadcast %cst_49 : f32 to vector<8x128xf32>
    %174 = arith.subf %173, %166 : vector<8x128xf32>
    %175 = arith.mulf %174, %172 : vector<8x128xf32>
    %176 = arith.mulf %166, %115 : vector<8x128xf32>
    %177 = arith.addf %175, %176 : vector<8x128xf32>
    %178 = arith.truncf %177 : vector<8x128xf32> to vector<8x128xbf16>
    %cst_50 = arith.constant dense<0.000000e+00> : vector<8x384xf32>
    %179 = tpu.matmul %178, %5, %cst_50 {dimension_numbers = #tpu.dot_dimension_numbers<[1], [0], [0], [1], [0, 0, 1, 1], [], []>} : vector<8x128xbf16>, vector<128x384xbf16>, vector<8x384xf32> -> vector<8x384xf32>
    %180 = arith.addf %179, %9 : vector<8x384xf32>
    %181 = arith.truncf %147 : vector<8x128xf32> to vector<8x128xbf16>
    %cst_51 = arith.constant dense<0.000000e+00> : vector<8x384xf32>
    %182 = tpu.matmul %181, %6, %cst_51 {dimension_numbers = #tpu.dot_dimension_numbers<[1], [0], [0], [1], [0, 0, 1, 1], [], []>} : vector<8x128xbf16>, vector<128x384xbf16>, vector<8x384xf32> -> vector<8x384xf32>
    %183 = vector.extract_strided_slice %180 {offsets = [0, 0], sizes = [8, 128], strides = [1, 1]} : vector<8x384xf32> to vector<8x128xf32>
    %184 = vector.extract_strided_slice %182 {offsets = [0, 0], sizes = [8, 128], strides = [1, 1]} : vector<8x384xf32> to vector<8x128xf32>
    %185 = arith.addf %183, %184 : vector<8x128xf32>
    %186 = arith.negf %185 : vector<8x128xf32>
    %187 = math.exp %186 : vector<8x128xf32>
    %cst_52 = arith.constant 1.000000e+00 : f32
    %188 = vector.broadcast %cst_52 : f32 to vector<8x128xf32>
    %189 = arith.addf %188, %187 : vector<8x128xf32>
    %190 = arith.divf %188, %189 : vector<8x128xf32>
    %191 = vector.extract_strided_slice %180 {offsets = [0, 128], sizes = [8, 128], strides = [1, 1]} : vector<8x384xf32> to vector<8x128xf32>
    %192 = vector.extract_strided_slice %182 {offsets = [0, 128], sizes = [8, 128], strides = [1, 1]} : vector<8x384xf32> to vector<8x128xf32>
    %193 = arith.addf %191, %192 : vector<8x128xf32>
    %194 = arith.negf %193 : vector<8x128xf32>
    %195 = math.exp %194 : vector<8x128xf32>
    %cst_53 = arith.constant 1.000000e+00 : f32
    %196 = vector.broadcast %cst_53 : f32 to vector<8x128xf32>
    %197 = arith.addf %196, %195 : vector<8x128xf32>
    %198 = arith.divf %196, %197 : vector<8x128xf32>
    %199 = vector.extract_strided_slice %180 {offsets = [0, 256], sizes = [8, 128], strides = [1, 1]} : vector<8x384xf32> to vector<8x128xf32>
    %200 = vector.extract_strided_slice %182 {offsets = [0, 256], sizes = [8, 128], strides = [1, 1]} : vector<8x384xf32> to vector<8x128xf32>
    %201 = arith.addf %200, %12 : vector<8x128xf32>
    %202 = arith.mulf %190, %201 : vector<8x128xf32>
    %203 = arith.addf %199, %202 : vector<8x128xf32>
    %204 = math.tanh %203 : vector<8x128xf32>
    %cst_54 = arith.constant 1.000000e+00 : f32
    %205 = vector.broadcast %cst_54 : f32 to vector<8x128xf32>
    %206 = arith.subf %205, %198 : vector<8x128xf32>
    %207 = arith.mulf %206, %204 : vector<8x128xf32>
    %208 = arith.mulf %198, %147 : vector<8x128xf32>
    %209 = arith.addf %207, %208 : vector<8x128xf32>
    %c24 = arith.constant 24 : index
    %c0_55 = arith.constant 0 : index
    %210 = vector.load %arg17[%c24, %c0_55] : memref<64x384xf32, #tpu.memory_space<vmem>>, vector<8x384xf32>
    %211 = arith.truncf %177 : vector<8x128xf32> to vector<8x128xbf16>
    %cst_56 = arith.constant dense<0.000000e+00> : vector<8x384xf32>
    %212 = tpu.matmul %211, %1, %cst_56 {dimension_numbers = #tpu.dot_dimension_numbers<[1], [0], [0], [1], [0, 0, 1, 1], [], []>} : vector<8x128xbf16>, vector<128x384xbf16>, vector<8x384xf32> -> vector<8x384xf32>
    %213 = vector.extract_strided_slice %210 {offsets = [0, 0], sizes = [8, 128], strides = [1, 1]} : vector<8x384xf32> to vector<8x128xf32>
    %214 = vector.extract_strided_slice %212 {offsets = [0, 0], sizes = [8, 128], strides = [1, 1]} : vector<8x384xf32> to vector<8x128xf32>
    %215 = arith.addf %213, %214 : vector<8x128xf32>
    %216 = arith.negf %215 : vector<8x128xf32>
    %217 = math.exp %216 : vector<8x128xf32>
    %cst_57 = arith.constant 1.000000e+00 : f32
    %218 = vector.broadcast %cst_57 : f32 to vector<8x128xf32>
    %219 = arith.addf %218, %217 : vector<8x128xf32>
    %220 = arith.divf %218, %219 : vector<8x128xf32>
    %221 = vector.extract_strided_slice %210 {offsets = [0, 128], sizes = [8, 128], strides = [1, 1]} : vector<8x384xf32> to vector<8x128xf32>
    %222 = vector.extract_strided_slice %212 {offsets = [0, 128], sizes = [8, 128], strides = [1, 1]} : vector<8x384xf32> to vector<8x128xf32>
    %223 = arith.addf %221, %222 : vector<8x128xf32>
    %224 = arith.negf %223 : vector<8x128xf32>
    %225 = math.exp %224 : vector<8x128xf32>
    %cst_58 = arith.constant 1.000000e+00 : f32
    %226 = vector.broadcast %cst_58 : f32 to vector<8x128xf32>
    %227 = arith.addf %226, %225 : vector<8x128xf32>
    %228 = arith.divf %226, %227 : vector<8x128xf32>
    %229 = vector.extract_strided_slice %210 {offsets = [0, 256], sizes = [8, 128], strides = [1, 1]} : vector<8x384xf32> to vector<8x128xf32>
    %230 = vector.extract_strided_slice %212 {offsets = [0, 256], sizes = [8, 128], strides = [1, 1]} : vector<8x384xf32> to vector<8x128xf32>
    %231 = arith.addf %230, %4 : vector<8x128xf32>
    %232 = arith.mulf %220, %231 : vector<8x128xf32>
    %233 = arith.addf %229, %232 : vector<8x128xf32>
    %234 = math.tanh %233 : vector<8x128xf32>
    %cst_59 = arith.constant 1.000000e+00 : f32
    %235 = vector.broadcast %cst_59 : f32 to vector<8x128xf32>
    %236 = arith.subf %235, %228 : vector<8x128xf32>
    %237 = arith.mulf %236, %234 : vector<8x128xf32>
    %238 = arith.mulf %228, %177 : vector<8x128xf32>
    %239 = arith.addf %237, %238 : vector<8x128xf32>
    %240 = arith.truncf %239 : vector<8x128xf32> to vector<8x128xbf16>
    %cst_60 = arith.constant dense<0.000000e+00> : vector<8x384xf32>
    %241 = tpu.matmul %240, %5, %cst_60 {dimension_numbers = #tpu.dot_dimension_numbers<[1], [0], [0], [1], [0, 0, 1, 1], [], []>} : vector<8x128xbf16>, vector<128x384xbf16>, vector<8x384xf32> -> vector<8x384xf32>
    %242 = arith.addf %241, %9 : vector<8x384xf32>
    %243 = arith.truncf %209 : vector<8x128xf32> to vector<8x128xbf16>
    %cst_61 = arith.constant dense<0.000000e+00> : vector<8x384xf32>
    %244 = tpu.matmul %243, %6, %cst_61 {dimension_numbers = #tpu.dot_dimension_numbers<[1], [0], [0], [1], [0, 0, 1, 1], [], []>} : vector<8x128xbf16>, vector<128x384xbf16>, vector<8x384xf32> -> vector<8x384xf32>
    %245 = vector.extract_strided_slice %242 {offsets = [0, 0], sizes = [8, 128], strides = [1, 1]} : vector<8x384xf32> to vector<8x128xf32>
    %246 = vector.extract_strided_slice %244 {offsets = [0, 0], sizes = [8, 128], strides = [1, 1]} : vector<8x384xf32> to vector<8x128xf32>
    %247 = arith.addf %245, %246 : vector<8x128xf32>
    %248 = arith.negf %247 : vector<8x128xf32>
    %249 = math.exp %248 : vector<8x128xf32>
    %cst_62 = arith.constant 1.000000e+00 : f32
    %250 = vector.broadcast %cst_62 : f32 to vector<8x128xf32>
    %251 = arith.addf %250, %249 : vector<8x128xf32>
    %252 = arith.divf %250, %251 : vector<8x128xf32>
    %253 = vector.extract_strided_slice %242 {offsets = [0, 128], sizes = [8, 128], strides = [1, 1]} : vector<8x384xf32> to vector<8x128xf32>
    %254 = vector.extract_strided_slice %244 {offsets = [0, 128], sizes = [8, 128], strides = [1, 1]} : vector<8x384xf32> to vector<8x128xf32>
    %255 = arith.addf %253, %254 : vector<8x128xf32>
    %256 = arith.negf %255 : vector<8x128xf32>
    %257 = math.exp %256 : vector<8x128xf32>
    %cst_63 = arith.constant 1.000000e+00 : f32
    %258 = vector.broadcast %cst_63 : f32 to vector<8x128xf32>
    %259 = arith.addf %258, %257 : vector<8x128xf32>
    %260 = arith.divf %258, %259 : vector<8x128xf32>
    %261 = vector.extract_strided_slice %242 {offsets = [0, 256], sizes = [8, 128], strides = [1, 1]} : vector<8x384xf32> to vector<8x128xf32>
    %262 = vector.extract_strided_slice %244 {offsets = [0, 256], sizes = [8, 128], strides = [1, 1]} : vector<8x384xf32> to vector<8x128xf32>
    %263 = arith.addf %262, %12 : vector<8x128xf32>
    %264 = arith.mulf %252, %263 : vector<8x128xf32>
    %265 = arith.addf %261, %264 : vector<8x128xf32>
    %266 = math.tanh %265 : vector<8x128xf32>
    %cst_64 = arith.constant 1.000000e+00 : f32
    %267 = vector.broadcast %cst_64 : f32 to vector<8x128xf32>
    %268 = arith.subf %267, %260 : vector<8x128xf32>
    %269 = arith.mulf %268, %266 : vector<8x128xf32>
    %270 = arith.mulf %260, %209 : vector<8x128xf32>
    %271 = arith.addf %269, %270 : vector<8x128xf32>
    %c32 = arith.constant 32 : index
    %c0_65 = arith.constant 0 : index
    %272 = vector.load %arg17[%c32, %c0_65] : memref<64x384xf32, #tpu.memory_space<vmem>>, vector<8x384xf32>
    %273 = arith.truncf %239 : vector<8x128xf32> to vector<8x128xbf16>
    %cst_66 = arith.constant dense<0.000000e+00> : vector<8x384xf32>
    %274 = tpu.matmul %273, %1, %cst_66 {dimension_numbers = #tpu.dot_dimension_numbers<[1], [0], [0], [1], [0, 0, 1, 1], [], []>} : vector<8x128xbf16>, vector<128x384xbf16>, vector<8x384xf32> -> vector<8x384xf32>
    %275 = vector.extract_strided_slice %272 {offsets = [0, 0], sizes = [8, 128], strides = [1, 1]} : vector<8x384xf32> to vector<8x128xf32>
    %276 = vector.extract_strided_slice %274 {offsets = [0, 0], sizes = [8, 128], strides = [1, 1]} : vector<8x384xf32> to vector<8x128xf32>
    %277 = arith.addf %275, %276 : vector<8x128xf32>
    %278 = arith.negf %277 : vector<8x128xf32>
    %279 = math.exp %278 : vector<8x128xf32>
    %cst_67 = arith.constant 1.000000e+00 : f32
    %280 = vector.broadcast %cst_67 : f32 to vector<8x128xf32>
    %281 = arith.addf %280, %279 : vector<8x128xf32>
    %282 = arith.divf %280, %281 : vector<8x128xf32>
    %283 = vector.extract_strided_slice %272 {offsets = [0, 128], sizes = [8, 128], strides = [1, 1]} : vector<8x384xf32> to vector<8x128xf32>
    %284 = vector.extract_strided_slice %274 {offsets = [0, 128], sizes = [8, 128], strides = [1, 1]} : vector<8x384xf32> to vector<8x128xf32>
    %285 = arith.addf %283, %284 : vector<8x128xf32>
    %286 = arith.negf %285 : vector<8x128xf32>
    %287 = math.exp %286 : vector<8x128xf32>
    %cst_68 = arith.constant 1.000000e+00 : f32
    %288 = vector.broadcast %cst_68 : f32 to vector<8x128xf32>
    %289 = arith.addf %288, %287 : vector<8x128xf32>
    %290 = arith.divf %288, %289 : vector<8x128xf32>
    %291 = vector.extract_strided_slice %272 {offsets = [0, 256], sizes = [8, 128], strides = [1, 1]} : vector<8x384xf32> to vector<8x128xf32>
    %292 = vector.extract_strided_slice %274 {offsets = [0, 256], sizes = [8, 128], strides = [1, 1]} : vector<8x384xf32> to vector<8x128xf32>
    %293 = arith.addf %292, %4 : vector<8x128xf32>
    %294 = arith.mulf %282, %293 : vector<8x128xf32>
    %295 = arith.addf %291, %294 : vector<8x128xf32>
    %296 = math.tanh %295 : vector<8x128xf32>
    %cst_69 = arith.constant 1.000000e+00 : f32
    %297 = vector.broadcast %cst_69 : f32 to vector<8x128xf32>
    %298 = arith.subf %297, %290 : vector<8x128xf32>
    %299 = arith.mulf %298, %296 : vector<8x128xf32>
    %300 = arith.mulf %290, %239 : vector<8x128xf32>
    %301 = arith.addf %299, %300 : vector<8x128xf32>
    %302 = arith.truncf %301 : vector<8x128xf32> to vector<8x128xbf16>
    %cst_70 = arith.constant dense<0.000000e+00> : vector<8x384xf32>
    %303 = tpu.matmul %302, %5, %cst_70 {dimension_numbers = #tpu.dot_dimension_numbers<[1], [0], [0], [1], [0, 0, 1, 1], [], []>} : vector<8x128xbf16>, vector<128x384xbf16>, vector<8x384xf32> -> vector<8x384xf32>
    %304 = arith.addf %303, %9 : vector<8x384xf32>
    %305 = arith.truncf %271 : vector<8x128xf32> to vector<8x128xbf16>
    %cst_71 = arith.constant dense<0.000000e+00> : vector<8x384xf32>
    %306 = tpu.matmul %305, %6, %cst_71 {dimension_numbers = #tpu.dot_dimension_numbers<[1], [0], [0], [1], [0, 0, 1, 1], [], []>} : vector<8x128xbf16>, vector<128x384xbf16>, vector<8x384xf32> -> vector<8x384xf32>
    %307 = vector.extract_strided_slice %304 {offsets = [0, 0], sizes = [8, 128], strides = [1, 1]} : vector<8x384xf32> to vector<8x128xf32>
    %308 = vector.extract_strided_slice %306 {offsets = [0, 0], sizes = [8, 128], strides = [1, 1]} : vector<8x384xf32> to vector<8x128xf32>
    %309 = arith.addf %307, %308 : vector<8x128xf32>
    %310 = arith.negf %309 : vector<8x128xf32>
    %311 = math.exp %310 : vector<8x128xf32>
    %cst_72 = arith.constant 1.000000e+00 : f32
    %312 = vector.broadcast %cst_72 : f32 to vector<8x128xf32>
    %313 = arith.addf %312, %311 : vector<8x128xf32>
    %314 = arith.divf %312, %313 : vector<8x128xf32>
    %315 = vector.extract_strided_slice %304 {offsets = [0, 128], sizes = [8, 128], strides = [1, 1]} : vector<8x384xf32> to vector<8x128xf32>
    %316 = vector.extract_strided_slice %306 {offsets = [0, 128], sizes = [8, 128], strides = [1, 1]} : vector<8x384xf32> to vector<8x128xf32>
    %317 = arith.addf %315, %316 : vector<8x128xf32>
    %318 = arith.negf %317 : vector<8x128xf32>
    %319 = math.exp %318 : vector<8x128xf32>
    %cst_73 = arith.constant 1.000000e+00 : f32
    %320 = vector.broadcast %cst_73 : f32 to vector<8x128xf32>
    %321 = arith.addf %320, %319 : vector<8x128xf32>
    %322 = arith.divf %320, %321 : vector<8x128xf32>
    %323 = vector.extract_strided_slice %304 {offsets = [0, 256], sizes = [8, 128], strides = [1, 1]} : vector<8x384xf32> to vector<8x128xf32>
    %324 = vector.extract_strided_slice %306 {offsets = [0, 256], sizes = [8, 128], strides = [1, 1]} : vector<8x384xf32> to vector<8x128xf32>
    %325 = arith.addf %324, %12 : vector<8x128xf32>
    %326 = arith.mulf %314, %325 : vector<8x128xf32>
    %327 = arith.addf %323, %326 : vector<8x128xf32>
    %328 = math.tanh %327 : vector<8x128xf32>
    %cst_74 = arith.constant 1.000000e+00 : f32
    %329 = vector.broadcast %cst_74 : f32 to vector<8x128xf32>
    %330 = arith.subf %329, %322 : vector<8x128xf32>
    %331 = arith.mulf %330, %328 : vector<8x128xf32>
    %332 = arith.mulf %322, %271 : vector<8x128xf32>
    %333 = arith.addf %331, %332 : vector<8x128xf32>
    %c40 = arith.constant 40 : index
    %c0_75 = arith.constant 0 : index
    %334 = vector.load %arg17[%c40, %c0_75] : memref<64x384xf32, #tpu.memory_space<vmem>>, vector<8x384xf32>
    %335 = arith.truncf %301 : vector<8x128xf32> to vector<8x128xbf16>
    %cst_76 = arith.constant dense<0.000000e+00> : vector<8x384xf32>
    %336 = tpu.matmul %335, %1, %cst_76 {dimension_numbers = #tpu.dot_dimension_numbers<[1], [0], [0], [1], [0, 0, 1, 1], [], []>} : vector<8x128xbf16>, vector<128x384xbf16>, vector<8x384xf32> -> vector<8x384xf32>
    %337 = vector.extract_strided_slice %334 {offsets = [0, 0], sizes = [8, 128], strides = [1, 1]} : vector<8x384xf32> to vector<8x128xf32>
    %338 = vector.extract_strided_slice %336 {offsets = [0, 0], sizes = [8, 128], strides = [1, 1]} : vector<8x384xf32> to vector<8x128xf32>
    %339 = arith.addf %337, %338 : vector<8x128xf32>
    %340 = arith.negf %339 : vector<8x128xf32>
    %341 = math.exp %340 : vector<8x128xf32>
    %cst_77 = arith.constant 1.000000e+00 : f32
    %342 = vector.broadcast %cst_77 : f32 to vector<8x128xf32>
    %343 = arith.addf %342, %341 : vector<8x128xf32>
    %344 = arith.divf %342, %343 : vector<8x128xf32>
    %345 = vector.extract_strided_slice %334 {offsets = [0, 128], sizes = [8, 128], strides = [1, 1]} : vector<8x384xf32> to vector<8x128xf32>
    %346 = vector.extract_strided_slice %336 {offsets = [0, 128], sizes = [8, 128], strides = [1, 1]} : vector<8x384xf32> to vector<8x128xf32>
    %347 = arith.addf %345, %346 : vector<8x128xf32>
    %348 = arith.negf %347 : vector<8x128xf32>
    %349 = math.exp %348 : vector<8x128xf32>
    %cst_78 = arith.constant 1.000000e+00 : f32
    %350 = vector.broadcast %cst_78 : f32 to vector<8x128xf32>
    %351 = arith.addf %350, %349 : vector<8x128xf32>
    %352 = arith.divf %350, %351 : vector<8x128xf32>
    %353 = vector.extract_strided_slice %334 {offsets = [0, 256], sizes = [8, 128], strides = [1, 1]} : vector<8x384xf32> to vector<8x128xf32>
    %354 = vector.extract_strided_slice %336 {offsets = [0, 256], sizes = [8, 128], strides = [1, 1]} : vector<8x384xf32> to vector<8x128xf32>
    %355 = arith.addf %354, %4 : vector<8x128xf32>
    %356 = arith.mulf %344, %355 : vector<8x128xf32>
    %357 = arith.addf %353, %356 : vector<8x128xf32>
    %358 = math.tanh %357 : vector<8x128xf32>
    %cst_79 = arith.constant 1.000000e+00 : f32
    %359 = vector.broadcast %cst_79 : f32 to vector<8x128xf32>
    %360 = arith.subf %359, %352 : vector<8x128xf32>
    %361 = arith.mulf %360, %358 : vector<8x128xf32>
    %362 = arith.mulf %352, %301 : vector<8x128xf32>
    %363 = arith.addf %361, %362 : vector<8x128xf32>
    %364 = arith.truncf %363 : vector<8x128xf32> to vector<8x128xbf16>
    %cst_80 = arith.constant dense<0.000000e+00> : vector<8x384xf32>
    %365 = tpu.matmul %364, %5, %cst_80 {dimension_numbers = #tpu.dot_dimension_numbers<[1], [0], [0], [1], [0, 0, 1, 1], [], []>} : vector<8x128xbf16>, vector<128x384xbf16>, vector<8x384xf32> -> vector<8x384xf32>
    %366 = arith.addf %365, %9 : vector<8x384xf32>
    %367 = arith.truncf %333 : vector<8x128xf32> to vector<8x128xbf16>
    %cst_81 = arith.constant dense<0.000000e+00> : vector<8x384xf32>
    %368 = tpu.matmul %367, %6, %cst_81 {dimension_numbers = #tpu.dot_dimension_numbers<[1], [0], [0], [1], [0, 0, 1, 1], [], []>} : vector<8x128xbf16>, vector<128x384xbf16>, vector<8x384xf32> -> vector<8x384xf32>
    %369 = vector.extract_strided_slice %366 {offsets = [0, 0], sizes = [8, 128], strides = [1, 1]} : vector<8x384xf32> to vector<8x128xf32>
    %370 = vector.extract_strided_slice %368 {offsets = [0, 0], sizes = [8, 128], strides = [1, 1]} : vector<8x384xf32> to vector<8x128xf32>
    %371 = arith.addf %369, %370 : vector<8x128xf32>
    %372 = arith.negf %371 : vector<8x128xf32>
    %373 = math.exp %372 : vector<8x128xf32>
    %cst_82 = arith.constant 1.000000e+00 : f32
    %374 = vector.broadcast %cst_82 : f32 to vector<8x128xf32>
    %375 = arith.addf %374, %373 : vector<8x128xf32>
    %376 = arith.divf %374, %375 : vector<8x128xf32>
    %377 = vector.extract_strided_slice %366 {offsets = [0, 128], sizes = [8, 128], strides = [1, 1]} : vector<8x384xf32> to vector<8x128xf32>
    %378 = vector.extract_strided_slice %368 {offsets = [0, 128], sizes = [8, 128], strides = [1, 1]} : vector<8x384xf32> to vector<8x128xf32>
    %379 = arith.addf %377, %378 : vector<8x128xf32>
    %380 = arith.negf %379 : vector<8x128xf32>
    %381 = math.exp %380 : vector<8x128xf32>
    %cst_83 = arith.constant 1.000000e+00 : f32
    %382 = vector.broadcast %cst_83 : f32 to vector<8x128xf32>
    %383 = arith.addf %382, %381 : vector<8x128xf32>
    %384 = arith.divf %382, %383 : vector<8x128xf32>
    %385 = vector.extract_strided_slice %366 {offsets = [0, 256], sizes = [8, 128], strides = [1, 1]} : vector<8x384xf32> to vector<8x128xf32>
    %386 = vector.extract_strided_slice %368 {offsets = [0, 256], sizes = [8, 128], strides = [1, 1]} : vector<8x384xf32> to vector<8x128xf32>
    %387 = arith.addf %386, %12 : vector<8x128xf32>
    %388 = arith.mulf %376, %387 : vector<8x128xf32>
    %389 = arith.addf %385, %388 : vector<8x128xf32>
    %390 = math.tanh %389 : vector<8x128xf32>
    %cst_84 = arith.constant 1.000000e+00 : f32
    %391 = vector.broadcast %cst_84 : f32 to vector<8x128xf32>
    %392 = arith.subf %391, %384 : vector<8x128xf32>
    %393 = arith.mulf %392, %390 : vector<8x128xf32>
    %394 = arith.mulf %384, %333 : vector<8x128xf32>
    %395 = arith.addf %393, %394 : vector<8x128xf32>
    %c48 = arith.constant 48 : index
    %c0_85 = arith.constant 0 : index
    %396 = vector.load %arg17[%c48, %c0_85] : memref<64x384xf32, #tpu.memory_space<vmem>>, vector<8x384xf32>
    %397 = arith.truncf %363 : vector<8x128xf32> to vector<8x128xbf16>
    %cst_86 = arith.constant dense<0.000000e+00> : vector<8x384xf32>
    %398 = tpu.matmul %397, %1, %cst_86 {dimension_numbers = #tpu.dot_dimension_numbers<[1], [0], [0], [1], [0, 0, 1, 1], [], []>} : vector<8x128xbf16>, vector<128x384xbf16>, vector<8x384xf32> -> vector<8x384xf32>
    %399 = vector.extract_strided_slice %396 {offsets = [0, 0], sizes = [8, 128], strides = [1, 1]} : vector<8x384xf32> to vector<8x128xf32>
    %400 = vector.extract_strided_slice %398 {offsets = [0, 0], sizes = [8, 128], strides = [1, 1]} : vector<8x384xf32> to vector<8x128xf32>
    %401 = arith.addf %399, %400 : vector<8x128xf32>
    %402 = arith.negf %401 : vector<8x128xf32>
    %403 = math.exp %402 : vector<8x128xf32>
    %cst_87 = arith.constant 1.000000e+00 : f32
    %404 = vector.broadcast %cst_87 : f32 to vector<8x128xf32>
    %405 = arith.addf %404, %403 : vector<8x128xf32>
    %406 = arith.divf %404, %405 : vector<8x128xf32>
    %407 = vector.extract_strided_slice %396 {offsets = [0, 128], sizes = [8, 128], strides = [1, 1]} : vector<8x384xf32> to vector<8x128xf32>
    %408 = vector.extract_strided_slice %398 {offsets = [0, 128], sizes = [8, 128], strides = [1, 1]} : vector<8x384xf32> to vector<8x128xf32>
    %409 = arith.addf %407, %408 : vector<8x128xf32>
    %410 = arith.negf %409 : vector<8x128xf32>
    %411 = math.exp %410 : vector<8x128xf32>
    %cst_88 = arith.constant 1.000000e+00 : f32
    %412 = vector.broadcast %cst_88 : f32 to vector<8x128xf32>
    %413 = arith.addf %412, %411 : vector<8x128xf32>
    %414 = arith.divf %412, %413 : vector<8x128xf32>
    %415 = vector.extract_strided_slice %396 {offsets = [0, 256], sizes = [8, 128], strides = [1, 1]} : vector<8x384xf32> to vector<8x128xf32>
    %416 = vector.extract_strided_slice %398 {offsets = [0, 256], sizes = [8, 128], strides = [1, 1]} : vector<8x384xf32> to vector<8x128xf32>
    %417 = arith.addf %416, %4 : vector<8x128xf32>
    %418 = arith.mulf %406, %417 : vector<8x128xf32>
    %419 = arith.addf %415, %418 : vector<8x128xf32>
    %420 = math.tanh %419 : vector<8x128xf32>
    %cst_89 = arith.constant 1.000000e+00 : f32
    %421 = vector.broadcast %cst_89 : f32 to vector<8x128xf32>
    %422 = arith.subf %421, %414 : vector<8x128xf32>
    %423 = arith.mulf %422, %420 : vector<8x128xf32>
    %424 = arith.mulf %414, %363 : vector<8x128xf32>
    %425 = arith.addf %423, %424 : vector<8x128xf32>
    %426 = arith.truncf %425 : vector<8x128xf32> to vector<8x128xbf16>
    %cst_90 = arith.constant dense<0.000000e+00> : vector<8x384xf32>
    %427 = tpu.matmul %426, %5, %cst_90 {dimension_numbers = #tpu.dot_dimension_numbers<[1], [0], [0], [1], [0, 0, 1, 1], [], []>} : vector<8x128xbf16>, vector<128x384xbf16>, vector<8x384xf32> -> vector<8x384xf32>
    %428 = arith.addf %427, %9 : vector<8x384xf32>
    %429 = arith.truncf %395 : vector<8x128xf32> to vector<8x128xbf16>
    %cst_91 = arith.constant dense<0.000000e+00> : vector<8x384xf32>
    %430 = tpu.matmul %429, %6, %cst_91 {dimension_numbers = #tpu.dot_dimension_numbers<[1], [0], [0], [1], [0, 0, 1, 1], [], []>} : vector<8x128xbf16>, vector<128x384xbf16>, vector<8x384xf32> -> vector<8x384xf32>
    %431 = vector.extract_strided_slice %428 {offsets = [0, 0], sizes = [8, 128], strides = [1, 1]} : vector<8x384xf32> to vector<8x128xf32>
    %432 = vector.extract_strided_slice %430 {offsets = [0, 0], sizes = [8, 128], strides = [1, 1]} : vector<8x384xf32> to vector<8x128xf32>
    %433 = arith.addf %431, %432 : vector<8x128xf32>
    %434 = arith.negf %433 : vector<8x128xf32>
    %435 = math.exp %434 : vector<8x128xf32>
    %cst_92 = arith.constant 1.000000e+00 : f32
    %436 = vector.broadcast %cst_92 : f32 to vector<8x128xf32>
    %437 = arith.addf %436, %435 : vector<8x128xf32>
    %438 = arith.divf %436, %437 : vector<8x128xf32>
    %439 = vector.extract_strided_slice %428 {offsets = [0, 128], sizes = [8, 128], strides = [1, 1]} : vector<8x384xf32> to vector<8x128xf32>
    %440 = vector.extract_strided_slice %430 {offsets = [0, 128], sizes = [8, 128], strides = [1, 1]} : vector<8x384xf32> to vector<8x128xf32>
    %441 = arith.addf %439, %440 : vector<8x128xf32>
    %442 = arith.negf %441 : vector<8x128xf32>
    %443 = math.exp %442 : vector<8x128xf32>
    %cst_93 = arith.constant 1.000000e+00 : f32
    %444 = vector.broadcast %cst_93 : f32 to vector<8x128xf32>
    %445 = arith.addf %444, %443 : vector<8x128xf32>
    %446 = arith.divf %444, %445 : vector<8x128xf32>
    %447 = vector.extract_strided_slice %428 {offsets = [0, 256], sizes = [8, 128], strides = [1, 1]} : vector<8x384xf32> to vector<8x128xf32>
    %448 = vector.extract_strided_slice %430 {offsets = [0, 256], sizes = [8, 128], strides = [1, 1]} : vector<8x384xf32> to vector<8x128xf32>
    %449 = arith.addf %448, %12 : vector<8x128xf32>
    %450 = arith.mulf %438, %449 : vector<8x128xf32>
    %451 = arith.addf %447, %450 : vector<8x128xf32>
    %452 = math.tanh %451 : vector<8x128xf32>
    %cst_94 = arith.constant 1.000000e+00 : f32
    %453 = vector.broadcast %cst_94 : f32 to vector<8x128xf32>
    %454 = arith.subf %453, %446 : vector<8x128xf32>
    %455 = arith.mulf %454, %452 : vector<8x128xf32>
    %456 = arith.mulf %446, %395 : vector<8x128xf32>
    %457 = arith.addf %455, %456 : vector<8x128xf32>
    %c56 = arith.constant 56 : index
    %c0_95 = arith.constant 0 : index
    %458 = vector.load %arg17[%c56, %c0_95] : memref<64x384xf32, #tpu.memory_space<vmem>>, vector<8x384xf32>
    %459 = arith.truncf %425 : vector<8x128xf32> to vector<8x128xbf16>
    %cst_96 = arith.constant dense<0.000000e+00> : vector<8x384xf32>
    %460 = tpu.matmul %459, %1, %cst_96 {dimension_numbers = #tpu.dot_dimension_numbers<[1], [0], [0], [1], [0, 0, 1, 1], [], []>} : vector<8x128xbf16>, vector<128x384xbf16>, vector<8x384xf32> -> vector<8x384xf32>
    %461 = vector.extract_strided_slice %458 {offsets = [0, 0], sizes = [8, 128], strides = [1, 1]} : vector<8x384xf32> to vector<8x128xf32>
    %462 = vector.extract_strided_slice %460 {offsets = [0, 0], sizes = [8, 128], strides = [1, 1]} : vector<8x384xf32> to vector<8x128xf32>
    %463 = arith.addf %461, %462 : vector<8x128xf32>
    %464 = arith.negf %463 : vector<8x128xf32>
    %465 = math.exp %464 : vector<8x128xf32>
    %cst_97 = arith.constant 1.000000e+00 : f32
    %466 = vector.broadcast %cst_97 : f32 to vector<8x128xf32>
    %467 = arith.addf %466, %465 : vector<8x128xf32>
    %468 = arith.divf %466, %467 : vector<8x128xf32>
    %469 = vector.extract_strided_slice %458 {offsets = [0, 128], sizes = [8, 128], strides = [1, 1]} : vector<8x384xf32> to vector<8x128xf32>
    %470 = vector.extract_strided_slice %460 {offsets = [0, 128], sizes = [8, 128], strides = [1, 1]} : vector<8x384xf32> to vector<8x128xf32>
    %471 = arith.addf %469, %470 : vector<8x128xf32>
    %472 = arith.negf %471 : vector<8x128xf32>
    %473 = math.exp %472 : vector<8x128xf32>
    %cst_98 = arith.constant 1.000000e+00 : f32
    %474 = vector.broadcast %cst_98 : f32 to vector<8x128xf32>
    %475 = arith.addf %474, %473 : vector<8x128xf32>
    %476 = arith.divf %474, %475 : vector<8x128xf32>
    %477 = vector.extract_strided_slice %458 {offsets = [0, 256], sizes = [8, 128], strides = [1, 1]} : vector<8x384xf32> to vector<8x128xf32>
    %478 = vector.extract_strided_slice %460 {offsets = [0, 256], sizes = [8, 128], strides = [1, 1]} : vector<8x384xf32> to vector<8x128xf32>
    %479 = arith.addf %478, %4 : vector<8x128xf32>
    %480 = arith.mulf %468, %479 : vector<8x128xf32>
    %481 = arith.addf %477, %480 : vector<8x128xf32>
    %482 = math.tanh %481 : vector<8x128xf32>
    %cst_99 = arith.constant 1.000000e+00 : f32
    %483 = vector.broadcast %cst_99 : f32 to vector<8x128xf32>
    %484 = arith.subf %483, %476 : vector<8x128xf32>
    %485 = arith.mulf %484, %482 : vector<8x128xf32>
    %486 = arith.mulf %476, %425 : vector<8x128xf32>
    %487 = arith.addf %485, %486 : vector<8x128xf32>
    %488 = arith.truncf %487 : vector<8x128xf32> to vector<8x128xbf16>
    %cst_100 = arith.constant dense<0.000000e+00> : vector<8x384xf32>
    %489 = tpu.matmul %488, %5, %cst_100 {dimension_numbers = #tpu.dot_dimension_numbers<[1], [0], [0], [1], [0, 0, 1, 1], [], []>} : vector<8x128xbf16>, vector<128x384xbf16>, vector<8x384xf32> -> vector<8x384xf32>
    %490 = arith.addf %489, %9 : vector<8x384xf32>
    %491 = arith.truncf %457 : vector<8x128xf32> to vector<8x128xbf16>
    %cst_101 = arith.constant dense<0.000000e+00> : vector<8x384xf32>
    %492 = tpu.matmul %491, %6, %cst_101 {dimension_numbers = #tpu.dot_dimension_numbers<[1], [0], [0], [1], [0, 0, 1, 1], [], []>} : vector<8x128xbf16>, vector<128x384xbf16>, vector<8x384xf32> -> vector<8x384xf32>
    %493 = vector.extract_strided_slice %490 {offsets = [0, 0], sizes = [8, 128], strides = [1, 1]} : vector<8x384xf32> to vector<8x128xf32>
    %494 = vector.extract_strided_slice %492 {offsets = [0, 0], sizes = [8, 128], strides = [1, 1]} : vector<8x384xf32> to vector<8x128xf32>
    %495 = arith.addf %493, %494 : vector<8x128xf32>
    %496 = arith.negf %495 : vector<8x128xf32>
    %497 = math.exp %496 : vector<8x128xf32>
    %cst_102 = arith.constant 1.000000e+00 : f32
    %498 = vector.broadcast %cst_102 : f32 to vector<8x128xf32>
    %499 = arith.addf %498, %497 : vector<8x128xf32>
    %500 = arith.divf %498, %499 : vector<8x128xf32>
    %501 = vector.extract_strided_slice %490 {offsets = [0, 128], sizes = [8, 128], strides = [1, 1]} : vector<8x384xf32> to vector<8x128xf32>
    %502 = vector.extract_strided_slice %492 {offsets = [0, 128], sizes = [8, 128], strides = [1, 1]} : vector<8x384xf32> to vector<8x128xf32>
    %503 = arith.addf %501, %502 : vector<8x128xf32>
    %504 = arith.negf %503 : vector<8x128xf32>
    %505 = math.exp %504 : vector<8x128xf32>
    %cst_103 = arith.constant 1.000000e+00 : f32
    %506 = vector.broadcast %cst_103 : f32 to vector<8x128xf32>
    %507 = arith.addf %506, %505 : vector<8x128xf32>
    %508 = arith.divf %506, %507 : vector<8x128xf32>
    %509 = vector.extract_strided_slice %490 {offsets = [0, 256], sizes = [8, 128], strides = [1, 1]} : vector<8x384xf32> to vector<8x128xf32>
    %510 = vector.extract_strided_slice %492 {offsets = [0, 256], sizes = [8, 128], strides = [1, 1]} : vector<8x384xf32> to vector<8x128xf32>
    %511 = arith.addf %510, %12 : vector<8x128xf32>
    %512 = arith.mulf %500, %511 : vector<8x128xf32>
    %513 = arith.addf %509, %512 : vector<8x128xf32>
    %514 = math.tanh %513 : vector<8x128xf32>
    %cst_104 = arith.constant 1.000000e+00 : f32
    %515 = vector.broadcast %cst_104 : f32 to vector<8x128xf32>
    %516 = arith.subf %515, %508 : vector<8x128xf32>
    %517 = arith.mulf %516, %514 : vector<8x128xf32>
    %518 = arith.mulf %508, %457 : vector<8x128xf32>
    %519 = arith.addf %517, %518 : vector<8x128xf32>
    %520 = tpu.iota {dimensions = array<i32: 0>} : vector<8x1xi32>
    %c4_i32 = arith.constant 4 : i32
    %521 = vector.broadcast %c4_i32 : i32 to vector<8x1xi32>
    %522 = arith.cmpi slt, %520, %521 : vector<8x1xi32>
    %523 = arith.extui %522 : vector<8x1xi1> to vector<8x1xi32>
    %524 = arith.sitofp %523 : vector<8x1xi32> to vector<8x1xf32>
    %525 = vector.broadcast %524 : vector<8x1xf32> to vector<8x128xf32>
    %526 = arith.mulf %519, %525 : vector<8x128xf32>
    %cst_105 = arith.constant dense<0.000000e+00> : vector<128xf32>
    %527 = vector.multi_reduction <add>, %526, %cst_105 [0] : vector<8x128xf32> to vector<128xf32>
    %528 = vector.shape_cast %527 : vector<128xf32> to vector<1x128xf32>
    %cst_106 = arith.constant 2.500000e-01 : f32
    %529 = vector.broadcast %cst_106 : f32 to vector<1x128xf32>
    %530 = arith.mulf %528, %529 : vector<1x128xf32>
    %531 = vector.broadcast %530 : vector<1x128xf32> to vector<8x128xf32>
    %532 = arith.subf %519, %531 : vector<8x128xf32>
    %533 = vector.broadcast %524 : vector<8x1xf32> to vector<8x128xf32>
    %534 = arith.mulf %532, %533 : vector<8x128xf32>
    %535 = arith.mulf %534, %534 : vector<8x128xf32>
    %cst_107 = arith.constant dense<0.000000e+00> : vector<128xf32>
    %536 = vector.multi_reduction <add>, %535, %cst_107 [0] : vector<8x128xf32> to vector<128xf32>
    %537 = vector.shape_cast %536 : vector<128xf32> to vector<1x128xf32>
    %cst_108 = arith.constant 2.500000e-01 : f32
    %538 = vector.broadcast %cst_108 : f32 to vector<1x128xf32>
    %539 = arith.mulf %537, %538 : vector<1x128xf32>
    %540 = vector.broadcast %530 : vector<1x128xf32> to vector<8x128xf32>
    %541 = arith.subf %519, %540 : vector<8x128xf32>
    %cst_109 = arith.constant 9.99999974E-6 : f32
    %542 = vector.broadcast %cst_109 : f32 to vector<1x128xf32>
    %543 = arith.addf %539, %542 : vector<1x128xf32>
    %544 = math.rsqrt %543 : vector<1x128xf32>
    %545 = vector.broadcast %544 : vector<1x128xf32> to vector<8x128xf32>
    %546 = arith.mulf %541, %545 : vector<8x128xf32>
    %c0_110 = arith.constant 0 : index
    %c0_111 = arith.constant 0 : index
    %547 = vector.load %arg10[%c0_110, %c0_111] : memref<1x128xf32, #tpu.memory_space<vmem>>, vector<1x128xf32>
    %548 = vector.broadcast %547 : vector<1x128xf32> to vector<8x128xf32>
    %549 = arith.mulf %546, %548 : vector<8x128xf32>
    %c0_112 = arith.constant 0 : index
    %c0_113 = arith.constant 0 : index
    %550 = vector.load %arg11[%c0_112, %c0_113] : memref<1x128xf32, #tpu.memory_space<vmem>>, vector<1x128xf32>
    %551 = vector.broadcast %550 : vector<1x128xf32> to vector<8x128xf32>
    %552 = arith.addf %549, %551 : vector<8x128xf32>
    %c0_114 = arith.constant 0 : index
    %c0_115 = arith.constant 0 : index
    %553 = vector.load %arg12[%c0_114, %c0_115] : memref<128x64xf32, #tpu.memory_space<vmem>>, vector<128x64xf32>
    %cst_116 = arith.constant dense<0.000000e+00> : vector<8x64xf32>
    %554 = tpu.matmul %552, %553, %cst_116 {dimension_numbers = #tpu.dot_dimension_numbers<[1], [0], [0], [1], [0, 0, 1, 1], [], []>} : vector<8x128xf32>, vector<128x64xf32>, vector<8x64xf32> -> vector<8x64xf32>
    %c0_117 = arith.constant 0 : index
    %c0_118 = arith.constant 0 : index
    %555 = vector.load %arg13[%c0_117, %c0_118] : memref<1x64xf32, #tpu.memory_space<vmem>>, vector<1x64xf32>
    %556 = vector.broadcast %555 : vector<1x64xf32> to vector<8x64xf32>
    %557 = arith.addf %554, %556 : vector<8x64xf32>
    %cst_119 = arith.constant 0.000000e+00 : f32
    %558 = vector.broadcast %cst_119 : f32 to vector<8x64xf32>
    %559 = arith.maximumf %557, %558 : vector<8x64xf32>
    %c0_120 = arith.constant 0 : index
    %c0_121 = arith.constant 0 : index
    %560 = vector.load %arg14[%c0_120, %c0_121] : memref<64x4xf32, #tpu.memory_space<vmem>>, vector<64x4xf32>
    %cst_122 = arith.constant dense<0.000000e+00> : vector<8x4xf32>
    %561 = tpu.matmul %559, %560, %cst_122 {dimension_numbers = #tpu.dot_dimension_numbers<[1], [0], [0], [1], [0, 0, 1, 1], [], []>} : vector<8x64xf32>, vector<64x4xf32>, vector<8x4xf32> -> vector<8x4xf32>
    %c0_123 = arith.constant 0 : index
    %c0_124 = arith.constant 0 : index
    %562 = vector.load %arg15[%c0_123, %c0_124] : memref<1x4xf32, #tpu.memory_space<vmem>>, vector<1x4xf32>
    %563 = vector.broadcast %562 : vector<1x4xf32> to vector<8x4xf32>
    %564 = arith.addf %561, %563 : vector<8x4xf32>
    %565 = vector.extract_strided_slice %564 {offsets = [0, 0], sizes = [4, 4], strides = [1, 1]} : vector<8x4xf32> to vector<4x4xf32>
    %c0_125 = arith.constant 0 : index
    %c0_126 = arith.constant 0 : index
    %566 = vector.load %arg16[%c0_125, %c0_126] : memref<4x4xf32, #tpu.memory_space<vmem>>, vector<4x4xf32>
    tpu.vector_store %arg16[%c0_125, %c0_126], %565 {strides = array<i32>} : memref<4x4xf32, #tpu.memory_space<vmem>>, vector<4x4xf32>,
    return
  }
}

</mosaic_0001>

<bundles_post_ra>
// kernel: gru_v3_forward.1
= control target key start
LH: loop header
LB: loop body
LE: loop exit
PB: predicated region body
PF: predicated region fallthrough
CT: control target
= control target key end

     0   :  { %s4976_s0 = inlined_call_operand.vmem [shape: f32[64,16], index: 0, kind: input, shape index: {}]   ;;  %s4977_s1 = inlined_call_operand.vmem [shape: f32[2,8,128], index: 1, kind: input, shape index: {}]   ;;  %s4978_s2 = inlined_call_operand.vmem [shape: bf16[16,384], index: 2, kind: input, shape index: {}]   ;;  %s4979_s3 = inlined_call_operand.vmem [shape: bf16[128,384], index: 3, kind: input, shape index: {}]   ;;  %s4980_s4 = inlined_call_operand.vmem [shape: f32[1,384], index: 4, kind: input, shape index: {}]   ;;  %s4981_s5 = inlined_call_operand.vmem [shape: f32[1,128], index: 5, kind: input, shape index: {}]   ;;  %s4982_s6 = inlined_call_operand.vmem [shape: bf16[128,384], index: 6, kind: input, shape index: {}]   ;;  %s4983_s7 = inlined_call_operand.vmem [shape: bf16[128,384], index: 7, kind: input, shape index: {}]   ;;  %s4984_s8 = inlined_call_operand.vmem [shape: f32[1,384], index: 8, kind: input, shape index: {}]   ;;  %s4985_s9 = inlined_call_operand.vmem [shape: f32[1,128], index: 9, kind: input, shape index: {}]   ;;  %s4986_s10 = inlined_call_operand.vmem [shape: f32[1,128], index: 10, kind: input, shape index: {}]   ;;  %s4987_s11 = inlined_call_operand.vmem [shape: f32[1,128], index: 11, kind: input, shape index: {}]   ;;  %s4988_s12 = inlined_call_operand.vmem [shape: f32[128,64], index: 12, kind: input, shape index: {}]   ;;  %s4989_s13 = inlined_call_operand.vmem [shape: f32[1,64], index: 13, kind: input, shape index: {}]   ;;  %s4990_s14 = inlined_call_operand.vmem [shape: f32[64,4], index: 14, kind: input, shape index: {}]   ;;  %s4991_s15 = inlined_call_operand.vmem [shape: f32[1,4], index: 15, kind: input, shape index: {}]   ;;  %s4992_s16 = inlined_call_operand.hbm [shape: f32[4,4], index: 16, kind: output, shape index: {}]  }
   0x1   :  { %5111 = sst [smem:[#allocation80_spill]] %s4976_s0 }
   0x2   :  { %v2605_v0 = vld [vmem:[%s4978_s2] sm:$0xf]  ;;  %v2951_v1 = vld [vmem:[%s4978_s2 + $0x8] sm:$0xf0]  ;;  %v2714_v2 = vld [vmem:[%s4979_s3 + $0xa8] sm:$0xf] }
   0x3   :  { %v2606_v3 = vor.u32 %v2951_v1, %v2605_v0  ;;  %v2975_v4 = vld [vmem:[%s4979_s3 + $0xb0] sm:$0xf0]  ;;  %s5112_s0 = sld [smem:[#allocation80_spill]]  ;;  %v2702_v9 = vld [vmem:[%s4979_s3 + $0x90] sm:$0xf]  ;;  %vm207_vm0 = vcmask 130048  }
   0x4   :  { %v3330_v7 = vor.u32 %v2975_v4, %v2714_v2  ;;  %v2972_v10 = vld [vmem:[%s4979_s3 + $0x98] sm:$0xf0]  ;;  %v2690_v12 = vld [vmem:[%s4979_s3 + $0x78] sm:$0xf]  ;;  %v2969_v13 = vld [vmem:[%s4979_s3 + $0x80] sm:$0xf0] }
   0x5   :  { %227 = vmatpush.bf16.msra.mxu0 %v2606_v3  ;;  %v3341_v11 = vor.u32 %v2972_v10, %v2702_v9  ;;  %v2722_v14 = vld [vmem:[%s4979_s3 + $0xb0] sm:$0xf]  ;;  %v2976_v15 = vld [vmem:[%s4979_s3 + $0xb8] sm:$0xf0]  ;;  %v3360_v17 = vor.u32 %v2969_v13, %v2690_v12  ;;  %v2710_v18 = vld [vmem:[%s4979_s3 + $0x98] sm:$0xf] }
   0x6   :  { %5113 = vst [vmem:[#allocation6_spill] sm:$0xff] %v3330_v7  ;;  %466 = vmatpush.bf16.msra.mxu3 %v3330_v7  ;;  %v3357_v16 = vor.u32 %v2976_v15, %v2722_v14  ;;  %v2678_v19 = vld [vmem:[%s4979_s3 + $0x60] sm:$0xf]  ;;  %v2966_v20 = vld [vmem:[%s4979_s3 + $0x68] sm:$0xf0] }
   0x7   :  { %5114 = vst [vmem:[#allocation7_spill] sm:$0xff] %v3341_v11  ;;  %v2973_v21 = vld [vmem:[%s4979_s3 + $0xa0] sm:$0xf0]  ;;  %v2698_v23 = vld [vmem:[%s4979_s3 + $0x80] sm:$0xf]  ;;  %v3381_v24 = vor.u32 %v2966_v20, %v2678_v19 }
   0x8   :  { %5115 = vst [vmem:[#allocation8_spill] sm:$0xff] %v3360_v17  ;;  %v3375_v22 = vor.u32 %v2973_v21, %v2710_v18  ;;  %v2666_v25 = vld [vmem:[%s4979_s3 + $0x48] sm:$0xf]  ;;  %v2963_v26 = vld [vmem:[%s4979_s3 + $0x50] sm:$0xf0] }
   0x9   :  { %v171_v5 = vld [vmem:[%s5112_s0] sm:$0xff]  ;;  %v172_v6 = vld [vmem:[%s5112_s0 + $0x8] sm:$0xff]  ;;  %492 = vmatpush.bf16.msrb.mxu0 %v3357_v16  ;;  %5116 = vst [vmem:[#allocation9_spill] sm:$0xff] %v3381_v24  ;;  %v173_v28 = vld [vmem:[%s5112_s0 + $0x10] sm:$0xff] }
   0xa   :  { %v3332_v8 = vpack.c.bf16 %v172_v6, %v171_v5  ;;  %467 = vmatpush.bf16.msra.mxu3 %v3341_v11  ;;  %v2970_v27 = vld [vmem:[%s4979_s3 + $0x88] sm:$0xf0]  ;;  %v174_v29 = vld [vmem:[%s5112_s0 + $0x18] sm:$0xff] }
   0xb   :  { %v3399_v30 = vor.u32 %v2970_v27, %v2698_v23 }
   0xc   :  { %2615 = vmatmul.msk.bf16.vlgmr.msra.gmra.mxu0 %vm207_vm0, %v3332_v8 }
   0xd   :  { %493 = vmatpush.bf16.msrb.mxu0 %v3375_v22 }
   0xe   :  { %468 = vmatpush.bf16.msra.mxu3 %v3360_v17 }
   0xf   :  { %21 = vsyncpa [#allocation4], 0  ;;  %v3402_v31 = vor.u32 %v2963_v26, %v2666_v25  ;;  %v2654_v32 = vld [vmem:[%s4979_s3 + $0x30] sm:$0xf]  ;;  %v2960_v33 = vld [vmem:[%s4979_s3 + $0x38] sm:$0xf0]  ;;  %v3417_v36 = vpack.c.bf16 %v174_v29, %v173_v28 }
  0x10   :  { %v2686_v34 = vld [vmem:[%s4979_s3 + $0x68] sm:$0xf]  ;;  %v2967_v35 = vld [vmem:[%s4979_s3 + $0x70] sm:$0xf0]  ;;  %v3422_v38 = vor.u32 %v2960_v33, %v2654_v32  ;;  %v2642_v39 = vld [vmem:[%s4979_s3 + $0x18] sm:$0xf] }
  0x11   :  { %5117 = vst [vmem:[#allocation10_spill] sm:$0xff] %v3402_v31  ;;  %494 = vmatpush.bf16.msrb.mxu0 %v3399_v30  ;;  %v3419_v37 = vor.u32 %v2967_v35, %v2686_v34  ;;  %v2957_v40 = vld [vmem:[%s4979_s3 + $0x20] sm:$0xf0]  ;;  %v2674_v41 = vld [vmem:[%s4979_s3 + $0x50] sm:$0xf]  ;;  %v176_v3 = vld [vmem:[%s5112_s0 + $0x28] sm:$0xff] }
  0x12   :  { %469 = vmatpush.bf16.msra.mxu3 %v3381_v24  ;;  %5118 = vst [vmem:[#allocation11_spill] sm:$0xff] %v3422_v38  ;;  %v2964_v42 = vld [vmem:[%s4979_s3 + $0x58] sm:$0xf0]  ;;  %v2950_v44 = vld [vmem:[%s4978_s2 + $0x4] sm:$0xf]  ;;  %v3448_v47 = vor.u32 %v2957_v40, %v2642_v39  ;;  %v177_v27 = vld [vmem:[%s5112_s0 + $0x30] sm:$0xff] }
  0x13   :  { %v3439_v43 = vor.u32 %v2964_v42, %v2674_v41  ;;  %v2607_v45 = vld [vmem:[%s4978_s2 + $0xc] sm:$0xf0]  ;;  %v2630_v48 = vld [vmem:[%s4979_s3] sm:$0xf]  ;;  %v2954_v49 = vld [vmem:[%s4979_s3 + $0x8] sm:$0xf0] }
  0x14   :  { %v2610_v46 = vor.u32 %v2950_v44, %v2607_v45  ;;  %5119 = vst [vmem:[#allocation12_spill] sm:$0xff] %v3448_v47  ;;  %v2662_v50 = vld [vmem:[%s4979_s3 + $0x38] sm:$0xf]  ;;  %v2961_v51 = vld [vmem:[%s4979_s3 + $0x40] sm:$0xf0]  ;;  %v3472_v55 = vor.u32 %v2954_v49, %v2630_v48  ;;  %s3226_s22 = smov [#allocation3]  }
  0x15   :  { %495 = vmatpush.bf16.msrb.mxu0 %v3419_v37  ;;  %v2974_v52 = vld [vmem:[%s4979_s3 + $0xac] sm:$0xf]  ;;  %v2716_v53 = vld [vmem:[%s4979_s3 + $0xb4] sm:$0xf0]  ;;  %v3469_v54 = vor.u32 %v2961_v51, %v2662_v50  ;;  %v3477_v56 = vld [vmem:[%s4977_s1] sm:$0xff]  ;;  %s2592_s23 = sshll.u32 %s3226_s22, 4  ;;  %s2593_s23 = int_to_ptr.vmem [resolvable:$true] %s2592_s23 }
  0x16   :  { %470 = vmatpush.bf16.msra.mxu3 %v3402_v31  ;;  %256 = vmatpush.bf16.msra.mxu1 %v2610_v46  ;;  %5120 = vst [vmem:[#allocation13_spill] sm:$0xff] %v3472_v55  ;;  %v3481_v57 = vor.u32 %v2974_v52, %v2716_v53  ;;  %v2613_v58 = vld [vmem:[%s4978_s2 + $0x8] sm:$0xf]  ;;  %v2952_v59 = vld [vmem:[%s4978_s2 + $0x10] sm:$0xf0]  ;;  %v337_v1 = vpack.c.bf16 %v3477_v56, %v3477_v56  ;;  %v175_v2 = vld [vmem:[%s5112_s0 + $0x20] sm:$0xff] }
  0x17   :  { %v2650_v60 = vld [vmem:[%s4979_s3 + $0x20] sm:$0xf]  ;;  %v2971_v61 = vld [vmem:[%s4979_s3 + $0x94] sm:$0xf]  ;;  %v2614_v63 = vor.u32 %v2952_v59, %v2613_v58  ;;  %v2958_v0 = vld [vmem:[%s4979_s3 + $0x28] sm:$0xf0]  ;;  %v181_v12 = vpack.c.bf16 %v176_v3, %v175_v2 }
  0x18   :  { %5121 = vst [vmem:[#allocation14_spill] sm:$0xff] %v3481_v57  ;;  %v2704_v62 = vld [vmem:[%s4979_s3 + $0x9c] sm:$0xf0]  ;;  %v3510_v4 = vor.u32 %v2958_v0, %v2650_v60  ;;  %v2638_v5 = vld [vmem:[%s4979_s3 + $0x8] sm:$0xf]  ;;  %v178_v28 = vld [vmem:[%s5112_s0 + $0x38] sm:$0xff] }
  0x19   :  { %496 = vmatpush.bf16.msrb.mxu0 %v3439_v43  ;;  %2619 = vmatmul.msk.bf16.vlgmr.msra.gmra.mxu1 %vm207_vm0, %v3332_v8  ;;  %v2955_v6 = vld [vmem:[%s4979_s3 + $0x10] sm:$0xf0]  ;;  %v3520_v9 = vor.u32 %v2971_v61, %v2704_v62  ;;  %v2968_v13 = vld [vmem:[%s4979_s3 + $0x7c] sm:$0xf]  ;;  %v2692_v14 = vld [vmem:[%s4979_s3 + $0x84] sm:$0xf0]  ;;  %v182_v32 = vpack.c.bf16 %v178_v28, %v177_v27 }
  0x1a   :  { %471 = vmatpush.bf16.msra.mxu3 %v3422_v38  ;;  %285 = vmatpush.bf16.msra.mxu2 %v2614_v63  ;;  %v3523_v10 = vor.u32 %v2955_v6, %v2638_v5  ;;  %v3534_v15 = vor.u32 %v2968_v13, %v2692_v14  ;;  %v2965_v18 = vld [vmem:[%s4979_s3 + $0x64] sm:$0xf]  ;;  %v2680_v19 = vld [vmem:[%s4979_s3 + $0x6c] sm:$0xf0]  ;;  %v2668_v21 = vld [vmem:[%s4979_s3 + $0x54] sm:$0xf0] }
  0x1b   :  { %5122 = vst [vmem:[#allocation15_spill] sm:$0xff] %v3520_v9  ;;  %v3545_v20 = vor.u32 %v2965_v18, %v2680_v19  ;;  %v2959_v25 = vld [vmem:[%s4979_s3 + $0x34] sm:$0xf]  ;;  %v2656_v26 = vld [vmem:[%s4979_s3 + $0x3c] sm:$0xf0] }
  0x1c   :  { %2616 = vmatmul.msk.bf16.gmra.mxu0 %vm207_vm0, %v3417_v36  ;;  %5123 = vst [vmem:[#allocation16_spill] sm:$0xff] %v3534_v15  ;;  %v3571_v29 = vor.u32 %v2959_v25, %v2656_v26  ;;  %v2956_v33 = vld [vmem:[%s4979_s3 + $0x1c] sm:$0xf]  ;;  %v2644_v34 = vld [vmem:[%s4979_s3 + $0x24] sm:$0xf0] }
  0x1d   :  { %497 = vmatpush.bf16.msrb.mxu0 %v3469_v54  ;;  %2623 = vmatmul.msk.bf16.vlgmr.msra.gmra.mxu2 %vm207_vm0, %v3332_v8  ;;  %5124 = vst [vmem:[#allocation17_spill] sm:$0xff] %v3545_v20  ;;  %v2962_v8 = vld [vmem:[%s4979_s3 + $0x4c] sm:$0xf]  ;;  %v3582_v35 = vor.u32 %v2956_v33, %v2644_v34  ;;  %v2953_v39 = vld [vmem:[%s4979_s3 + $0x4] sm:$0xf] }
  0x1e   :  { %472 = vmatpush.bf16.msra.mxu3 %v3448_v47  ;;  %v3556_v23 = vor.u32 %v2962_v8, %v2668_v21  ;;  %5126 = vst [vmem:[#allocation19_spill] sm:$0xff] %v3571_v29  ;;  %v2632_v40 = vld [vmem:[%s4979_s3 + $0xc] sm:$0xf0]  ;;  %v2908_v44 = vld [vmem:[%s4983_s7 + $0xa8] sm:$0xf] }
  0x1f   :  { %5127 = vst [vmem:[#allocation20_spill] sm:$0xff] %v3582_v35  ;;  %v3592_v41 = vor.u32 %v2953_v39, %v2632_v40  ;;  %v3023_v45 = vld [vmem:[%s4983_s7 + $0xb0] sm:$0xf0]  ;;  %v2812_v48 = vld [vmem:[%s4982_s6 + $0xa8] sm:$0xf] }
  0x20   :  { %5125 = vst [vmem:[#allocation18_spill] sm:$0xff] %v3556_v23  ;;  %v3609_v46 = vor.u32 %v3023_v45, %v2908_v44  ;;  %v2999_v49 = vld [vmem:[%s4982_s6 + $0xb0] sm:$0xf0]  ;;  %v3621_v50 = vld [vmem:[%s4980_s4] sm:$0x7] }
  0x21   :  { %498 = vmatpush.bf16.msrb.mxu0 %v3510_v4  ;;  %5128 = vst [vmem:[#allocation21_spill] sm:$0xff] %v3592_v41  ;;  %v3623_v51 = vor.u32 %v2999_v49, %v2812_v48  ;;  %v2896_v52 = vld [vmem:[%s4983_s7 + $0x90] sm:$0xf]  ;;  %v3020_v53 = vld [vmem:[%s4983_s7 + $0x98] sm:$0xf0]  ;;  %v3635_v59 = vperm.slane %v3621_v50, 0 }
  0x22   :  { %473 = vmatpush.bf16.msra.mxu3 %v3472_v55  ;;  %5130 = vst [vmem:[#allocation23_spill] sm:$0xff] %v3609_v46  ;;  %v3631_v58 = vor.u32 %v3020_v53, %v2896_v52  ;;  %v2800_v60 = vld [vmem:[%s4982_s6 + $0x90] sm:$0xf]  ;;  %v2996_v61 = vld [vmem:[%s4982_s6 + $0x98] sm:$0xf0] }
  0x23   :  { %682 = vmatpush.bf16.msrb.mxu1 %v3623_v51  ;;  %5132 = vst [vmem:[#allocation25_spill] sm:$0xff] %v3635_v59  ;;  %v3644_v63 = vor.u32 %v2996_v61, %v2800_v60  ;;  %v2884_v0 = vld [vmem:[%s4983_s7 + $0x78] sm:$0xf]  ;;  %v2993_v6 = vld [vmem:[%s4982_s6 + $0x80] sm:$0xf0] }
  0x24   :  { %5131 = vst [vmem:[#allocation24_spill] sm:$0xff] %v3631_v58  ;;  %v2788_v5 = vld [vmem:[%s4982_s6 + $0x78] sm:$0xf]  ;;  %v2872_v13 = vld [vmem:[%s4983_s7 + $0x60] sm:$0xf] }
  0x25   :  { %474 = vmatmul.bf16.vlgmr.msra.gmra.mxu3 %v337_v1  ;;  %499 = vmatpush.bf16.msrb.mxu0 %v3523_v10  ;;  %v3014_v14 = vld [vmem:[%s4983_s7 + $0x68] sm:$0xf0]  ;;  %v2776_v19 = vld [vmem:[%s4982_s6 + $0x60] sm:$0xf]  ;;  %v2820_v26 = vld [vmem:[%s4982_s6 + $0xb0] sm:$0xf] }
  0x26   :  { %479 = vmatpush.bf16.msrb.mxu3 %v3481_v57  ;;  %v3673_v18 = vor.u32 %v3014_v14, %v2872_v13  ;;  %v2990_v8 = vld [vmem:[%s4982_s6 + $0x68] sm:$0xf0]  ;;  %v3000_v27 = vld [vmem:[%s4982_s6 + $0xb8] sm:$0xf0]  ;;  %v2860_v28 = vld [vmem:[%s4983_s7 + $0x48] sm:$0xf] }
  0x27   :  { %683 = vmatpush.bf16.msrb.mxu1 %v3644_v63  ;;  %v3685_v25 = vor.u32 %v2990_v8, %v2776_v19  ;;  %v3011_v33 = vld [vmem:[%s4983_s7 + $0x50] sm:$0xf0]  ;;  %v2764_v34 = vld [vmem:[%s4982_s6 + $0x48] sm:$0xf]  ;;  %v2808_v45 = vld [vmem:[%s4982_s6 + $0x98] sm:$0xf] }
  0x28   :  { %5135 = vst [vmem:[#allocation28_spill] sm:$0xff] %v3673_v18  ;;  %v2987_v39 = vld [vmem:[%s4982_s6 + $0x50] sm:$0xf0]  ;;  %v3708_v40 = vor.u32 %v3011_v33, %v2860_v28  ;;  %v2997_v48 = vld [vmem:[%s4982_s6 + $0xa0] sm:$0xf0] }
  0x29   :  { %2620 = vmatmul.msk.bf16.gmra.mxu1 %vm207_vm0, %v3417_v36  ;;  %850 = vmatpush.bf16.msra.mxu0 %v3609_v46  ;;  %v3710_v44 = vor.u32 %v2987_v39, %v2764_v34  ;;  %v2848_v49 = vld [vmem:[%s4983_s7 + $0x30] sm:$0xf]  ;;  %v3722_v52 = vor.u32 %v2997_v48, %v2808_v45  ;;  %v3008_v53 = vld [vmem:[%s4983_s7 + $0x38] sm:$0xf0]  ;;  %v2814_v13 = vld [vmem:[%s4982_s6 + $0xb4] sm:$0xf0] }
  0x2a   :  { %480 = vmatpush.bf16.msrb.mxu3 %v3520_v9  ;;  %5138 = vst [vmem:[#allocation31_spill] sm:$0xff] %v3708_v40  ;;  %v3728_v60 = vor.u32 %v3008_v53, %v2848_v49  ;;  %v2796_v14 = vld [vmem:[%s4982_s6 + $0x80] sm:$0xf]  ;;  %v3005_v28 = vld [vmem:[%s4983_s7 + $0x20] sm:$0xf0] }
  0x2b   :  { %5139 = vst [vmem:[#allocation32_spill] sm:$0xff] %v3722_v52  ;;  %v2740_v45 = vld [vmem:[%s4982_s6 + $0x18] sm:$0xf]  ;;  %v2981_v48 = vld [vmem:[%s4982_s6 + $0x20] sm:$0xf0] }
  0x2c   :  { %2617 = vmatmul.msk.bf16.gmra.mxu0 %vm207_vm0, %v181_v12  ;;  %5140 = vst [vmem:[#allocation33_spill] sm:$0xff] %v3728_v60  ;;  %v3780_v49 = vor.u32 %v2981_v48, %v2740_v45  ;;  %v2995_v53 = vld [vmem:[%s4982_s6 + $0x94] sm:$0xf]  ;;  %v2992_v48 = vld [vmem:[%s4982_s6 + $0x7c] sm:$0xf] }
  0x2d   :  { %2624 = vmatmul.msk.bf16.gmra.mxu2 %vm207_vm0, %v3417_v36  ;;  %851 = vmatpush.bf16.msra.mxu0 %v3631_v58 }
  0x2e   :  { %481 = vmatpush.bf16.msrb.mxu3 %v3534_v15 }
  0x32   :  { %482 = vmatpush.bf16.msrb.mxu3 %v3545_v20 }
  0x36   :  { %483 = vmatpush.bf16.msrb.mxu3 %v3556_v23 }
  0x39   :  { %2621 = vmatmul.msk.bf16.gmra.mxu1 %vm207_vm0, %v181_v12 }
  0x3a   :  { %484 = vmatpush.bf16.msrb.mxu3 %v3571_v29 }
  0x3c   :  { %2618 = vmatmul.msk.bf16.gmra.mxu0 %vm207_vm0, %v182_v32 }
  0x3d   :  { %2625 = vmatmul.msk.bf16.gmra.mxu2 %vm207_vm0, %v181_v12  ;;  %v3664_v12 = vor.u32 %v2993_v6, %v2788_v5  ;;  %v2998_v6 = vld [vmem:[%s4982_s6 + $0xac] sm:$0xf] }
  0x3e   :  { %485 = vmatpush.bf16.msrb.mxu3 %v3582_v35  ;;  %v3755_v8 = vor.u32 %v2998_v6, %v2814_v13  ;;  %v2991_v13 = vld [vmem:[%s4982_s6 + $0x70] sm:$0xf0] }
  0x3f   :  { %684 = vmatpush.bf16.msrb.mxu1 %v3664_v12 }
  0x40   :  { %695 = vmatpush.bf16.msrb.mxu2 %v3755_v8 }
  0x42   :  { %486 = vmatpush.bf16.msrb.mxu3 %v3592_v41 }
  0x43   :  { %685 = vmatpush.bf16.msrb.mxu1 %v3685_v25 }
  0x45   :  { %487 = vmatmul.bf16.vlgmr.msrb.gmra.mxu3 %v337_v1 }
  0x47   :  { %686 = vmatpush.bf16.msrb.mxu1 %v3710_v44 }
  0x49   :  { %2622 = vmatmul.msk.bf16.gmra.mxu1 %vm207_vm0, %v182_v32 }
  0x4c   :  { %500 = vmatmul.bf16.vlgmr.msrb.gmra.mxu0 %v337_v1  ;;  %v3017_v1 = vld [vmem:[%s4983_s7 + $0x80] sm:$0xf0] }
  0x4d   :  { %2626 = vmatmul.msk.bf16.gmra.mxu2 %vm207_vm0, %v182_v32  ;;  %v3655_v3 = vor.u32 %v3017_v1, %v2884_v0  ;;  %v3696_v32 = vor.u32 %v3000_v27, %v2820_v26  ;;  %v2984_v0 = vld [vmem:[%s4982_s6 + $0x38] sm:$0xf0]  ;;  %v2994_v26 = vld [vmem:[%s4982_s6 + $0x88] sm:$0xf0]  ;;  %v2836_v27 = vld [vmem:[%s4983_s7 + $0x18] sm:$0xf] }
  0x4e   :  { %v3767_v34 = vor.u32 %v2994_v26, %v2796_v14  ;;  %v2824_v14 = vld [vmem:[%s4983_s7] sm:$0xf]  ;;  %v3002_v26 = vld [vmem:[%s4983_s7 + $0x8] sm:$0xf0] }
  0x4f   :  { %5134 = vst [vmem:[#allocation27_spill] sm:$0xff] %v3655_v3  ;;  %852 = vmatpush.bf16.msra.mxu0 %v3655_v3  ;;  %708 = vmatpush.bf16.msra.mxu3 %v3696_v32  ;;  %v3004_v3 = vld [vmem:[%s4983_s7 + $0x1c] sm:$0xf] }
  0x50   :  { %5137 = vst [vmem:[#allocation30_spill] sm:$0xff] %v3696_v32 }
  0x51   :  { %5142 = vst [vmem:[#allocation35_spill] sm:$0xff] %v3767_v34 }
  0x53   :  { %853 = vmatpush.bf16.msra.mxu0 %v3673_v18  ;;  %709 = vmatpush.bf16.msra.mxu3 %v3722_v52 }
  0x57   :  { %854 = vmatpush.bf16.msra.mxu0 %v3708_v40  ;;  %710 = vmatpush.bf16.msra.mxu3 %v3767_v34  ;;  %v2730_v40 = vld [vmem:[%s4982_s6 + $0xc] sm:$0xf0] }
  0x5b   :  { %855 = vmatpush.bf16.msra.mxu0 %v3728_v60 }
  0x89   :  { %v3599_v36 = vpop.f32.mrf.mxu0 }
  0x8a   :  { %v230_v19 = vadd.f32 %v3599_v36, %v3635_v59  ;;  %v3769_v36 = vor.u32 %v3005_v28, %v2836_v27  ;;  %v3808_v28 = vor.u32 %v3002_v26, %v2824_v14  ;;  %v2910_v14 = vld [vmem:[%s4983_s7 + $0xb4] sm:$0xf0] }
  0x8c   :  { %5143 = vst [vmem:[#allocation36_spill] sm:$0xff] %v3769_v36  ;;  %856 = vmatpush.bf16.msra.mxu0 %v3769_v36  ;;  %v3949_v36 = vperm.slane %v3621_v50, 1 }
  0x8d   :  { %5146 = vst [vmem:[#allocation39_spill] sm:$0xff] %v3808_v28 }
  0x8e   :  { %5157 = vst [vmem:[#allocation50_spill] sm:$0xff] %v3949_v36 }
  0x90   :  { %857 = vmatpush.bf16.msra.mxu0 %v3808_v28 }
  0x91   :  { %v3601_v42 = vpop.f32.mrf.mxu0 }
  0x92   :  { %5129 = vst [vmem:[#allocation22_spill] sm:$0xff] %v3601_v42  ;;  %v2986_v42 = vld [vmem:[%s4982_s6 + $0x4c] sm:$0xf] }
  0x94   :  { %953 = vmatpush.bf16.msrb.mxu0 %v3481_v57 }
  0x96   :  { %v258_v60 = vpop.f32.mrf.mxu1 }
  0x98   :  { %954 = vmatpush.bf16.msrb.mxu0 %v3520_v9 }
  0x99   :  { %v234_v62 = vpop.f32.mrf.mxu0 }
  0x9a   :  { %v3653_v2 = vadd.f32 %v234_v62, %v3635_v59  ;;  %v2752_v62 = vld [vmem:[%s4982_s6 + $0x30] sm:$0xf] }
  0x9b   :  { %v3742_v5 = vor.u32 %v2984_v0, %v2752_v62  ;;  %v2784_v62 = vld [vmem:[%s4982_s6 + $0x68] sm:$0xf] }
  0x9c   :  { %5133 = vst [vmem:[#allocation26_spill] sm:$0xff] %v3653_v2  ;;  %955 = vmatpush.bf16.msrb.mxu0 %v3534_v15  ;;  %v3013_v15 = vld [vmem:[%s4983_s7 + $0x64] sm:$0xf] }
  0x9d   :  { %687 = vmatpush.bf16.msrb.mxu1 %v3742_v5 }
  0xa0   :  { %956 = vmatpush.bf16.msrb.mxu0 %v3545_v20 }
  0xa1   :  { %v3683_v21 = vpop.f32.mrf.mxu0  ;;  %688 = vmatpush.bf16.msrb.mxu1 %v3780_v49 }
  0xa2   :  { %5136 = vst [vmem:[#allocation29_spill] sm:$0xff] %v3683_v21 }
  0xa4   :  { %957 = vmatpush.bf16.msrb.mxu0 %v3556_v23  ;;  %v3024_v23 = vld [vmem:[%s4983_s7 + $0xb8] sm:$0xf0] }
  0xa8   :  { %v475_v33 = vpop.f32.mrf.mxu3  ;;  %958 = vmatpush.bf16.msrb.mxu0 %v3571_v29 }
  0xa9   :  { %v239_v61 = vpop.f32.mrf.mxu0  ;;  %v505_v39 = vadd.f32 %v475_v33, %v230_v19  ;;  %v3800_v19 = vor.u32 %v2991_v13, %v2784_v62  ;;  %v2728_v33 = vld [vmem:[%s4982_s6] sm:$0xf]  ;;  %v3022_v13 = vld [vmem:[%s4983_s7 + $0xac] sm:$0xf] }
  0xaa   :  { %v3740_v1 = vadd.f32 %v239_v61, %v3635_v59  ;;  %v2802_v61 = vld [vmem:[%s4982_s6 + $0x9c] sm:$0xf0] }
  0xab   :  { %v2724_v0 = vmul.f32 -1.442695, %v505_v39  ;;  %v3791_v6 = vor.u32 %v2995_v53, %v2802_v61  ;;  %5144 = vst [vmem:[#allocation37_spill] sm:$0xff] %v3800_v19  ;;  %v2978_v39 = vld [vmem:[%s4982_s6 + $0x8] sm:$0xf0]  ;;  %711 = vmatpush.bf16.msra.mxu3 %v3800_v19 }
  0xac   :  { %5141 = vst [vmem:[#allocation34_spill] sm:$0xff] %v3740_v1  ;;  %v3817_v45 = vor.u32 %v2978_v39, %v2728_v33  ;;  %v2790_v53 = vld [vmem:[%s4982_s6 + $0x84] sm:$0xf0]  ;;  %v2772_v61 = vld [vmem:[%s4982_s6 + $0x50] sm:$0xf]  ;;  %v3844_v39 = vor.u32 %v3022_v13, %v2910_v14  ;;  %959 = vmatpush.bf16.msrb.mxu0 %v3582_v35 }
  0xad   :  { %3033 = vpow2.f32 %v2724_v0  ;;  %696 = vmatpush.bf16.msrb.mxu2 %v3791_v6  ;;  %v3829_v62 = vor.u32 %v2992_v48, %v2790_v53  ;;  %v2988_v0 = vld [vmem:[%s4982_s6 + $0x58] sm:$0xf0]  ;;  %v2989_v48 = vld [vmem:[%s4982_s6 + $0x64] sm:$0xf]  ;;  %v2778_v53 = vld [vmem:[%s4982_s6 + $0x6c] sm:$0xf0] }
  0xae   :  { %5147 = vst [vmem:[#allocation40_spill] sm:$0xff] %v3817_v45  ;;  %689 = vmatpush.bf16.msrb.mxu1 %v3817_v45  ;;  %v3842_v33 = vor.u32 %v2988_v0, %v2772_v61  ;;  %v2760_v61 = vld [vmem:[%s4982_s6 + $0x38] sm:$0xf]  ;;  %v3858_v13 = vor.u32 %v2989_v48, %v2778_v53  ;;  %v2985_v14 = vld [vmem:[%s4982_s6 + $0x40] sm:$0xf0] }
  0xaf   :  { %5149 = vst [vmem:[#allocation42_spill] sm:$0xff] %v3844_v39  ;;  %v3870_v1 = vor.u32 %v2985_v14, %v2760_v61  ;;  %v2982_v14 = vld [vmem:[%s4982_s6 + $0x28] sm:$0xf0] }
  0xb0   :  { %v477_v26 = vpop.f32.mrf.mxu3  ;;  %5148 = vst [vmem:[#allocation41_spill] sm:$0xff] %v3842_v33  ;;  %712 = vmatpush.bf16.msra.mxu3 %v3842_v33  ;;  %960 = vmatpush.bf16.msrb.mxu0 %v3592_v41  ;;  %v4058_v41 = vld [vmem:[%s4981_s5] ss:$0 sm:$0xff] }
  0xb1   :  { %v3805_v27 = vpop.f32.mrf.mxu0  ;;  %697 = vmatpush.bf16.msrb.mxu2 %v3829_v62  ;;  %v3019_v26 = vld [vmem:[%s4983_s7 + $0x94] sm:$0xf] }
  0xb2   :  { %5145 = vst [vmem:[#allocation38_spill] sm:$0xff] %v3805_v27  ;;  %863 = vmatpush.bf16.msra.mxu1 %v3844_v39  ;;  %v2898_v27 = vld [vmem:[%s4983_s7 + $0x9c] sm:$0xf0] }
  0xb3   :  { %v3034_v0 = vpop.eup %3033  ;;  %v3872_v21 = vor.u32 %v3019_v26, %v2898_v27  ;;  %v2766_v27 = vld [vmem:[%s4982_s6 + $0x54] sm:$0xf0] }
  0xb4   :  { %v3875_v53 = vadd.f32 1.0, %v3034_v0  ;;  %713 = vmatpush.bf16.msra.mxu3 %v3870_v1  ;;  %v3888_v61 = vor.u32 %v2986_v42, %v2766_v27  ;;  %v2748_v0 = vld [vmem:[%s4982_s6 + $0x20] sm:$0xf]  ;;  %v2886_v42 = vld [vmem:[%s4983_s7 + $0x84] sm:$0xf0] }
  0xb5   :  { %5150 = vst [vmem:[#allocation43_spill] sm:$0xff] %v3872_v21  ;;  %698 = vmatpush.bf16.msrb.mxu2 %v3858_v13  ;;  %v3897_v26 = vor.u32 %v2982_v14, %v2748_v0  ;;  %v2983_v0 = vld [vmem:[%s4982_s6 + $0x34] sm:$0xf]  ;;  %v2754_v14 = vld [vmem:[%s4982_s6 + $0x3c] sm:$0xf0] }
  0xb6   :  { %864 = vmatpush.bf16.msra.mxu1 %v3872_v21  ;;  %3035 = vrcp.f32 %v3875_v53  ;;  %v2838_v21 = vld [vmem:[%s4983_s7 + $0x24] sm:$0xf0]  ;;  %vm515_vm2 = vweird.f32 %v3875_v53  ;;  %v519_v35 = vand.u32 2147483647, %v3875_v53 }
  0xb8   :  { %714 = vmatpush.bf16.msra.mxu3 %v3897_v26  ;;  %vm520_vm4 = vcmp.eq.f32.partialorder %v519_v35, 8.507059e+37 }
  0xb9   :  { %v244_v48 = vpop.f32.mrf.mxu0  ;;  %699 = vmatpush.bf16.msrb.mxu2 %v3888_v61 }
  0xba   :  { %v3878_v2 = vadd.f32 %v244_v48, %v3635_v59  ;;  %v3016_v48 = vld [vmem:[%s4983_s7 + $0x7c] sm:$0xf]  ;;  %v3928_v59 = vld [vmem:[%s4977_s1 + $0x8] sm:$0xff] }
  0xbb   :  { %v3906_v27 = vor.u32 %v3016_v48, %v2886_v42  ;;  %v3920_v48 = vor.u32 %v2983_v0, %v2754_v14  ;;  %v2979_v42 = vld [vmem:[%s4982_s6 + $0x10] sm:$0xf0]  ;;  %5153 = vst [vmem:[#allocation46_spill] sm:$0xff] %v3928_v59  ;;  %v3938_v0 = vpack.c.bf16 %v3928_v59, %v3928_v59  ;;  %v2874_v14 = vld [vmem:[%s4983_s7 + $0x6c] sm:$0xf0] }
  0xbc   :  { %5151 = vst [vmem:[#allocation44_spill] sm:$0xff] %v3878_v2  ;;  %v2736_v2 = vld [vmem:[%s4982_s6 + $0x8] sm:$0xf]  ;;  %v3946_v28 = vor.u32 %v3013_v15, %v2874_v14  ;;  %v3010_v14 = vld [vmem:[%s4983_s7 + $0x4c] sm:$0xf]  ;;  %v3969_v59 = vpop.eup %3035 }
  0xbd   :  { %5152 = vst [vmem:[#allocation45_spill] sm:$0xff] %v3906_v27  ;;  %865 = vmatpush.bf16.msra.mxu1 %v3906_v27  ;;  %v3934_v9 = vor.u32 %v2979_v42, %v2736_v2  ;;  %700 = vmatpush.bf16.msrb.mxu2 %v3920_v48  ;;  %v2980_v2 = vld [vmem:[%s4982_s6 + $0x1c] sm:$0xf]  ;;  %v2742_v42 = vld [vmem:[%s4982_s6 + $0x24] sm:$0xf0]  ;;  %vm516_vm1 = vweird.f32 %v3969_v59 }
  0xbe   :  { %5156 = vst [vmem:[#allocation49_spill] sm:$0xff] %v3946_v28  ;;  %858 = vmatmul.bf16.vlgmr.msra.gmra.mxu0 %v3938_v0  ;;  %v3961_v15 = vor.u32 %v2980_v2, %v2742_v42  ;;  %v259_v2 = vadd.f32 %v258_v60, %v3949_v36  ;;  %v2977_v42 = vld [vmem:[%s4982_s6 + $0x4] sm:$0xf]  ;;  %v2916_v36 = vld [vmem:[%s4983_s7 + $0xb0] sm:$0xf]  ;;  %vm517_vm3 = vmor %vm515_vm2, %vm516_vm1 }
  0xbf   :  { %5154 = vst [vmem:[#allocation47_spill] sm:$0xff] %v3934_v9  ;;  %715 = vmatpush.bf16.msra.mxu3 %v3934_v9  ;;  %v3989_v60 = vor.u32 %v2977_v42, %v2730_v40  ;;  %1054 = vmatpush.bf16.msra.mxu0 %v3696_v32 }
  0xc1   :  { %v3943_v57 = vpop.f32.mrf.mxu0  ;;  %866 = vmatpush.bf16.msra.mxu1 %v3946_v28  ;;  %701 = vmatpush.bf16.msrb.mxu2 %v3961_v15  ;;  %v3007_v28 = vld [vmem:[%s4983_s7 + $0x34] sm:$0xf]  ;;  %5159 = vst [vmem:[#allocation52_spill] sm:$0xff] %v3989_v60 }
  0xc2   :  { %5155 = vst [vmem:[#allocation48_spill] sm:$0xff] %v3943_v57  ;;  %v2862_v57 = vld [vmem:[%s4983_s7 + $0x54] sm:$0xf0] }
  0xc3   :  { %940 = vmatpush.bf16.msrb.mxu3 %v3330_v7  ;;  %v3972_v20 = vor.u32 %v3010_v14, %v2862_v57  ;;  %v511_v57 = vmul.f32 %v3969_v59, %v3875_v53  ;;  %v2850_v14 = vld [vmem:[%s4983_s7 + $0x3c] sm:$0xf0]  ;;  %1055 = vmatpush.bf16.msra.mxu0 %v3722_v52 }
  0xc4   :  { %v4001_v18 = vor.u32 %v3007_v28, %v2850_v14  ;;  %v3021_v28 = vld [vmem:[%s4983_s7 + $0xa0] sm:$0xf0] }
  0xc5   :  { %5158 = vst [vmem:[#allocation51_spill] sm:$0xff] %v3972_v20  ;;  %867 = vmatpush.bf16.msra.mxu1 %v3972_v20  ;;  %v4003_v20 = vor.u32 %v3024_v23, %v2916_v36  ;;  %702 = vmatpush.bf16.msrb.mxu2 %v3989_v60  ;;  %v512_v29 = vsub.f32 1.0, %v511_v57  ;;  %v4015_v23 = vor.u32 %v3004_v3, %v2838_v21  ;;  %v2904_v36 = vld [vmem:[%s4983_s7 + $0x98] sm:$0xf]  ;;  %v3001_v3 = vld [vmem:[%s4983_s7 + $0x4] sm:$0xf] }
  0xc6   :  { %5160 = vst [vmem:[#allocation53_spill] sm:$0xff] %v4001_v18  ;;  %v4024_v14 = vor.u32 %v3021_v28, %v2904_v36  ;;  %v2826_v21 = vld [vmem:[%s4983_s7 + $0xc] sm:$0xf0]  ;;  %v3018_v36 = vld [vmem:[%s4983_s7 + $0x88] sm:$0xf0] }
  0xc7   :  { %941 = vmatpush.bf16.msrb.mxu3 %v3341_v11  ;;  %5161 = vst [vmem:[#allocation54_spill] sm:$0xff] %v4003_v20  ;;  %v513_v57 = vmul.f32 %v3969_v59, %v512_v29  ;;  %1056 = vmatpush.bf16.msra.mxu0 %v3767_v34 }
  0xc8   :  { %v488_v40 = vpop.f32.mrf.mxu3  ;;  %5162 = vst [vmem:[#allocation55_spill] sm:$0xff] %v4015_v23 }
  0xc9   :  { %v501_v42 = vpop.f32.mrf.mxu0  ;;  %v525_v27 = vadd.f32 %v488_v40, %v259_v2  ;;  %876 = vmatpush.bf16.msra.mxu2 %v4003_v20  ;;  %868 = vmatpush.bf16.msra.mxu1 %v4001_v18  ;;  %5163 = vst [vmem:[#allocation56_spill] sm:$0xff] %v4024_v14  ;;  %v2892_v40 = vld [vmem:[%s4983_s7 + $0x80] sm:$0xf] }
  0xca   :  { %v4045_v28 = vor.u32 %v3018_v36, %v2892_v40  ;;  %v514_v40 = vadd.f32 %v3969_v59, %v513_v57  ;;  %v2868_v57 = vld [vmem:[%s4983_s7 + $0x50] sm:$0xf] }
  0xcb   :  { %942 = vmatpush.bf16.msrb.mxu3 %v3360_v17  ;;  %v2725_v2 = vmul.f32 -1.442695, %v525_v27  ;;  %v4036_v27 = vor.u32 %v3001_v3, %v2826_v21  ;;  %v2880_v3 = vld [vmem:[%s4983_s7 + $0x68] sm:$0xf]  ;;  %v3015_v21 = vld [vmem:[%s4983_s7 + $0x70] sm:$0xf0]  ;;  %1057 = vmatpush.bf16.msra.mxu0 %v3800_v19 }
  0xcc   :  { %5165 = vst [vmem:[#allocation58_spill] sm:$0xff] %v4045_v28  ;;  %v4064_v36 = vor.u32 %v3015_v21, %v2880_v3  ;;  %v3012_v3 = vld [vmem:[%s4983_s7 + $0x58] sm:$0xf0]  ;;  %v518_v21 = vsel %vm517_vm3, %v3969_v59, %v514_v40  ;;  %v2856_v59 = vld [vmem:[%s4983_s7 + $0x38] sm:$0xf] }
  0xcd   :  { %3037 = vpow2.f32 %v2725_v2  ;;  %877 = vmatpush.bf16.msra.mxu2 %v4024_v14  ;;  %869 = vmatpush.bf16.msra.mxu1 %v4015_v23  ;;  %5164 = vst [vmem:[#allocation57_spill] sm:$0xff] %v4036_v27  ;;  %v4083_v23 = vor.u32 %v3012_v3, %v2868_v57  ;;  %v2844_v3 = vld [vmem:[%s4983_s7 + $0x20] sm:$0xf] }
  0xce   :  { %5166 = vst [vmem:[#allocation59_spill] sm:$0xff] %v4064_v36 }
  0xcf   :  { %943 = vmatpush.bf16.msrb.mxu3 %v3381_v24  ;;  %5168 = vst [vmem:[#allocation61_spill] sm:$0xff] %v4083_v23  ;;  %1058 = vmatpush.bf16.msra.mxu0 %v3842_v33 }
  0xd0   :  { %v490_v2 = vpop.f32.mrf.mxu3 }
  0xd1   :  { %v503_v29 = vpop.f32.mrf.mxu0  ;;  %878 = vmatpush.bf16.msra.mxu2 %v4045_v28  ;;  %870 = vmatpush.bf16.msra.mxu1 %v4036_v27  ;;  %v287_v27 = vpop.f32.mrf.mxu2 }
  0xd2   :  { %v521_v29 = vand.u32 2147483648, %v3875_v53  ;;  %v4080_v53 = vperm.slane %v3621_v50, 2  ;;  %v3009_v50 = vld [vmem:[%s4983_s7 + $0x40] sm:$0xf0] }
  0xd3   :  { %944 = vmatpush.bf16.msrb.mxu3 %v3402_v31  ;;  %v3038_v2 = vpop.eup %3037  ;;  %1059 = vmatpush.bf16.msra.mxu0 %v3870_v1 }
  0xd4   :  { %v529_v32 = vadd.f32 1.0, %v3038_v2  ;;  %v545_v2 = vadd.f32 %v4058_v41, %v501_v42  ;;  %5167 = vst [vmem:[#allocation60_spill] sm:$0xff] %v4080_v53  ;;  %v522_v52 = vor.u32 1.1754944e-38, %v521_v29  ;;  %v288_v40 = vadd.f32 %v287_v27, %v4080_v53 }
  0xd5   :  { %879 = vmatpush.bf16.msra.mxu2 %v4064_v36  ;;  %v4095_v29 = vor.u32 %v3009_v50, %v2856_v59 }
  0xd6   :  { %3039 = vrcp.f32 %v529_v32  ;;  %v523_v18 = vsel %vm520_vm4, %v522_v52, %v518_v21  ;;  %v539_v50 = vand.u32 2147483647, %v529_v32  ;;  %vm535_vm6 = vweird.f32 %v529_v32 }
  0xd7   :  { %945 = vmatpush.bf16.msrb.mxu3 %v3422_v38  ;;  %v546_v42 = vmul.f32 %v545_v2, %v523_v18  ;;  %5169 = vst [vmem:[#allocation62_spill] sm:$0xff] %v4095_v29  ;;  %v3006_v18 = vld [vmem:[%s4983_s7 + $0x28] sm:$0xf0]  ;;  %v541_v2 = vand.u32 2147483648, %v529_v32  ;;  %1060 = vmatpush.bf16.msra.mxu0 %v3897_v26 }
  0xd8   :  { %v4106_v21 = vor.u32 %v3006_v18, %v2844_v3  ;;  %vm540_vm8 = vcmp.eq.f32.partialorder %v539_v50, 8.507059e+37  ;;  %v5181_v50 = vld [vmem:[#allocation36_spill] sm:$0xff] }
  0xd9   :  { %880 = vmatpush.bf16.msra.mxu2 %v4083_v23  ;;  %v547_v57 = vadd.f32 %v546_v42, %v288_v40  ;;  %v2832_v42 = vld [vmem:[%s4983_s7 + $0x8] sm:$0xf]  ;;  %v3003_v40 = vld [vmem:[%s4983_s7 + $0x10] sm:$0xf0]  ;;  %v542_v18 = vor.u32 1.1754944e-38, %v541_v2  ;;  %v5179_v2 = vld [vmem:[#allocation33_spill] sm:$0xff] }
  0xda   :  { %5170 = vst [vmem:[#allocation63_spill] sm:$0xff] %v4106_v21 }
  0xdb   :  { %946 = vmatpush.bf16.msrb.mxu3 %v3448_v47  ;;  %3041 = vtanh.f32 %v547_v57  ;;  %1061 = vmatpush.bf16.msra.mxu0 %v3934_v9 }
  0xdc   :  { %v3040_v35 = vpop.eup %3039 }
  0xdd   :  { %v531_v52 = vmul.f32 %v3040_v35, %v529_v32  ;;  %881 = vmatpush.bf16.msra.mxu2 %v4095_v29  ;;  %vm536_vm5 = vweird.f32 %v3040_v35 }
  0xde   :  { %vm537_vm7 = vmor %vm535_vm6, %vm536_vm5 }
  0xdf   :  { %947 = vmatpush.bf16.msrb.mxu3 %v3472_v55  ;;  %v532_v27 = vsub.f32 1.0, %v531_v52  ;;  %v4116_v52 = vor.u32 %v3003_v40, %v2832_v42  ;;  %v5182_v40 = vld [vmem:[#allocation55_spill] sm:$0xff] }
  0xe1   :  { %v533_v59 = vmul.f32 %v3040_v35, %v532_v27  ;;  %882 = vmatpush.bf16.msra.mxu2 %v4106_v21  ;;  %5171 = vst [vmem:[#allocation64_spill] sm:$0xff] %v4116_v52  ;;  %v3042_v34 = vpop.eup %3041 }
  0xe3   :  { %v534_v3 = vadd.f32 %v3040_v35, %v533_v59  ;;  %v5180_v59 = vld [vmem:[#allocation53_spill] sm:$0xff] }
  0xe5   :  { %v538_v27 = vsel %vm537_vm7, %v3040_v35, %v534_v3  ;;  %883 = vmatpush.bf16.msra.mxu2 %v4116_v52  ;;  %v5178_v35 = vld [vmem:[#allocation51_spill] sm:$0xff]  ;;  %v260_v3 = vpop.f32.mrf.mxu1 }
  0xe6   :  { %v543_v33 = vsel %vm540_vm8, %v542_v18, %v538_v27  ;;  %v5183_v18 = vld [vmem:[#allocation39_spill] sm:$0xff]  ;;  %v5184_v27 = vld [vmem:[#allocation57_spill] sm:$0xff] }
  0xe7   :  { %v549_v19 = vsub.f32 1.0, %v543_v33  ;;  %v551_v57 = vmul.f32 %v543_v33, %v3477_v56  ;;  %v5172_v56 = vld [vmem:[#allocation43_spill] sm:$0xff]  ;;  %v5175_v33 = vld [vmem:[#allocation28_spill] sm:$0xff] }
  0xe9   :  { %v550_v53 = vmul.f32 %v3042_v34, %v549_v19  ;;  %v5173_v34 = vld [vmem:[#allocation27_spill] sm:$0xff]  ;;  %v5174_v19 = vld [vmem:[#allocation45_spill] sm:$0xff] }
  0xeb   :  { %v4122_v42 = vadd.f32 %v551_v57, %v550_v53  ;;  %v5177_v53 = vld [vmem:[#allocation31_spill] sm:$0xff]  ;;  %v5185_v57 = vld [vmem:[#allocation14_spill] sm:$0xff] }
  0xed   :  { %v553_v32 = vpack.c.bf16 %v4122_v42, %v4122_v42 }
  0xef   :  { %690 = vmatmul.bf16.vlgmr.msrb.gmra.mxu1 %v553_v32  ;;  %703 = vmatmul.bf16.vlgmr.msrb.gmra.mxu2 %v553_v32 }
  0xf0   :  { %716 = vmatmul.bf16.vlgmr.msra.gmra.mxu3 %v553_v32  ;;  %961 = vmatmul.bf16.vlgmr.msrb.gmra.mxu0 %v553_v32 }
  0xf1   :  { %966 = vmatpush.bf16.msrb.mxu1 %v3357_v16  ;;  %1028 = vmatpush.bf16.msrb.mxu2 %v3623_v51 }
  0xf2   :  { %1041 = vmatpush.bf16.msra.mxu3 %v3755_v8  ;;  %1158 = vmatpush.bf16.msrb.mxu0 %v3330_v7 }
  0xf5   :  { %967 = vmatpush.bf16.msrb.mxu1 %v3375_v22  ;;  %1029 = vmatpush.bf16.msrb.mxu2 %v3644_v63 }
  0xf6   :  { %1042 = vmatpush.bf16.msra.mxu3 %v3791_v6  ;;  %1159 = vmatpush.bf16.msrb.mxu0 %v3341_v11 }
  0xf9   :  { %968 = vmatpush.bf16.msrb.mxu1 %v3399_v30  ;;  %1030 = vmatpush.bf16.msrb.mxu2 %v3664_v12 }
  0xfa   :  { %1043 = vmatpush.bf16.msra.mxu3 %v3829_v62  ;;  %1160 = vmatpush.bf16.msrb.mxu0 %v3360_v17 }
  0xfd   :  { %969 = vmatpush.bf16.msrb.mxu1 %v3419_v37  ;;  %1031 = vmatpush.bf16.msrb.mxu2 %v3685_v25 }
  0xfe   :  { %1044 = vmatpush.bf16.msra.mxu3 %v3858_v13  ;;  %1161 = vmatpush.bf16.msrb.mxu0 %v3381_v24 }
  0xff   :  { %871 = vmatmul.bf16.vlgmr.msra.gmra.mxu1 %v3938_v0  ;;  %884 = vmatmul.bf16.vlgmr.msra.gmra.mxu2 %v3938_v0  ;;  %v5176_v0 = vld [vmem:[#allocation49_spill] sm:$0xff] }
 0x100   :  { %948 = vmatmul.bf16.vlgmr.msrb.gmra.mxu3 %v553_v32 }
 0x101   :  { %970 = vmatpush.bf16.msrb.mxu1 %v3439_v43  ;;  %1032 = vmatpush.bf16.msrb.mxu2 %v3710_v44 }
 0x102   :  { %1045 = vmatpush.bf16.msra.mxu3 %v3888_v61  ;;  %1162 = vmatpush.bf16.msrb.mxu0 %v3402_v31 }
 0x105   :  { %971 = vmatpush.bf16.msrb.mxu1 %v3469_v54  ;;  %1033 = vmatpush.bf16.msrb.mxu2 %v3742_v5 }
 0x106   :  { %1046 = vmatpush.bf16.msra.mxu3 %v3920_v48  ;;  %1163 = vmatpush.bf16.msrb.mxu0 %v3422_v38 }
 0x109   :  { %972 = vmatpush.bf16.msrb.mxu1 %v3510_v4  ;;  %1034 = vmatpush.bf16.msrb.mxu2 %v3780_v49 }
 0x10a   :  { %1047 = vmatpush.bf16.msra.mxu3 %v3961_v15  ;;  %1164 = vmatpush.bf16.msrb.mxu0 %v3448_v47 }
 0x10d   :  { %973 = vmatpush.bf16.msrb.mxu1 %v3523_v10  ;;  %1035 = vmatpush.bf16.msrb.mxu2 %v3817_v45 }
 0x10e   :  { %1048 = vmatpush.bf16.msra.mxu3 %v3989_v60  ;;  %1165 = vmatpush.bf16.msrb.mxu0 %v3472_v55  ;;  %v5206_v55 = vld [vmem:[#allocation50_spill] sm:$0xff] }
 0x110   :  { %974 = vmatmul.bf16.vlgmr.msrb.gmra.mxu1 %v553_v32  ;;  %v4186_v32 = vpop.f32.mrf.mxu2 }
 0x111   :  { %1068 = vmatpush.bf16.msra.mxu1 %v3609_v46  ;;  %1081 = vmatpush.bf16.msra.mxu2 %v3844_v39 }
 0x112   :  { %1094 = vmatpush.bf16.msrb.mxu3 %v4003_v20 }
 0x115   :  { %1069 = vmatpush.bf16.msra.mxu1 %v3631_v58  ;;  %1082 = vmatpush.bf16.msra.mxu2 %v5172_v56 }
 0x116   :  { %1095 = vmatpush.bf16.msrb.mxu3 %v4024_v14 }
 0x119   :  { %1070 = vmatpush.bf16.msra.mxu1 %v5173_v34  ;;  %1083 = vmatpush.bf16.msra.mxu2 %v5174_v19 }
 0x11a   :  { %1096 = vmatpush.bf16.msrb.mxu3 %v4045_v28 }
 0x11d   :  { %1071 = vmatpush.bf16.msra.mxu1 %v5175_v33  ;;  %1084 = vmatpush.bf16.msra.mxu2 %v5176_v0 }
 0x11e   :  { %1097 = vmatpush.bf16.msrb.mxu3 %v4064_v36 }
 0x121   :  { %1072 = vmatpush.bf16.msra.mxu1 %v5177_v53  ;;  %1085 = vmatpush.bf16.msra.mxu2 %v5178_v35  ;;  %v5197_v35 = vld [vmem:[#allocation21_spill] sm:$0xff] }
 0x122   :  { %1098 = vmatpush.bf16.msrb.mxu3 %v4083_v23  ;;  %v5195_v23 = vld [vmem:[#allocation20_spill] sm:$0xff] }
 0x125   :  { %1073 = vmatpush.bf16.msra.mxu1 %v5179_v2  ;;  %1086 = vmatpush.bf16.msra.mxu2 %v5180_v59  ;;  %v5186_v59 = vld [vmem:[#allocation15_spill] sm:$0xff]  ;;  %v5190_v2 = vld [vmem:[#allocation17_spill] sm:$0xff] }
 0x126   :  { %1099 = vmatpush.bf16.msrb.mxu3 %v4095_v29  ;;  %v4189_v29 = vpop.f32.mrf.mxu1 }
 0x127   :  { %5187 = vst [vmem:[#allocation65_spill] sm:$0xff] %v4189_v29 }
 0x129   :  { %1074 = vmatpush.bf16.msra.mxu1 %v5181_v50  ;;  %1087 = vmatpush.bf16.msra.mxu2 %v5182_v40  ;;  %v5188_v50 = vld [vmem:[#allocation16_spill] sm:$0xff]  ;;  %v4192_v40 = vpop.f32.mrf.mxu2 }
 0x12a   :  { %1100 = vmatpush.bf16.msrb.mxu3 %v4106_v21  ;;  %5189 = vst [vmem:[#allocation66_spill] sm:$0xff] %v4192_v40 }
 0x12d   :  { %1075 = vmatpush.bf16.msra.mxu1 %v5183_v18  ;;  %1088 = vmatpush.bf16.msra.mxu2 %v5184_v27  ;;  %v5192_v18 = vld [vmem:[#allocation18_spill] sm:$0xff] }
 0x12e   :  { %1101 = vmatpush.bf16.msrb.mxu3 %v4116_v52  ;;  %v4195_v21 = vpop.f32.mrf.mxu1 }
 0x12f   :  { %5191 = vst [vmem:[#allocation67_spill] sm:$0xff] %v4195_v21 }
 0x131   :  { %1171 = vmatpush.bf16.msrb.mxu1 %v5185_v57  ;;  %v5193_v57 = vld [vmem:[#allocation19_spill] sm:$0xff]  ;;  %v4199_v52 = vpop.f32.mrf.mxu2 }
 0x132   :  { %5194 = vst [vmem:[#allocation68_spill] sm:$0xff] %v4199_v52  ;;  %v159_v52 = vld [vmem:[%s4984_s8] sm:$0x7] }
 0x133   :  { %v4226_v33 = vperm.slane %v159_v52, 1 }
 0x135   :  { %1172 = vmatpush.bf16.msrb.mxu1 %v5186_v59  ;;  %5207 = vst [vmem:[#allocation78_spill] sm:$0xff] %v4226_v33 }
 0x136   :  { %v4202_v59 = vpop.f32.mrf.mxu1 }
 0x137   :  { %5196 = vst [vmem:[#allocation69_spill] sm:$0xff] %v4202_v59 }
 0x139   :  { %1173 = vmatpush.bf16.msrb.mxu1 %v5188_v50  ;;  %v4205_v50 = vpop.f32.mrf.mxu2 }
 0x13a   :  { %5198 = vst [vmem:[#allocation70_spill] sm:$0xff] %v4205_v50 }
 0x13b   :  { %v859_v27 = vpop.f32.mrf.mxu0 }
 0x13d   :  { %1174 = vmatpush.bf16.msrb.mxu1 %v5190_v2 }
 0x13e   :  { %v4207_v40 = vpop.f32.mrf.mxu1 }
 0x13f   :  { %5199 = vst [vmem:[#allocation71_spill] sm:$0xff] %v4207_v40 }
 0x141   :  { %1175 = vmatpush.bf16.msrb.mxu1 %v5192_v18  ;;  %v4209_v2 = vpop.f32.mrf.mxu2 }
 0x142   :  { %5200 = vst [vmem:[#allocation72_spill] sm:$0xff] %v4209_v2 }
 0x143   :  { %v861_v29 = vpop.f32.mrf.mxu0 }
 0x144   :  { %v4222_v29 = vperm.slane %v159_v52, 0 }
 0x145   :  { %1176 = vmatpush.bf16.msrb.mxu1 %v5193_v57 }
 0x146   :  { %v4211_v21 = vpop.f32.mrf.mxu1  ;;  %5205 = vst [vmem:[#allocation77_spill] sm:$0xff] %v4222_v29 }
 0x147   :  { %5201 = vst [vmem:[#allocation73_spill] sm:$0xff] %v4211_v21 }
 0x149   :  { %1177 = vmatpush.bf16.msrb.mxu1 %v5195_v23  ;;  %v4213_v18 = vpop.f32.mrf.mxu2 }
 0x14a   :  { %5202 = vst [vmem:[#allocation74_spill] sm:$0xff] %v4213_v18 }
 0x14d   :  { %1178 = vmatpush.bf16.msrb.mxu1 %v5197_v35 }
 0x14e   :  { %v4215_v57 = vpop.f32.mrf.mxu1 }
 0x14f   :  { %5203 = vst [vmem:[#allocation75_spill] sm:$0xff] %v4215_v57  ;;  %v261_v57 = vadd.f32 %v260_v3, %v5206_v55  ;;  %v5209_v3 = vld [vmem:[#allocation22_spill] sm:$0xff] }
 0x151   :  { %v4220_v59 = vpop.f32.mrf.mxu2 }
 0x152   :  { %5204 = vst [vmem:[#allocation76_spill] sm:$0xff] %v4220_v59 }
 0x16c   :  { %v691_v35 = vpop.f32.mrf.mxu1 }
 0x16d   :  { %v692_v50 = vadd.f32 %v691_v35, %v4222_v29  ;;  %v962_v40 = vpop.f32.mrf.mxu0 }
 0x16e   :  { %v999_v0 = vadd.f32 %v962_v40, %v261_v57 }
 0x16f   :  { %v889_v23 = vadd.f32 %v859_v27, %v692_v50  ;;  %v5208_v27 = vld [vmem:[#allocation25_spill] sm:$0xff] }
 0x170   :  { %v2921_v19 = vmul.f32 -1.442695, %v999_v0 }
 0x171   :  { %v2918_v2 = vmul.f32 -1.442695, %v889_v23 }
 0x172   :  { %v704_v53 = vpop.f32.mrf.mxu2 }
 0x173   :  { %3043 = vpow2.f32 %v2918_v2  ;;  %v717_v21 = vpop.f32.mrf.mxu3  ;;  %v705_v34 = vadd.f32 %v704_v53, %v4226_v33  ;;  %v4234_v53 = vld [vmem:[%s4985_s9] ss:$0 sm:$0xff] }
 0x174   :  { %v693_v18 = vpop.f32.mrf.mxu1  ;;  %5210 = vst [vmem:[#allocation22_spill] sm:$0xff] %v4234_v53 }
 0x175   :  { %v964_v36 = vpop.f32.mrf.mxu0 }
 0x176   :  { %v232_v36 = vadd.f32 %v5209_v3, %v5208_v27 }
 0x179   :  { %v3044_v47 = vpop.eup %3043 }
 0x17a   :  { %v893_v59 = vadd.f32 1.0, %v3044_v47  ;;  %v706_v28 = vpop.f32.mrf.mxu2 }
 0x17b   :  { %v719_v35 = vpop.f32.mrf.mxu3 }
 0x17c   :  { %3045 = vrcp.f32 %v893_v59  ;;  %v872_v50 = vpop.f32.mrf.mxu1  ;;  %vm899_vm10 = vweird.f32 %v893_v59 }
 0x17d   :  { %v909_v23 = vadd.f32 %v872_v50, %v705_v34  ;;  %3047 = vpow2.f32 %v2921_v19  ;;  %v905_v34 = vand.u32 2147483648, %v893_v59  ;;  %v903_v50 = vand.u32 2147483647, %v893_v59 }
 0x17f   :  { %v2919_v2 = vmul.f32 -1.442695, %v909_v23  ;;  %vm904_vm12 = vcmp.eq.f32.partialorder %v903_v50, 8.507059e+37 }
 0x181   :  { %3049 = vpow2.f32 %v2919_v2 }
 0x182   :  { %v3046_v18 = vpop.eup %3045  ;;  %v885_v40 = vpop.f32.mrf.mxu2 }
 0x183   :  { %v949_v57 = vpop.f32.mrf.mxu3  ;;  %v895_v29 = vmul.f32 %v3046_v18, %v893_v59  ;;  %v3048_v28 = vpop.eup %3047  ;;  %vm900_vm9 = vweird.f32 %v3046_v18 }
 0x184   :  { %v979_v55 = vadd.f32 %v949_v57, %v232_v36  ;;  %v874_v47 = vpop.f32.mrf.mxu1  ;;  %v4236_v23 = vadd.f32 1.0, %v3048_v28  ;;  %vm901_vm11 = vmor %vm899_vm10, %vm900_vm9 }
 0x185   :  { %v896_v0 = vsub.f32 1.0, %v895_v29  ;;  %v906_v29 = vor.u32 1.1754944e-38, %v905_v34 }
 0x186   :  { %v2920_v38 = vmul.f32 -1.442695, %v979_v55  ;;  %v929_v55 = vadd.f32 %v4234_v53, %v885_v40  ;;  %vm1009_vm6 = vweird.f32 %v4236_v23 }
 0x187   :  { %v3050_v19 = vpop.eup %3049  ;;  %v897_v35 = vmul.f32 %v3046_v18, %v896_v0  ;;  %v4240_v0 = vperm.slane %v159_v52, 2 }
 0x188   :  { %v913_v2 = vadd.f32 1.0, %v3050_v19  ;;  %3051 = vpow2.f32 %v2920_v38 }
 0x189   :  { %v898_v3 = vadd.f32 %v3046_v18, %v897_v35  ;;  %5211 = vst [vmem:[#allocation79_spill] sm:$0xff] %v4240_v0  ;;  %v718_v59 = vadd.f32 %v717_v21, %v4240_v0 }
 0x18a   :  { %3053 = vrcp.f32 %v913_v2  ;;  %v887_v36 = vpop.f32.mrf.mxu2  ;;  %vm919_vm14 = vweird.f32 %v913_v2 }
 0x18b   :  { %v902_v57 = vsel %vm901_vm11, %v3046_v18, %v898_v3  ;;  %v951_v47 = vpop.f32.mrf.mxu3  ;;  %3055 = vrcp.f32 %v4236_v23  ;;  %v925_v18 = vand.u32 2147483648, %v913_v2 }
 0x18c   :  { %v907_v27 = vsel %vm904_vm12, %v906_v29, %v902_v57  ;;  %v923_v47 = vand.u32 2147483647, %v913_v2 }
 0x18d   :  { %v975_v28 = vpop.f32.mrf.mxu1  ;;  %v930_v19 = vmul.f32 %v929_v55, %v907_v27 }
 0x18e   :  { %v3052_v33 = vpop.eup %3051  ;;  %vm924_vm0 = vcmp.eq.f32.partialorder %v923_v47, 8.507059e+37 }
 0x18f   :  { %v983_v38 = vadd.f32 1.0, %v3052_v33  ;;  %v931_v40 = vadd.f32 %v930_v19, %v718_v59  ;;  %v926_v33 = vor.u32 1.1754944e-38, %v925_v18 }
 0x190   :  { %v3054_v35 = vpop.eup %3053 }
 0x191   :  { %v915_v14 = vmul.f32 %v3054_v35, %v913_v2  ;;  %3057 = vrcp.f32 %v983_v38  ;;  %v3056_v34 = vpop.eup %3055  ;;  %vm920_vm13 = vweird.f32 %v3054_v35  ;;  %vm989_vm2 = vweird.f32 %v983_v38 }
 0x192   :  { %v1005_v50 = vmul.f32 %v3056_v34, %v4236_v23  ;;  %3059 = vtanh.f32 %v931_v40  ;;  %vm921_vm15 = vmor %vm919_vm14, %vm920_vm13  ;;  %v5212_v40 = vld [vmem:[#allocation46_spill] sm:$0xff]  ;;  %vm1010_vm5 = vweird.f32 %v3056_v34 }
 0x193   :  { %v916_v36 = vsub.f32 1.0, %v915_v14  ;;  %v995_v14 = vand.u32 2147483648, %v983_v38  ;;  %vm1011_vm7 = vmor %vm1009_vm6, %vm1010_vm5 }
 0x194   :  { %v1006_v21 = vsub.f32 1.0, %v1005_v50  ;;  %v1019_v50 = vadd.f32 %v4058_v41, %v975_v28  ;;  %v5214_v28 = vld [vmem:[#allocation30_spill] sm:$0xff] }
 0x195   :  { %v917_v3 = vmul.f32 %v3054_v35, %v916_v36  ;;  %v977_v52 = vpop.f32.mrf.mxu1  ;;  %v993_v36 = vand.u32 2147483647, %v983_v38  ;;  %v996_v18 = vor.u32 1.1754944e-38, %v995_v14  ;;  %v5216_v14 = vld [vmem:[#allocation35_spill] sm:$0xff] }
 0x196   :  { %v1007_v52 = vmul.f32 %v3056_v34, %v1006_v21 }
 0x197   :  { %v3058_v29 = vpop.eup %3057  ;;  %v918_v27 = vadd.f32 %v3054_v35, %v917_v3  ;;  %vm994_vm4 = vcmp.eq.f32.partialorder %v993_v36, 8.507059e+37 }
 0x198   :  { %v985_v55 = vmul.f32 %v3058_v29, %v983_v38  ;;  %v3060_v53 = vpop.eup %3059  ;;  %vm990_vm1 = vweird.f32 %v3058_v29  ;;  %v1008_v47 = vadd.f32 %v3056_v34, %v1007_v52  ;;  %v5217_v52 = vld [vmem:[#allocation37_spill] sm:$0xff] }
 0x199   :  { %v922_v57 = vsel %vm921_vm15, %v3054_v35, %v918_v27  ;;  %vm991_vm3 = vmor %vm989_vm2, %vm990_vm1 }
 0x19a   :  { %v986_v0 = vsub.f32 1.0, %v985_v55  ;;  %v927_v19 = vsel %vm924_vm0, %v926_v33, %v922_v57  ;;  %v5213_v33 = vld [vmem:[#allocation60_spill] sm:$0xff] }
 0x19b   :  { %v933_v59 = vsub.f32 1.0, %v927_v19  ;;  %v935_v31 = vmul.f32 %v5212_v40, %v927_v19  ;;  %v5215_v57 = vld [vmem:[#allocation32_spill] sm:$0xff]  ;;  %v5218_v40 = vld [vmem:[#allocation41_spill] sm:$0xff] }
 0x19c   :  { %v987_v56 = vmul.f32 %v3058_v29, %v986_v0 }
 0x19d   :  { %v934_v58 = vmul.f32 %v3060_v53, %v933_v59  ;;  %v290_v53 = vadd.f32 %v4186_v32, %v5213_v33 }
 0x19e   :  { %v988_v2 = vadd.f32 %v3058_v29, %v987_v56  ;;  %v1015_v56 = vand.u32 2147483648, %v4236_v23 }
 0x19f   :  { %v4245_v3 = vadd.f32 %v935_v31, %v934_v58  ;;  %v1013_v31 = vand.u32 2147483647, %v4236_v23 }
 0x1a0   :  { %v992_v35 = vsel %vm991_vm3, %v3058_v29, %v988_v2  ;;  %v1012_v29 = vsel %vm1011_vm7, %v3056_v34, %v1008_v47  ;;  %v1016_v55 = vor.u32 1.1754944e-38, %v1015_v56  ;;  %v5220_v2 = vld [vmem:[#allocation24_spill] sm:$0xff]  ;;  %v5224_v47 = vld [vmem:[#allocation27_spill] sm:$0xff] }
 0x1a1   :  { %v997_v27 = vsel %vm994_vm4, %v996_v18, %v992_v35  ;;  %v1067_v0 = vpack.c.bf16 %v4245_v3, %v4245_v3  ;;  %vm1014_vm8 = vcmp.eq.f32.partialorder %v1013_v31, 8.507059e+37  ;;  %v5221_v18 = vld [vmem:[#allocation43_spill] sm:$0xff]  ;;  %v5222_v35 = vld [vmem:[#allocation56_spill] sm:$0xff] }
 0x1a2   :  { %v1020_v38 = vmul.f32 %v1019_v50, %v997_v27  ;;  %v1017_v21 = vsel %vm1014_vm8, %v1016_v55, %v1012_v29  ;;  %v5223_v50 = vld [vmem:[#allocation11_spill] sm:$0xff]  ;;  %v5225_v27 = vld [vmem:[#allocation45_spill] sm:$0xff]  ;;  %v5228_v56 = vld [vmem:[#allocation28_spill] sm:$0xff] }
 0x1a3   :  { %1076 = vmatmul.bf16.vlgmr.msra.gmra.mxu1 %v1067_v0  ;;  %v1023_v32 = vsub.f32 1.0, %v1017_v21  ;;  %v1025_v36 = vmul.f32 %v1017_v21, %v4122_v42  ;;  %v5219_v42 = vld [vmem:[#allocation10_spill] sm:$0xff]  ;;  %v5230_v31 = vld [vmem:[#allocation59_spill] sm:$0xff]  ;;  %v5234_v21 = vld [vmem:[#allocation61_spill] sm:$0xff] }
 0x1a4   :  { %v1021_v58 = vadd.f32 %v1020_v38, %v290_v53  ;;  %1272 = vmatpush.bf16.msra.mxu1 %v5214_v28  ;;  %v5227_v53 = vld [vmem:[#allocation12_spill] sm:$0xff]  ;;  %v5229_v38 = vld [vmem:[#allocation49_spill] sm:$0xff]  ;;  %v5232_v29 = vld [vmem:[#allocation31_spill] sm:$0xff] }
 0x1a5   :  { %v5233_v55 = vld [vmem:[#allocation51_spill] sm:$0xff] }
 0x1a6   :  { %3061 = vtanh.f32 %v1021_v58  ;;  %v5231_v58 = vld [vmem:[#allocation13_spill] sm:$0xff] }
 0x1a8   :  { %1273 = vmatpush.bf16.msra.mxu1 %v5215_v57 }
 0x1ac   :  { %v3062_v19 = vpop.eup %3061  ;;  %1274 = vmatpush.bf16.msra.mxu1 %v5216_v14 }
 0x1ad   :  { %v1024_v59 = vmul.f32 %v3062_v19, %v1023_v32  ;;  %v5235_v32 = vld [vmem:[#allocation33_spill] sm:$0xff] }
 0x1ae   :  { %v5236_v19 = vld [vmem:[#allocation53_spill] sm:$0xff] }
 0x1af   :  { %v4259_v23 = vadd.f32 %v1025_v36, %v1024_v59  ;;  %v5237_v59 = vld [vmem:[#allocation62_spill] sm:$0xff]  ;;  %v5238_v36 = vld [vmem:[#allocation36_spill] sm:$0xff] }
 0x1b0   :  { %1275 = vmatpush.bf16.msra.mxu1 %v5217_v52 }
 0x1b1   :  { %v1027_v34 = vpack.c.bf16 %v4259_v23, %v4259_v23 }
 0x1b3   :  { %1036 = vmatmul.bf16.vlgmr.msrb.gmra.mxu2 %v1027_v34  ;;  %1049 = vmatmul.bf16.vlgmr.msra.gmra.mxu3 %v1027_v34 }
 0x1b4   :  { %1062 = vmatmul.bf16.vlgmr.msra.gmra.mxu0 %v1027_v34  ;;  %1179 = vmatmul.bf16.vlgmr.msrb.gmra.mxu1 %v1027_v34 }
 0x1b5   :  { %1184 = vmatpush.bf16.msrb.mxu2 %v3357_v16  ;;  %1246 = vmatpush.bf16.msra.mxu3 %v3623_v51 }
 0x1b6   :  { %1259 = vmatpush.bf16.msra.mxu0 %v3755_v8  ;;  %1276 = vmatpush.bf16.msra.mxu1 %v5218_v40 }
 0x1b9   :  { %1185 = vmatpush.bf16.msrb.mxu2 %v3375_v22  ;;  %1247 = vmatpush.bf16.msra.mxu3 %v3644_v63 }
 0x1ba   :  { %1260 = vmatpush.bf16.msra.mxu0 %v3791_v6  ;;  %1277 = vmatpush.bf16.msra.mxu1 %v3870_v1 }
 0x1bd   :  { %1186 = vmatpush.bf16.msrb.mxu2 %v3399_v30  ;;  %1248 = vmatpush.bf16.msra.mxu3 %v3664_v12 }
 0x1be   :  { %1261 = vmatpush.bf16.msra.mxu0 %v3829_v62  ;;  %1278 = vmatpush.bf16.msra.mxu1 %v3897_v26 }
 0x1c1   :  { %1187 = vmatpush.bf16.msrb.mxu2 %v3419_v37  ;;  %1249 = vmatpush.bf16.msra.mxu3 %v3685_v25 }
 0x1c2   :  { %1262 = vmatpush.bf16.msra.mxu0 %v3858_v13  ;;  %1279 = vmatpush.bf16.msra.mxu1 %v3934_v9 }
 0x1c3   :  { %1089 = vmatmul.bf16.vlgmr.msra.gmra.mxu2 %v1067_v0  ;;  %1102 = vmatmul.bf16.vlgmr.msrb.gmra.mxu3 %v1067_v0  ;;  %v5226_v0 = vld [vmem:[#allocation58_spill] sm:$0xff] }
 0x1c4   :  { %1166 = vmatmul.bf16.vlgmr.msrb.gmra.mxu0 %v1027_v34 }
 0x1c5   :  { %1188 = vmatpush.bf16.msrb.mxu2 %v3439_v43  ;;  %1250 = vmatpush.bf16.msra.mxu3 %v3710_v44 }
 0x1c6   :  { %1376 = vmatpush.bf16.msrb.mxu1 %v3330_v7  ;;  %1263 = vmatpush.bf16.msra.mxu0 %v3888_v61 }
 0x1c9   :  { %1189 = vmatpush.bf16.msrb.mxu2 %v3469_v54  ;;  %1251 = vmatpush.bf16.msra.mxu3 %v3742_v5 }
 0x1ca   :  { %1377 = vmatpush.bf16.msrb.mxu1 %v3341_v11  ;;  %1264 = vmatpush.bf16.msra.mxu0 %v3920_v48  ;;  %v5255_v11 = vld [vmem:[#allocation26_spill] sm:$0xff] }
 0x1cd   :  { %1190 = vmatpush.bf16.msrb.mxu2 %v3510_v4  ;;  %1252 = vmatpush.bf16.msra.mxu3 %v3780_v49 }
 0x1ce   :  { %1378 = vmatpush.bf16.msrb.mxu1 %v3360_v17  ;;  %1265 = vmatpush.bf16.msra.mxu0 %v3961_v15 }
 0x1d1   :  { %1191 = vmatpush.bf16.msrb.mxu2 %v3523_v10  ;;  %1253 = vmatpush.bf16.msra.mxu3 %v3817_v45 }
 0x1d2   :  { %1379 = vmatpush.bf16.msrb.mxu1 %v3381_v24  ;;  %1266 = vmatpush.bf16.msra.mxu0 %v3989_v60  ;;  %v5253_v24 = vld [vmem:[#allocation65_spill] sm:$0xff] }
 0x1d4   :  { %1192 = vmatmul.bf16.vlgmr.msrb.gmra.mxu2 %v1027_v34  ;;  %v5239_v34 = vld [vmem:[#allocation55_spill] sm:$0xff] }
 0x1d5   :  { %1286 = vmatpush.bf16.msra.mxu2 %v3609_v46  ;;  %1299 = vmatpush.bf16.msrb.mxu3 %v3844_v39 }
 0x1d6   :  { %1312 = vmatpush.bf16.msrb.mxu0 %v4003_v20  ;;  %1380 = vmatpush.bf16.msrb.mxu1 %v5219_v42  ;;  %v5243_v42 = vld [vmem:[#allocation14_spill] sm:$0xff] }
 0x1d9   :  { %1287 = vmatpush.bf16.msra.mxu2 %v5220_v2  ;;  %1300 = vmatpush.bf16.msrb.mxu3 %v5221_v18 }
 0x1da   :  { %1313 = vmatpush.bf16.msrb.mxu0 %v5222_v35  ;;  %1381 = vmatpush.bf16.msrb.mxu1 %v5223_v50  ;;  %v5241_v50 = vld [vmem:[#allocation39_spill] sm:$0xff] }
 0x1dd   :  { %1288 = vmatpush.bf16.msra.mxu2 %v5224_v47  ;;  %1301 = vmatpush.bf16.msrb.mxu3 %v5225_v27 }
 0x1de   :  { %1314 = vmatpush.bf16.msrb.mxu0 %v5226_v0  ;;  %1382 = vmatpush.bf16.msrb.mxu1 %v5227_v53  ;;  %v5240_v53 = vld [vmem:[#allocation63_spill] sm:$0xff] }
 0x1e1   :  { %1289 = vmatpush.bf16.msra.mxu2 %v5228_v56  ;;  %1302 = vmatpush.bf16.msrb.mxu3 %v5229_v38 }
 0x1e2   :  { %1315 = vmatpush.bf16.msrb.mxu0 %v5230_v31  ;;  %1383 = vmatpush.bf16.msrb.mxu1 %v5231_v58  ;;  %v5242_v58 = vld [vmem:[#allocation57_spill] sm:$0xff] }
 0x1e5   :  { %1290 = vmatpush.bf16.msra.mxu2 %v5232_v29  ;;  %1303 = vmatpush.bf16.msrb.mxu3 %v5233_v55  ;;  %v5244_v55 = vld [vmem:[#allocation64_spill] sm:$0xff] }
 0x1e6   :  { %1316 = vmatpush.bf16.msrb.mxu0 %v5234_v21  ;;  %v5245_v21 = vld [vmem:[#allocation15_spill] sm:$0xff] }
 0x1e9   :  { %1291 = vmatpush.bf16.msra.mxu2 %v5235_v32  ;;  %1304 = vmatpush.bf16.msrb.mxu3 %v5236_v19  ;;  %v5246_v32 = vld [vmem:[#allocation16_spill] sm:$0xff]  ;;  %v5247_v19 = vld [vmem:[#allocation17_spill] sm:$0xff] }
 0x1ea   :  { %1317 = vmatpush.bf16.msrb.mxu0 %v5237_v59  ;;  %v5248_v59 = vld [vmem:[#allocation18_spill] sm:$0xff] }
 0x1ed   :  { %1292 = vmatpush.bf16.msra.mxu2 %v5238_v36  ;;  %1305 = vmatpush.bf16.msrb.mxu3 %v5239_v34  ;;  %v5249_v36 = vld [vmem:[#allocation19_spill] sm:$0xff]  ;;  %v5250_v34 = vld [vmem:[#allocation20_spill] sm:$0xff] }
 0x1ee   :  { %1318 = vmatpush.bf16.msrb.mxu0 %v5240_v53  ;;  %v5251_v53 = vld [vmem:[#allocation21_spill] sm:$0xff] }
 0x1f1   :  { %1293 = vmatpush.bf16.msra.mxu2 %v5241_v50  ;;  %1306 = vmatpush.bf16.msrb.mxu3 %v5242_v58 }
 0x1f2   :  { %1319 = vmatpush.bf16.msrb.mxu0 %v5244_v55  ;;  %v5252_v55 = vld [vmem:[#allocation50_spill] sm:$0xff] }
 0x1f5   :  { %1389 = vmatpush.bf16.msrb.mxu2 %v5243_v42 }
 0x1f9   :  { %1390 = vmatpush.bf16.msrb.mxu2 %v5245_v21  ;;  %v264_v21 = vadd.f32 %v5253_v24, %v5252_v55 }
 0x1fd   :  { %1391 = vmatpush.bf16.msrb.mxu2 %v5246_v32 }
 0x201   :  { %1392 = vmatpush.bf16.msrb.mxu2 %v5247_v19  ;;  %v5254_v19 = vld [vmem:[#allocation77_spill] sm:$0xff] }
 0x205   :  { %1393 = vmatpush.bf16.msrb.mxu2 %v5248_v59 }
 0x209   :  { %1394 = vmatpush.bf16.msrb.mxu2 %v5249_v36 }
 0x20d   :  { %1395 = vmatpush.bf16.msrb.mxu2 %v5250_v34 }
 0x211   :  { %1396 = vmatpush.bf16.msrb.mxu2 %v5251_v53 }
 0x220   :  { %v1077_v50 = vpop.f32.mrf.mxu1 }
 0x228   :  { %v1079_v58 = vpop.f32.mrf.mxu1 }
 0x231   :  { %v4332_v29 = vpop.f32.mrf.mxu0  ;;  %v1180_v42 = vpop.f32.mrf.mxu1 }
 0x232   :  { %v1217_v31 = vadd.f32 %v1180_v42, %v264_v21  ;;  %v5256_v21 = vld [vmem:[#allocation78_spill] sm:$0xff] }
 0x234   :  { %v2925_v59 = vmul.f32 -1.442695, %v1217_v31 }
 0x236   :  { %v1037_v32 = vpop.f32.mrf.mxu2  ;;  %v1050_v38 = vpop.f32.mrf.mxu3  ;;  %3063 = vpow2.f32 %v2925_v59 }
 0x237   :  { %v1038_v56 = vadd.f32 %v1037_v32, %v5254_v19  ;;  %v1051_v55 = vadd.f32 %v1050_v38, %v5256_v21 }
 0x239   :  { %v1107_v17 = vadd.f32 %v1077_v50, %v1038_v56  ;;  %v1065_v36 = vpop.f32.mrf.mxu0  ;;  %v1182_v0 = vpop.f32.mrf.mxu1 }
 0x23b   :  { %v2922_v34 = vmul.f32 -1.442695, %v1107_v17 }
 0x23c   :  { %v3064_v47 = vpop.eup %3063 }
 0x23d   :  { %3065 = vpow2.f32 %v2922_v34  ;;  %v4339_v2 = vadd.f32 1.0, %v3064_v47 }
 0x23e   :  { %v1039_v53 = vpop.f32.mrf.mxu2  ;;  %v1052_v58 = vpop.f32.mrf.mxu3 }
 0x23f   :  { %vm1227_vm4 = vweird.f32 %v4339_v2 }
 0x241   :  { %v1167_v27 = vpop.f32.mrf.mxu0 }
 0x242   :  { %v1197_v35 = vadd.f32 %v1167_v27, %v5255_v11 }
 0x243   :  { %v3066_v18 = vpop.eup %3065 }
 0x244   :  { %v1111_v24 = vadd.f32 1.0, %v3066_v18  ;;  %v2924_v42 = vmul.f32 -1.442695, %v1197_v35 }
 0x246   :  { %3067 = vrcp.f32 %v1111_v24  ;;  %v1090_v50 = vpop.f32.mrf.mxu2  ;;  %v1103_v56 = vpop.f32.mrf.mxu3  ;;  %v1123_v47 = vand.u32 2147483648, %v1111_v24  ;;  %vm1117_vm10 = vweird.f32 %v1111_v24 }
 0x247   :  { %3069 = vpow2.f32 %v2924_v42  ;;  %v1127_v17 = vadd.f32 %v1090_v50, %v1051_v55  ;;  %v1121_v55 = vand.u32 2147483647, %v1111_v24 }
 0x248   :  { %3071 = vrcp.f32 %v4339_v2 }
 0x249   :  { %v2923_v0 = vmul.f32 -1.442695, %v1127_v17  ;;  %v1169_v31 = vpop.f32.mrf.mxu0  ;;  %v1124_v17 = vor.u32 1.1754944e-38, %v1123_v47  ;;  %vm1122_vm12 = vcmp.eq.f32.partialorder %v1121_v55, 8.507059e+37  ;;  %v5259_v55 = vld [vmem:[#allocation66_spill] sm:$0xff] }
 0x24b   :  { %3073 = vpow2.f32 %v2923_v0 }
 0x24c   :  { %v3068_v53 = vpop.eup %3067 }
 0x24d   :  { %v3070_v32 = vpop.eup %3069  ;;  %v1113_v11 = vmul.f32 %v3068_v53, %v1111_v24  ;;  %vm1118_vm9 = vweird.f32 %v3068_v53 }
 0x24e   :  { %v1201_v27 = vadd.f32 1.0, %v3070_v32  ;;  %v1092_v18 = vpop.f32.mrf.mxu2  ;;  %v1105_v35 = vpop.f32.mrf.mxu3  ;;  %vm1119_vm11 = vmor %vm1117_vm10, %vm1118_vm9 }
 0x24f   :  { %v1114_v59 = vsub.f32 1.0, %v1113_v11  ;;  %v4342_v38 = vpop.eup %3071  ;;  %v5257_v11 = vld [vmem:[#allocation22_spill] sm:$0xff] }
 0x250   :  { %3075 = vrcp.f32 %v1201_v27  ;;  %v1223_v50 = vmul.f32 %v4342_v38, %v4339_v2  ;;  %v1147_v18 = vadd.f32 %v5257_v11, %v1103_v56  ;;  %v1211_v20 = vand.u32 2147483647, %v1201_v27 }
 0x251   :  { %v3074_v36 = vpop.eup %3073  ;;  %v1115_v34 = vmul.f32 %v3068_v53, %v1114_v59  ;;  %v1213_v9 = vand.u32 2147483648, %v1201_v27  ;;  %v293_v56 = vadd.f32 %v5259_v55, %v5213_v33  ;;  %vm1207_vm14 = vweird.f32 %v1201_v27 }
 0x252   :  { %v1131_v58 = vadd.f32 1.0, %v3074_v36  ;;  %v1224_v59 = vsub.f32 1.0, %v1223_v50  ;;  %vm1212_vm0 = vcmp.eq.f32.partialorder %v1211_v20, 8.507059e+37  ;;  %vm1228_vm2 = vweird.f32 %v4342_v38 }
 0x253   :  { %v1116_v42 = vadd.f32 %v3068_v53, %v1115_v34  ;;  %v5258_v34 = vld [vmem:[#allocation79_spill] sm:$0xff]  ;;  %vm1229_vm6 = vmor %vm1227_vm4, %vm1228_vm2 }
 0x254   :  { %3077 = vrcp.f32 %v1131_v58  ;;  %v1064_v24 = vadd.f32 %v4332_v29, %v5258_v34  ;;  %v1143_v50 = vand.u32 2147483648, %v1131_v58  ;;  %vm1137_vm3 = vweird.f32 %v1131_v58 }
 0x255   :  { %v1120_v0 = vsel %vm1119_vm11, %v3068_v53, %v1116_v42  ;;  %v1225_v53 = vmul.f32 %v4342_v38, %v1224_v59 }
 0x256   :  { %v3076_v31 = vpop.eup %3075  ;;  %v1125_v32 = vsel %vm1122_vm12, %v1124_v17, %v1120_v0  ;;  %v1141_v0 = vand.u32 2147483647, %v1131_v58  ;;  %v1144_v20 = vor.u32 1.1754944e-38, %v1143_v50 }
 0x257   :  { %v1193_v35 = vpop.f32.mrf.mxu2  ;;  %v1203_v21 = vmul.f32 %v3076_v31, %v1201_v27  ;;  %v1148_v19 = vmul.f32 %v1147_v18, %v1125_v32  ;;  %vm1208_vm13 = vweird.f32 %v3076_v31  ;;  %v1226_v59 = vadd.f32 %v4342_v38, %v1225_v53 }
 0x258   :  { %vm1209_vm15 = vmor %vm1207_vm14, %vm1208_vm13  ;;  %vm1142_vm7 = vcmp.eq.f32.partialorder %v1141_v0, 8.507059e+37 }
 0x259   :  { %v1204_v7 = vsub.f32 1.0, %v1203_v21  ;;  %v1149_v47 = vadd.f32 %v1148_v19, %v1064_v24  ;;  %v1214_v21 = vor.u32 1.1754944e-38, %v1213_v9  ;;  %v1231_v9 = vand.u32 2147483647, %v4339_v2 }
 0x25a   :  { %v3078_v36 = vpop.eup %3077 }
 0x25b   :  { %v1133_v60 = vmul.f32 %v3078_v36, %v1131_v58  ;;  %v1205_v39 = vmul.f32 %v3076_v31, %v1204_v7  ;;  %vm1138_vm1 = vweird.f32 %v3078_v36  ;;  %v1237_v7 = vadd.f32 %v4058_v41, %v1193_v35 }
 0x25c   :  { %3079 = vtanh.f32 %v1149_v47  ;;  %vm1139_vm5 = vmor %vm1137_vm3, %vm1138_vm1  ;;  %v1230_v35 = vsel %vm1229_vm6, %v4342_v38, %v1226_v59  ;;  %vm1232_vm8 = vcmp.eq.f32.partialorder %v1231_v9, 8.507059e+37  ;;  %v5265_v59 = vld [vmem:[#allocation24_spill] sm:$0xff]  ;;  %v5270_v9 = vld [vmem:[#allocation45_spill] sm:$0xff] }
 0x25d   :  { %v1134_v42 = vsub.f32 1.0, %v1133_v60  ;;  %v1206_v17 = vadd.f32 %v3076_v31, %v1205_v39  ;;  %v1233_v39 = vand.u32 2147483648, %v4339_v2 }
 0x25f   :  { %v1135_v29 = vmul.f32 %v3078_v36, %v1134_v42  ;;  %v1210_v32 = vsel %vm1209_vm15, %v3076_v31, %v1206_v17  ;;  %v1195_v18 = vpop.f32.mrf.mxu2  ;;  %v1234_v53 = vor.u32 1.1754944e-38, %v1233_v39  ;;  %v5267_v39 = vld [vmem:[#allocation56_spill] sm:$0xff] }
 0x260   :  { %v1215_v19 = vsel %vm1212_vm0, %v1214_v21, %v1210_v32  ;;  %v5262_v32 = vld [vmem:[#allocation47_spill] sm:$0xff]  ;;  %v5264_v18 = vld [vmem:[#allocation6_spill] sm:$0xff] }
 0x261   :  { %v1238_v60 = vmul.f32 %v1237_v7, %v1215_v19  ;;  %v1136_v27 = vadd.f32 %v3078_v36, %v1135_v29  ;;  %v1235_v58 = vsel %vm1232_vm8, %v1234_v53, %v1230_v35  ;;  %v5263_v7 = vld [vmem:[#allocation54_spill] sm:$0xff]  ;;  %v5266_v19 = vld [vmem:[#allocation43_spill] sm:$0xff]  ;;  %v5274_v35 = vld [vmem:[#allocation49_spill] sm:$0xff] }
 0x262   :  { %v3080_v55 = vpop.eup %3079  ;;  %v1241_v2 = vsub.f32 1.0, %v1235_v58  ;;  %v1243_v38 = vmul.f32 %v1235_v58, %v4259_v23  ;;  %v5261_v23 = vld [vmem:[#allocation52_spill] sm:$0xff]  ;;  %v5276_v53 = vld [vmem:[#allocation9_spill] sm:$0xff] }
 0x263   :  { %v1239_v41 = vadd.f32 %v1238_v60, %v293_v56  ;;  %v1140_v31 = vsel %vm1139_vm5, %v3078_v36, %v1136_v27  ;;  %v5268_v60 = vld [vmem:[#allocation7_spill] sm:$0xff]  ;;  %v5279_v58 = vld [vmem:[#allocation61_spill] sm:$0xff] }
 0x264   :  { %v1145_v24 = vsel %vm1142_vm7, %v1144_v20, %v1140_v31  ;;  %v5269_v27 = vld [vmem:[#allocation27_spill] sm:$0xff]  ;;  %v5271_v20 = vld [vmem:[#allocation58_spill] sm:$0xff]  ;;  %v5273_v31 = vld [vmem:[#allocation28_spill] sm:$0xff] }
 0x265   :  { %3081 = vtanh.f32 %v1239_v41  ;;  %v1151_v47 = vsub.f32 1.0, %v1145_v24  ;;  %v1153_v17 = vmul.f32 %v1145_v24, %v4245_v3  ;;  %v5260_v3 = vld [vmem:[#allocation42_spill] sm:$0xff]  ;;  %v5272_v41 = vld [vmem:[#allocation8_spill] sm:$0xff]  ;;  %v5275_v24 = vld [vmem:[#allocation59_spill] sm:$0xff] }
 0x267   :  { %v1152_v42 = vmul.f32 %v3080_v55, %v1151_v47  ;;  %v5277_v47 = vld [vmem:[#allocation31_spill] sm:$0xff] }
 0x268   :  { %v5278_v55 = vld [vmem:[#allocation51_spill] sm:$0xff] }
 0x269   :  { %v4360_v21 = vadd.f32 %v1153_v17, %v1152_v42  ;;  %v5280_v42 = vld [vmem:[#allocation10_spill] sm:$0xff]  ;;  %v5281_v17 = vld [vmem:[#allocation33_spill] sm:$0xff] }
 0x26b   :  { %v3082_v50 = vpop.eup %3081  ;;  %v1285_v36 = vpack.c.bf16 %v4360_v21, %v4360_v21 }
 0x26c   :  { %v1242_v56 = vmul.f32 %v3082_v50, %v1241_v2  ;;  %v5282_v2 = vld [vmem:[#allocation53_spill] sm:$0xff]  ;;  %v5283_v50 = vld [vmem:[#allocation62_spill] sm:$0xff] }
 0x26d   :  { %1294 = vmatmul.bf16.vlgmr.msra.gmra.mxu2 %v1285_v36 }
 0x26e   :  { %v4365_v0 = vadd.f32 %v1243_v38, %v1242_v56  ;;  %1490 = vmatpush.bf16.msra.mxu2 %v5214_v28  ;;  %v5285_v56 = vld [vmem:[#allocation36_spill] sm:$0xff]  ;;  %v5286_v38 = vld [vmem:[#allocation55_spill] sm:$0xff] }
 0x270   :  { %v1245_v29 = vpack.c.bf16 %v4365_v0, %v4365_v0 }
 0x272   :  { %1254 = vmatmul.bf16.vlgmr.msra.gmra.mxu3 %v1245_v29  ;;  %1267 = vmatmul.bf16.vlgmr.msra.gmra.mxu0 %v1245_v29 }
 0x273   :  { %1280 = vmatmul.bf16.vlgmr.msra.gmra.mxu1 %v1245_v29  ;;  %1402 = vmatpush.bf16.msra.mxu3 %v3357_v16 }
 0x274   :  { %1464 = vmatpush.bf16.msra.mxu0 %v3623_v51  ;;  %1477 = vmatpush.bf16.msra.mxu1 %v3755_v8 }
 0x275   :  { %1491 = vmatpush.bf16.msra.mxu2 %v5215_v57 }
 0x277   :  { %1403 = vmatpush.bf16.msra.mxu3 %v3375_v22 }
 0x278   :  { %1465 = vmatpush.bf16.msra.mxu0 %v3644_v63  ;;  %1478 = vmatpush.bf16.msra.mxu1 %v3791_v6 }
 0x279   :  { %1492 = vmatpush.bf16.msra.mxu2 %v5216_v14 }
 0x27b   :  { %1404 = vmatpush.bf16.msra.mxu3 %v3399_v30 }
 0x27c   :  { %1466 = vmatpush.bf16.msra.mxu0 %v3664_v12  ;;  %1479 = vmatpush.bf16.msra.mxu1 %v3829_v62 }
 0x27d   :  { %1397 = vmatmul.bf16.vlgmr.msrb.gmra.mxu2 %v1245_v29 }
 0x27e   :  { %1493 = vmatpush.bf16.msra.mxu2 %v5217_v52 }
 0x27f   :  { %1405 = vmatpush.bf16.msra.mxu3 %v3419_v37 }
 0x280   :  { %1467 = vmatpush.bf16.msra.mxu0 %v3685_v25  ;;  %1480 = vmatpush.bf16.msra.mxu1 %v3858_v13 }
 0x282   :  { %1307 = vmatmul.bf16.vlgmr.msrb.gmra.mxu3 %v1285_v36  ;;  %1320 = vmatmul.bf16.vlgmr.msrb.gmra.mxu0 %v1285_v36  ;;  %v5284_v36 = vld [vmem:[#allocation11_spill] sm:$0xff] }
 0x283   :  { %1384 = vmatmul.bf16.vlgmr.msrb.gmra.mxu1 %v1245_v29  ;;  %1406 = vmatpush.bf16.msra.mxu3 %v3439_v43 }
 0x284   :  { %1468 = vmatpush.bf16.msra.mxu0 %v3710_v44  ;;  %1481 = vmatpush.bf16.msra.mxu1 %v3888_v61 }
 0x285   :  { %1494 = vmatpush.bf16.msra.mxu2 %v5218_v40 }
 0x287   :  { %1407 = vmatpush.bf16.msra.mxu3 %v3469_v54 }
 0x288   :  { %1469 = vmatpush.bf16.msra.mxu0 %v3742_v5  ;;  %1482 = vmatpush.bf16.msra.mxu1 %v3920_v48 }
 0x289   :  { %1495 = vmatpush.bf16.msra.mxu2 %v3870_v1 }
 0x28b   :  { %1408 = vmatpush.bf16.msra.mxu3 %v3510_v4 }
 0x28c   :  { %1470 = vmatpush.bf16.msra.mxu0 %v3780_v49  ;;  %1483 = vmatpush.bf16.msra.mxu1 %v3961_v15 }
 0x28d   :  { %1496 = vmatpush.bf16.msra.mxu2 %v3897_v26 }
 0x28f   :  { %1409 = vmatpush.bf16.msra.mxu3 %v3523_v10 }
 0x290   :  { %1471 = vmatpush.bf16.msra.mxu0 %v3817_v45  ;;  %1484 = vmatpush.bf16.msra.mxu1 %v5261_v23 }
 0x291   :  { %1497 = vmatpush.bf16.msra.mxu2 %v5262_v32 }
 0x292   :  { %1410 = vmatmul.bf16.vlgmr.msra.gmra.mxu3 %v1245_v29  ;;  %v5287_v29 = vld [vmem:[#allocation63_spill] sm:$0xff] }
 0x293   :  { %1504 = vmatpush.bf16.msrb.mxu3 %v3609_v46 }
 0x294   :  { %1517 = vmatpush.bf16.msrb.mxu0 %v5260_v3  ;;  %1530 = vmatpush.bf16.msrb.mxu1 %v5263_v7 }
 0x295   :  { %1594 = vmatpush.bf16.msrb.mxu2 %v5264_v18 }
 0x297   :  { %1505 = vmatpush.bf16.msrb.mxu3 %v5265_v59 }
 0x298   :  { %1518 = vmatpush.bf16.msrb.mxu0 %v5266_v19  ;;  %1531 = vmatpush.bf16.msrb.mxu1 %v5267_v39 }
 0x299   :  { %1595 = vmatpush.bf16.msrb.mxu2 %v5268_v60 }
 0x29b   :  { %1506 = vmatpush.bf16.msrb.mxu3 %v5269_v27 }
 0x29c   :  { %1519 = vmatpush.bf16.msrb.mxu0 %v5270_v9  ;;  %1532 = vmatpush.bf16.msrb.mxu1 %v5271_v20  ;;  %v5305_v9 = vld [vmem:[#allocation67_spill] sm:$0xff] }
 0x29d   :  { %1596 = vmatpush.bf16.msrb.mxu2 %v5272_v41  ;;  %v5302_v41 = vld [vmem:[#allocation25_spill] sm:$0xff] }
 0x29f   :  { %1507 = vmatpush.bf16.msrb.mxu3 %v5273_v31 }
 0x2a0   :  { %1520 = vmatpush.bf16.msrb.mxu0 %v5274_v35  ;;  %1533 = vmatpush.bf16.msrb.mxu1 %v5275_v24 }
 0x2a1   :  { %1597 = vmatpush.bf16.msrb.mxu2 %v5276_v53 }
 0x2a3   :  { %1508 = vmatpush.bf16.msrb.mxu3 %v5277_v47  ;;  %v5288_v47 = vld [vmem:[#allocation12_spill] sm:$0xff] }
 0x2a4   :  { %1521 = vmatpush.bf16.msrb.mxu0 %v5278_v55  ;;  %1534 = vmatpush.bf16.msrb.mxu1 %v5279_v58  ;;  %v5289_v55 = vld [vmem:[#allocation39_spill] sm:$0xff]  ;;  %v5290_v58 = vld [vmem:[#allocation14_spill] sm:$0xff] }
 0x2a5   :  { %1598 = vmatpush.bf16.msrb.mxu2 %v5280_v42  ;;  %v5291_v42 = vld [vmem:[#allocation57_spill] sm:$0xff] }
 0x2a7   :  { %1509 = vmatpush.bf16.msrb.mxu3 %v5281_v17  ;;  %v5292_v17 = vld [vmem:[#allocation64_spill] sm:$0xff] }
 0x2a8   :  { %1522 = vmatpush.bf16.msrb.mxu0 %v5282_v2  ;;  %1535 = vmatpush.bf16.msrb.mxu1 %v5283_v50  ;;  %v5293_v2 = vld [vmem:[#allocation13_spill] sm:$0xff]  ;;  %v5294_v50 = vld [vmem:[#allocation15_spill] sm:$0xff] }
 0x2a9   :  { %1599 = vmatpush.bf16.msrb.mxu2 %v5284_v36  ;;  %v5295_v36 = vld [vmem:[#allocation16_spill] sm:$0xff] }
 0x2ab   :  { %1510 = vmatpush.bf16.msrb.mxu3 %v5285_v56  ;;  %v5296_v56 = vld [vmem:[#allocation17_spill] sm:$0xff] }
 0x2ac   :  { %1523 = vmatpush.bf16.msrb.mxu0 %v5286_v38  ;;  %1536 = vmatpush.bf16.msrb.mxu1 %v5287_v29  ;;  %v5297_v38 = vld [vmem:[#allocation18_spill] sm:$0xff]  ;;  %v5298_v29 = vld [vmem:[#allocation19_spill] sm:$0xff] }
 0x2ad   :  { %1600 = vmatpush.bf16.msrb.mxu2 %v5288_v47  ;;  %v5299_v47 = vld [vmem:[#allocation20_spill] sm:$0xff] }
 0x2af   :  { %1511 = vmatpush.bf16.msrb.mxu3 %v5289_v55  ;;  %v5300_v55 = vld [vmem:[#allocation21_spill] sm:$0xff] }
 0x2b0   :  { %1524 = vmatpush.bf16.msrb.mxu0 %v5291_v42  ;;  %1537 = vmatpush.bf16.msrb.mxu1 %v5292_v17 }
 0x2b1   :  { %1601 = vmatpush.bf16.msrb.mxu2 %v5293_v2  ;;  %v5301_v2 = vld [vmem:[#allocation77_spill] sm:$0xff] }
 0x2b3   :  { %1607 = vmatpush.bf16.msra.mxu3 %v5290_v58 }
 0x2b7   :  { %1608 = vmatpush.bf16.msra.mxu3 %v5294_v50 }
 0x2bb   :  { %1609 = vmatpush.bf16.msra.mxu3 %v5295_v36 }
 0x2bf   :  { %1610 = vmatpush.bf16.msra.mxu3 %v5296_v56 }
 0x2c3   :  { %1611 = vmatpush.bf16.msra.mxu3 %v5297_v38 }
 0x2c7   :  { %1612 = vmatpush.bf16.msra.mxu3 %v5298_v29  ;;  %v5303_v29 = vld [vmem:[#allocation29_spill] sm:$0xff] }
 0x2c8   :  { %v237_v20 = vadd.f32 %v5303_v29, %v5302_v41 }
 0x2cb   :  { %1613 = vmatpush.bf16.msra.mxu3 %v5299_v47  ;;  %v5304_v47 = vld [vmem:[#allocation50_spill] sm:$0xff] }
 0x2cf   :  { %1614 = vmatpush.bf16.msra.mxu3 %v5300_v55  ;;  %v266_v55 = vadd.f32 %v5305_v9, %v5304_v47 }
 0x2ef   :  { %v1268_v58 = vpop.f32.mrf.mxu0 }
 0x2f0   :  { %v4441_v42 = vpop.f32.mrf.mxu1  ;;  %v1295_v17 = vpop.f32.mrf.mxu2 }
 0x2f5   :  { %v1255_v53 = vpop.f32.mrf.mxu3 }
 0x2f6   :  { %v1256_v24 = vadd.f32 %v1255_v53, %v5301_v2 }
 0x2f7   :  { %v1270_v50 = vpop.f32.mrf.mxu0 }
 0x2f8   :  { %v1325_v35 = vadd.f32 %v1295_v17, %v1256_v24  ;;  %v1283_v36 = vpop.f32.mrf.mxu1  ;;  %v1297_v31 = vpop.f32.mrf.mxu2  ;;  %v5306_v17 = vld [vmem:[#allocation78_spill] sm:$0xff] }
 0x2f9   :  { %v1269_v31 = vadd.f32 %v1268_v58, %v5306_v17 }
 0x2fa   :  { %v2926_v56 = vmul.f32 -1.442695, %v1325_v35 }
 0x2fc   :  { %3083 = vpow2.f32 %v2926_v56 }
 0x2fd   :  { %v1257_v38 = vpop.f32.mrf.mxu3 }
 0x2ff   :  { %v1321_v27 = vpop.f32.mrf.mxu0 }
 0x300   :  { %v1385_v60 = vpop.f32.mrf.mxu1  ;;  %v1398_v39 = vpop.f32.mrf.mxu2 }
 0x301   :  { %v1415_v19 = vadd.f32 %v1385_v60, %v237_v20  ;;  %v1435_v59 = vadd.f32 %v1398_v39, %v266_v55 }
 0x302   :  { %v3084_v18 = vpop.eup %3083 }
 0x303   :  { %v1329_v53 = vadd.f32 1.0, %v3084_v18  ;;  %v2928_v50 = vmul.f32 -1.442695, %v1415_v19  ;;  %v2929_v24 = vmul.f32 -1.442695, %v1435_v59 }
 0x305   :  { %3085 = vrcp.f32 %v1329_v53  ;;  %v1308_v35 = vpop.f32.mrf.mxu3  ;;  %v1341_v55 = vand.u32 2147483648, %v1329_v53  ;;  %vm1335_vm10 = vweird.f32 %v1329_v53 }
 0x306   :  { %3087 = vpow2.f32 %v2928_v50  ;;  %v1345_v36 = vadd.f32 %v1308_v35, %v1269_v31 }
 0x307   :  { %3089 = vpow2.f32 %v2929_v24  ;;  %v1323_v56 = vpop.f32.mrf.mxu0  ;;  %v1339_v24 = vand.u32 2147483647, %v1329_v53 }
 0x308   :  { %v2927_v38 = vmul.f32 -1.442695, %v1345_v36  ;;  %v1387_v29 = vpop.f32.mrf.mxu1  ;;  %v1400_v9 = vpop.f32.mrf.mxu2  ;;  %v1342_v36 = vor.u32 1.1754944e-38, %v1341_v55 }
 0x309   :  { %vm1340_vm12 = vcmp.eq.f32.partialorder %v1339_v24, 8.507059e+37  ;;  %v1365_v29 = vadd.f32 %v5257_v11, %v1321_v27  ;;  %v5307_v11 = vld [vmem:[#allocation68_spill] sm:$0xff] }
 0x30a   :  { %3091 = vpow2.f32 %v2927_v38  ;;  %v295_v27 = vadd.f32 %v5307_v11, %v5213_v33 }
 0x30b   :  { %v3086_v41 = vpop.eup %3085 }
 0x30c   :  { %v3088_v47 = vpop.eup %3087  ;;  %v1331_v60 = vmul.f32 %v3086_v41, %v1329_v53  ;;  %vm1336_vm9 = vweird.f32 %v3086_v41  ;;  %v1282_v53 = vadd.f32 %v4441_v42, %v5258_v34 }
 0x30d   :  { %v3090_v39 = vpop.eup %3089  ;;  %v1419_v20 = vadd.f32 1.0, %v3088_v47  ;;  %v1310_v18 = vpop.f32.mrf.mxu3  ;;  %vm1337_vm11 = vmor %vm1335_vm10, %vm1336_vm9 }
 0x30e   :  { %v1332_v19 = vsub.f32 1.0, %v1331_v60  ;;  %v4449_v59 = vadd.f32 1.0, %v3090_v39 }
 0x30f   :  { %3093 = vrcp.f32 %v1419_v20  ;;  %v1429_v55 = vand.u32 2147483647, %v1419_v20  ;;  %vm1425_vm14 = vweird.f32 %v1419_v20 }
 0x310   :  { %v3092_v58 = vpop.eup %3091  ;;  %v1333_v50 = vmul.f32 %v3086_v41, %v1332_v19  ;;  %3095 = vrcp.f32 %v4449_v59  ;;  %vm1445_vm4 = vweird.f32 %v4449_v59 }
 0x311   :  { %v1349_v31 = vadd.f32 1.0, %v3092_v58  ;;  %vm1430_vm0 = vcmp.eq.f32.partialorder %v1429_v55, 8.507059e+37 }
 0x312   :  { %v1334_v35 = vadd.f32 %v3086_v41, %v1333_v50  ;;  %v1431_v50 = vand.u32 2147483648, %v1419_v20 }
 0x313   :  { %3097 = vrcp.f32 %v1349_v31  ;;  %v1359_v42 = vand.u32 2147483647, %v1349_v31  ;;  %vm1355_vm3 = vweird.f32 %v1349_v31 }
 0x314   :  { %v1338_v56 = vsel %vm1337_vm11, %v3086_v41, %v1334_v35 }
 0x315   :  { %v3094_v47 = vpop.eup %3093  ;;  %v1343_v38 = vsel %vm1340_vm12, %v1342_v36, %v1338_v56  ;;  %v1411_v9 = vpop.f32.mrf.mxu3  ;;  %vm1360_vm7 = vcmp.eq.f32.partialorder %v1359_v42, 8.507059e+37 }
 0x316   :  { %v3096_v60 = vpop.eup %3095  ;;  %v1421_v39 = vmul.f32 %v3094_v47, %v1419_v20  ;;  %v1366_v18 = vmul.f32 %v1365_v29, %v1343_v38  ;;  %vm1426_vm13 = vweird.f32 %v3094_v47  ;;  %v1361_v29 = vand.u32 2147483648, %v1349_v31 }
 0x317   :  { %v1441_v19 = vmul.f32 %v3096_v60, %v4449_v59  ;;  %vm1427_vm15 = vmor %vm1425_vm14, %vm1426_vm13  ;;  %vm1446_vm2 = vweird.f32 %v3096_v60 }
 0x318   :  { %v1422_v17 = vsub.f32 1.0, %v1421_v39  ;;  %v1367_v35 = vadd.f32 %v1366_v18, %v1282_v53  ;;  %v1432_v39 = vor.u32 1.1754944e-38, %v1431_v50  ;;  %v1362_v50 = vor.u32 1.1754944e-38, %v1361_v29  ;;  %vm1447_vm6 = vmor %vm1445_vm4, %vm1446_vm2 }
 0x319   :  { %v3098_v2 = vpop.eup %3097  ;;  %v1442_v58 = vsub.f32 1.0, %v1441_v19 }
 0x31a   :  { %v1351_v41 = vmul.f32 %v3098_v2, %v1349_v31  ;;  %v1423_v24 = vmul.f32 %v3094_v47, %v1422_v17  ;;  %v4461_v17 = vld [vmem:[%s4981_s5] ss:$0 sm:$0xff]  ;;  %vm1356_vm1 = vweird.f32 %v3098_v2  ;;  %3099 = vtanh.f32 %v1367_v35 }
 0x31b   :  { %v1443_v36 = vmul.f32 %v3096_v60, %v1442_v58  ;;  %v1455_v18 = vadd.f32 %v4461_v17, %v1411_v9  ;;  %v1451_v58 = vand.u32 2147483648, %v4449_v59  ;;  %vm1357_vm5 = vmor %vm1355_vm3, %vm1356_vm1 }
 0x31c   :  { %v1352_v56 = vsub.f32 1.0, %v1351_v41  ;;  %v1424_v38 = vadd.f32 %v3094_v47, %v1423_v24 }
 0x31d   :  { %v1413_v7 = vpop.f32.mrf.mxu3  ;;  %v1444_v53 = vadd.f32 %v3096_v60, %v1443_v36  ;;  %v1452_v36 = vor.u32 1.1754944e-38, %v1451_v58  ;;  %v5313_v58 = vld [vmem:[#allocation7_spill] sm:$0xff] }
 0x31e   :  { %v1353_v19 = vmul.f32 %v3098_v2, %v1352_v56  ;;  %v1428_v34 = vsel %vm1427_vm15, %v3094_v47, %v1424_v38  ;;  %v1449_v47 = vand.u32 2147483647, %v4449_v59 }
 0x31f   :  { %v1433_v20 = vsel %vm1430_vm0, %v1432_v39, %v1428_v34  ;;  %v1448_v9 = vsel %vm1447_vm6, %v3096_v60, %v1444_v53  ;;  %v5311_v53 = vld [vmem:[#allocation43_spill] sm:$0xff] }
 0x320   :  { %v1456_v55 = vmul.f32 %v1455_v18, %v1433_v20  ;;  %v1354_v7 = vadd.f32 %v3098_v2, %v1353_v19  ;;  %v3100_v11 = vpop.eup %3099  ;;  %vm1450_vm8 = vcmp.eq.f32.partialorder %v1449_v47, 8.507059e+37  ;;  %v5310_v18 = vld [vmem:[#allocation24_spill] sm:$0xff]  ;;  %v5316_v47 = vld [vmem:[#allocation58_spill] sm:$0xff] }
 0x321   :  { %v1453_v31 = vsel %vm1450_vm8, %v1452_v36, %v1448_v9  ;;  %v5312_v20 = vld [vmem:[#allocation56_spill] sm:$0xff]  ;;  %v5320_v9 = vld [vmem:[#allocation59_spill] sm:$0xff] }
 0x322   :  { %v1457_v41 = vadd.f32 %v1456_v55, %v295_v27  ;;  %v1358_v24 = vsel %vm1357_vm5, %v3098_v2, %v1354_v7  ;;  %v1459_v59 = vsub.f32 1.0, %v1453_v31  ;;  %v1461_v60 = vmul.f32 %v1453_v31, %v4365_v0  ;;  %v5309_v0 = vld [vmem:[#allocation6_spill] sm:$0xff]  ;;  %v5314_v55 = vld [vmem:[#allocation27_spill] sm:$0xff]  ;;  %v5315_v7 = vld [vmem:[#allocation45_spill] sm:$0xff] }
 0x323   :  { %v1363_v35 = vsel %vm1360_vm7, %v1362_v50, %v1358_v24  ;;  %v5317_v50 = vld [vmem:[#allocation8_spill] sm:$0xff]  ;;  %v5319_v24 = vld [vmem:[#allocation49_spill] sm:$0xff]  ;;  %v5322_v36 = vld [vmem:[#allocation31_spill] sm:$0xff] }
 0x324   :  { %3101 = vtanh.f32 %v1457_v41  ;;  %v1369_v34 = vsub.f32 1.0, %v1363_v35  ;;  %v1371_v38 = vmul.f32 %v1363_v35, %v4360_v21  ;;  %v5308_v21 = vld [vmem:[#allocation54_spill] sm:$0xff]  ;;  %v5318_v41 = vld [vmem:[#allocation28_spill] sm:$0xff]  ;;  %v5321_v35 = vld [vmem:[#allocation9_spill] sm:$0xff] }
 0x325   :  { %v5325_v31 = vld [vmem:[#allocation10_spill] sm:$0xff] }
 0x326   :  { %v1370_v56 = vmul.f32 %v3100_v11, %v1369_v34  ;;  %v5323_v34 = vld [vmem:[#allocation51_spill] sm:$0xff]  ;;  %v5324_v11 = vld [vmem:[#allocation61_spill] sm:$0xff] }
 0x328   :  { %v4468_v39 = vadd.f32 %v1371_v38, %v1370_v56  ;;  %v5326_v56 = vld [vmem:[#allocation33_spill] sm:$0xff] }
 0x329   :  { %v5327_v38 = vld [vmem:[#allocation53_spill] sm:$0xff] }
 0x32a   :  { %v3102_v19 = vpop.eup %3101  ;;  %v1503_v27 = vpack.c.bf16 %v4468_v39, %v4468_v39 }
 0x32b   :  { %v1460_v2 = vmul.f32 %v3102_v19, %v1459_v59  ;;  %v5328_v59 = vld [vmem:[#allocation62_spill] sm:$0xff]  ;;  %v5329_v19 = vld [vmem:[#allocation11_spill] sm:$0xff] }
 0x32c   :  { %1512 = vmatmul.bf16.vlgmr.msrb.gmra.mxu3 %v1503_v27 }
 0x32d   :  { %v4473_v29 = vadd.f32 %v1461_v60, %v1460_v2  ;;  %1708 = vmatpush.bf16.msrb.mxu3 %v5214_v28  ;;  %v5331_v2 = vld [vmem:[#allocation55_spill] sm:$0xff] }
 0x32e   :  { %v5332_v60 = vld [vmem:[#allocation63_spill] sm:$0xff] }
 0x32f   :  { %v1463_v42 = vpack.c.bf16 %v4473_v29, %v4473_v29 }
 0x331   :  { %1472 = vmatmul.bf16.vlgmr.msra.gmra.mxu0 %v1463_v42  ;;  %1485 = vmatmul.bf16.vlgmr.msra.gmra.mxu1 %v1463_v42 }
 0x332   :  { %1498 = vmatmul.bf16.vlgmr.msra.gmra.mxu2 %v1463_v42  ;;  %1620 = vmatpush.bf16.msra.mxu0 %v3357_v16 }
 0x333   :  { %1682 = vmatpush.bf16.msra.mxu1 %v3623_v51  ;;  %1695 = vmatpush.bf16.msra.mxu2 %v3755_v8 }
 0x334   :  { %1709 = vmatpush.bf16.msrb.mxu3 %v5215_v57 }
 0x336   :  { %1621 = vmatpush.bf16.msra.mxu0 %v3375_v22 }
 0x337   :  { %1683 = vmatpush.bf16.msra.mxu1 %v3644_v63  ;;  %1696 = vmatpush.bf16.msra.mxu2 %v3791_v6 }
 0x338   :  { %1710 = vmatpush.bf16.msrb.mxu3 %v5216_v14 }
 0x33a   :  { %1622 = vmatpush.bf16.msra.mxu0 %v3399_v30 }
 0x33b   :  { %1684 = vmatpush.bf16.msra.mxu1 %v3664_v12  ;;  %1697 = vmatpush.bf16.msra.mxu2 %v3829_v62 }
 0x33c   :  { %1615 = vmatmul.bf16.vlgmr.msra.gmra.mxu3 %v1463_v42 }
 0x33d   :  { %1711 = vmatpush.bf16.msrb.mxu3 %v5217_v52 }
 0x33e   :  { %1623 = vmatpush.bf16.msra.mxu0 %v3419_v37 }
 0x33f   :  { %1685 = vmatpush.bf16.msra.mxu1 %v3685_v25  ;;  %1698 = vmatpush.bf16.msra.mxu2 %v3858_v13 }
 0x341   :  { %1525 = vmatmul.bf16.vlgmr.msrb.gmra.mxu0 %v1503_v27  ;;  %1538 = vmatmul.bf16.vlgmr.msrb.gmra.mxu1 %v1503_v27  ;;  %v5330_v27 = vld [vmem:[#allocation36_spill] sm:$0xff] }
 0x342   :  { %1602 = vmatmul.bf16.vlgmr.msrb.gmra.mxu2 %v1463_v42  ;;  %1624 = vmatpush.bf16.msra.mxu0 %v3439_v43 }
 0x343   :  { %1686 = vmatpush.bf16.msra.mxu1 %v3710_v44  ;;  %1699 = vmatpush.bf16.msra.mxu2 %v3888_v61 }
 0x344   :  { %1712 = vmatpush.bf16.msrb.mxu3 %v5218_v40 }
 0x346   :  { %1625 = vmatpush.bf16.msra.mxu0 %v3469_v54 }
 0x347   :  { %1687 = vmatpush.bf16.msra.mxu1 %v3742_v5  ;;  %1700 = vmatpush.bf16.msra.mxu2 %v3920_v48 }
 0x348   :  { %1713 = vmatpush.bf16.msrb.mxu3 %v3870_v1 }
 0x34a   :  { %1626 = vmatpush.bf16.msra.mxu0 %v3510_v4 }
 0x34b   :  { %1688 = vmatpush.bf16.msra.mxu1 %v3780_v49  ;;  %1701 = vmatpush.bf16.msra.mxu2 %v3961_v15 }
 0x34c   :  { %1714 = vmatpush.bf16.msrb.mxu3 %v3897_v26 }
 0x34e   :  { %1627 = vmatpush.bf16.msra.mxu0 %v3523_v10 }
 0x34f   :  { %1689 = vmatpush.bf16.msra.mxu1 %v3817_v45  ;;  %1702 = vmatpush.bf16.msra.mxu2 %v5261_v23 }
 0x350   :  { %1715 = vmatpush.bf16.msrb.mxu3 %v5262_v32 }
 0x351   :  { %1628 = vmatmul.bf16.vlgmr.msra.gmra.mxu0 %v1463_v42  ;;  %v5333_v42 = vld [vmem:[#allocation12_spill] sm:$0xff] }
 0x352   :  { %1722 = vmatpush.bf16.msrb.mxu0 %v3609_v46 }
 0x353   :  { %1735 = vmatpush.bf16.msrb.mxu1 %v5260_v3  ;;  %1748 = vmatpush.bf16.msrb.mxu2 %v5308_v21 }
 0x354   :  { %1812 = vmatpush.bf16.msra.mxu3 %v5309_v0 }
 0x356   :  { %1723 = vmatpush.bf16.msrb.mxu0 %v5310_v18 }
 0x357   :  { %1736 = vmatpush.bf16.msrb.mxu1 %v5311_v53  ;;  %1749 = vmatpush.bf16.msrb.mxu2 %v5312_v20  ;;  %v5349_v53 = vld [vmem:[#allocation69_spill] sm:$0xff] }
 0x358   :  { %1813 = vmatpush.bf16.msra.mxu3 %v5313_v58 }
 0x35a   :  { %1724 = vmatpush.bf16.msrb.mxu0 %v5314_v55 }
 0x35b   :  { %1737 = vmatpush.bf16.msrb.mxu1 %v5315_v7  ;;  %1750 = vmatpush.bf16.msrb.mxu2 %v5316_v47 }
 0x35c   :  { %1814 = vmatpush.bf16.msra.mxu3 %v5317_v50 }
 0x35e   :  { %1725 = vmatpush.bf16.msrb.mxu0 %v5318_v41  ;;  %v5346_v41 = vld [vmem:[#allocation77_spill] sm:$0xff] }
 0x35f   :  { %1738 = vmatpush.bf16.msrb.mxu1 %v5319_v24  ;;  %1751 = vmatpush.bf16.msrb.mxu2 %v5320_v9  ;;  %v5340_v9 = vld [vmem:[#allocation16_spill] sm:$0xff] }
 0x360   :  { %1815 = vmatpush.bf16.msra.mxu3 %v5321_v35  ;;  %v5344_v24 = vld [vmem:[#allocation20_spill] sm:$0xff] }
 0x362   :  { %1726 = vmatpush.bf16.msrb.mxu0 %v5322_v36  ;;  %v5336_v36 = vld [vmem:[#allocation57_spill] sm:$0xff] }
 0x363   :  { %1739 = vmatpush.bf16.msrb.mxu1 %v5323_v34  ;;  %1752 = vmatpush.bf16.msrb.mxu2 %v5324_v11  ;;  %v5334_v34 = vld [vmem:[#allocation39_spill] sm:$0xff]  ;;  %v5335_v11 = vld [vmem:[#allocation14_spill] sm:$0xff] }
 0x364   :  { %1816 = vmatpush.bf16.msra.mxu3 %v5325_v31 }
 0x366   :  { %1727 = vmatpush.bf16.msrb.mxu0 %v5326_v56  ;;  %v5337_v56 = vld [vmem:[#allocation64_spill] sm:$0xff] }
 0x367   :  { %1740 = vmatpush.bf16.msrb.mxu1 %v5327_v38  ;;  %1753 = vmatpush.bf16.msrb.mxu2 %v5328_v59  ;;  %v5338_v38 = vld [vmem:[#allocation13_spill] sm:$0xff]  ;;  %v5339_v59 = vld [vmem:[#allocation15_spill] sm:$0xff] }
 0x368   :  { %1817 = vmatpush.bf16.msra.mxu3 %v5329_v19  ;;  %v5347_v19 = vld [vmem:[#allocation78_spill] sm:$0xff] }
 0x36a   :  { %1728 = vmatpush.bf16.msrb.mxu0 %v5330_v27  ;;  %v5341_v27 = vld [vmem:[#allocation17_spill] sm:$0xff] }
 0x36b   :  { %1741 = vmatpush.bf16.msrb.mxu1 %v5331_v2  ;;  %1754 = vmatpush.bf16.msrb.mxu2 %v5332_v60  ;;  %v5342_v2 = vld [vmem:[#allocation18_spill] sm:$0xff]  ;;  %v5343_v60 = vld [vmem:[#allocation19_spill] sm:$0xff] }
 0x36c   :  { %1818 = vmatpush.bf16.msra.mxu3 %v5333_v42 }
 0x36e   :  { %1729 = vmatpush.bf16.msrb.mxu0 %v5334_v34  ;;  %v5345_v34 = vld [vmem:[#allocation21_spill] sm:$0xff] }
 0x36f   :  { %1742 = vmatpush.bf16.msrb.mxu1 %v5336_v36  ;;  %1755 = vmatpush.bf16.msrb.mxu2 %v5337_v56 }
 0x370   :  { %1819 = vmatpush.bf16.msra.mxu3 %v5338_v38 }
 0x372   :  { %1825 = vmatpush.bf16.msra.mxu0 %v5335_v11 }
 0x376   :  { %1826 = vmatpush.bf16.msra.mxu0 %v5339_v59 }
 0x37a   :  { %1827 = vmatpush.bf16.msra.mxu0 %v5340_v9 }
 0x37e   :  { %1828 = vmatpush.bf16.msra.mxu0 %v5341_v27 }
 0x382   :  { %1829 = vmatpush.bf16.msra.mxu0 %v5342_v2 }
 0x386   :  { %1830 = vmatpush.bf16.msra.mxu0 %v5343_v60 }
 0x38a   :  { %1831 = vmatpush.bf16.msra.mxu0 %v5344_v24  ;;  %v5348_v24 = vld [vmem:[#allocation50_spill] sm:$0xff] }
 0x38e   :  { %1832 = vmatpush.bf16.msra.mxu0 %v5345_v34  ;;  %v269_v34 = vadd.f32 %v5349_v53, %v5348_v24 }
 0x3ae   :  { %v1473_v11 = vpop.f32.mrf.mxu0  ;;  %v1486_v36 = vpop.f32.mrf.mxu1 }
 0x3af   :  { %v1474_v56 = vadd.f32 %v1473_v11, %v5346_v41  ;;  %v1513_v42 = vpop.f32.mrf.mxu3  ;;  %v1487_v60 = vadd.f32 %v1486_v36, %v5347_v19 }
 0x3b1   :  { %v1543_v38 = vadd.f32 %v1513_v42, %v1474_v56 }
 0x3b3   :  { %v2930_v47 = vmul.f32 -1.442695, %v1543_v38 }
 0x3b5   :  { %3103 = vpow2.f32 %v2930_v47  ;;  %v1499_v59 = vpop.f32.mrf.mxu2 }
 0x3b6   :  { %v1475_v9 = vpop.f32.mrf.mxu0  ;;  %v1488_v7 = vpop.f32.mrf.mxu1 }
 0x3b7   :  { %v1515_v27 = vpop.f32.mrf.mxu3 }
 0x3bb   :  { %v3104_v55 = vpop.eup %3103 }
 0x3bc   :  { %v1547_v2 = vadd.f32 1.0, %v3104_v55  ;;  %v5350_v55 = vld [vmem:[#allocation34_spill] sm:$0xff] }
 0x3bd   :  { %v1501_v20 = vpop.f32.mrf.mxu2 }
 0x3be   :  { %3105 = vrcp.f32 %v1547_v2  ;;  %v1526_v18 = vpop.f32.mrf.mxu0  ;;  %v1539_v31 = vpop.f32.mrf.mxu1  ;;  %v1559_v53 = vand.u32 2147483648, %v1547_v2  ;;  %vm1553_vm10 = vweird.f32 %v1547_v2 }
 0x3bf   :  { %v1563_v11 = vadd.f32 %v1526_v18, %v1487_v60  ;;  %v1616_v41 = vpop.f32.mrf.mxu3  ;;  %v1557_v18 = vand.u32 2147483647, %v1547_v2 }
 0x3c0   :  { %v1653_v56 = vadd.f32 %v1616_v41, %v269_v34 }
 0x3c1   :  { %v2931_v38 = vmul.f32 -1.442695, %v1563_v11  ;;  %vm1558_vm12 = vcmp.eq.f32.partialorder %v1557_v18, 8.507059e+37 }
 0x3c2   :  { %v2933_v47 = vmul.f32 -1.442695, %v1653_v56  ;;  %v1560_v56 = vor.u32 1.1754944e-38, %v1559_v53 }
 0x3c3   :  { %3107 = vpow2.f32 %v2931_v38 }
 0x3c4   :  { %v3106_v9 = vpop.eup %3105  ;;  %3109 = vpow2.f32 %v2933_v47 }
 0x3c5   :  { %v1549_v7 = vmul.f32 %v3106_v9, %v1547_v2  ;;  %v1603_v27 = vpop.f32.mrf.mxu2  ;;  %vm1554_vm9 = vweird.f32 %v3106_v9 }
 0x3c6   :  { %v1633_v42 = vadd.f32 %v1603_v27, %v5350_v55  ;;  %v1528_v36 = vpop.f32.mrf.mxu0  ;;  %v1541_v20 = vpop.f32.mrf.mxu1  ;;  %vm1555_vm11 = vmor %vm1553_vm10, %vm1554_vm9  ;;  %v5352_v55 = vld [vmem:[#allocation79_spill] sm:$0xff] }
 0x3c7   :  { %v1550_v19 = vsub.f32 1.0, %v1549_v7  ;;  %v1618_v21 = vpop.f32.mrf.mxu3 }
 0x3c8   :  { %v2932_v24 = vmul.f32 -1.442695, %v1633_v42  ;;  %v1500_v42 = vadd.f32 %v1499_v59, %v5352_v55 }
 0x3c9   :  { %v3108_v23 = vpop.eup %3107  ;;  %v1551_v3 = vmul.f32 %v3106_v9, %v1550_v19  ;;  %v4559_v19 = vld [vmem:[%s4985_s9] ss:$0 sm:$0xff] }
 0x3ca   :  { %v3110_v41 = vpop.eup %3109  ;;  %v1567_v34 = vadd.f32 1.0, %v3108_v23  ;;  %3111 = vpow2.f32 %v2932_v24  ;;  %5351 = vst [vmem:[#allocation46_spill] sm:$0xff] %v4559_v19  ;;  %v1583_v7 = vadd.f32 %v4559_v19, %v1539_v31 }
 0x3cb   :  { %v1552_v60 = vadd.f32 %v3106_v9, %v1551_v3  ;;  %v4554_v11 = vadd.f32 1.0, %v3110_v41 }
 0x3cc   :  { %3113 = vrcp.f32 %v1567_v34  ;;  %v1579_v18 = vand.u32 2147483648, %v1567_v34  ;;  %vm1573_vm14 = vweird.f32 %v1567_v34 }
 0x3cd   :  { %v1556_v38 = vsel %vm1555_vm11, %v3106_v9, %v1552_v60  ;;  %v1605_v47 = vpop.f32.mrf.mxu2  ;;  %3115 = vrcp.f32 %v4554_v11  ;;  %vm1663_vm6 = vweird.f32 %v4554_v11 }
 0x3ce   :  { %v1561_v21 = vsel %vm1558_vm12, %v1560_v56, %v1556_v38  ;;  %v1629_v23 = vpop.f32.mrf.mxu0  ;;  %v1577_v56 = vand.u32 2147483647, %v1567_v34 }
 0x3cf   :  { %v1584_v24 = vmul.f32 %v1583_v7, %v1561_v21  ;;  %v1580_v21 = vor.u32 1.1754944e-38, %v1579_v18 }
 0x3d0   :  { %v3112_v3 = vpop.eup %3111  ;;  %vm1578_vm0 = vcmp.eq.f32.partialorder %v1577_v56, 8.507059e+37  ;;  %v1673_v56 = vadd.f32 %v4461_v17, %v1629_v23 }
 0x3d1   :  { %v1637_v2 = vadd.f32 1.0, %v3112_v3  ;;  %v1585_v36 = vadd.f32 %v1584_v24, %v1500_v42 }
 0x3d2   :  { %v3114_v27 = vpop.eup %3113 }
 0x3d3   :  { %v1569_v9 = vmul.f32 %v3114_v27, %v1567_v34  ;;  %3117 = vrcp.f32 %v1637_v2  ;;  %v3116_v20 = vpop.eup %3115  ;;  %vm1574_vm13 = vweird.f32 %v3114_v27  ;;  %vm1643_vm2 = vweird.f32 %v1637_v2 }
 0x3d4   :  { %3119 = vtanh.f32 %v1585_v36  ;;  %v1659_v31 = vmul.f32 %v3116_v20, %v4554_v11  ;;  %vm1575_vm15 = vmor %vm1573_vm14, %vm1574_vm13  ;;  %vm1664_vm5 = vweird.f32 %v3116_v20 }
 0x3d5   :  { %v1570_v53 = vsub.f32 1.0, %v1569_v9  ;;  %vm1665_vm7 = vmor %vm1663_vm6, %vm1664_vm5 }
 0x3d6   :  { %v1631_v41 = vpop.f32.mrf.mxu0  ;;  %v1660_v24 = vsub.f32 1.0, %v1659_v31 }
 0x3d7   :  { %v1571_v60 = vmul.f32 %v3114_v27, %v1570_v53  ;;  %v1647_v41 = vand.u32 2147483647, %v1637_v2  ;;  %v1649_v53 = vand.u32 2147483648, %v1637_v2 }
 0x3d9   :  { %v1572_v38 = vadd.f32 %v3114_v27, %v1571_v60  ;;  %v3118_v47 = vpop.eup %3117  ;;  %v1661_v60 = vmul.f32 %v3116_v20, %v1660_v24  ;;  %vm1648_vm4 = vcmp.eq.f32.partialorder %v1647_v41, 8.507059e+37 }
 0x3da   :  { %v1639_v7 = vmul.f32 %v3118_v47, %v1637_v2  ;;  %v3120_v55 = vpop.eup %3119  ;;  %vm1644_vm1 = vweird.f32 %v3118_v47 }
 0x3db   :  { %v1576_v59 = vsel %vm1575_vm15, %v3114_v27, %v1572_v38  ;;  %vm1645_vm3 = vmor %vm1643_vm2, %vm1644_vm1  ;;  %v1650_v27 = vor.u32 1.1754944e-38, %v1649_v53  ;;  %v1662_v38 = vadd.f32 %v3116_v20, %v1661_v60  ;;  %v5356_v53 = vld [vmem:[#allocation42_spill] sm:$0xff] }
 0x3dc   :  { %v1581_v3 = vsel %vm1578_vm0, %v1580_v21, %v1576_v59  ;;  %v1640_v9 = vsub.f32 1.0, %v1639_v7  ;;  %v5353_v21 = vld [vmem:[#allocation70_spill] sm:$0xff] }
 0x3dd   :  { %v1587_v42 = vsub.f32 1.0, %v1581_v3  ;;  %v1589_v36 = vmul.f32 %v1581_v3, %v4468_v39  ;;  %v298_v39 = vadd.f32 %v5353_v21, %v5213_v33  ;;  %v5358_v60 = vld [vmem:[#allocation54_spill] sm:$0xff] }
 0x3de   :  { %v1641_v46 = vmul.f32 %v3118_v47, %v1640_v9  ;;  %v5366_v21 = vld [vmem:[#allocation58_spill] sm:$0xff] }
 0x3df   :  { %v1588_v19 = vmul.f32 %v3120_v55, %v1587_v42 }
 0x3e0   :  { %v1642_v34 = vadd.f32 %v3118_v47, %v1641_v46  ;;  %v1669_v46 = vand.u32 2147483648, %v4554_v11 }
 0x3e1   :  { %v4566_v45 = vadd.f32 %v1589_v36, %v1588_v19  ;;  %v1667_v19 = vand.u32 2147483647, %v4554_v11  ;;  %v5357_v36 = vld [vmem:[#allocation52_spill] sm:$0xff] }
 0x3e2   :  { %v1646_v18 = vsel %vm1645_vm3, %v3118_v47, %v1642_v34  ;;  %v1666_v47 = vsel %vm1665_vm7, %v3116_v20, %v1662_v38  ;;  %v1670_v59 = vor.u32 1.1754944e-38, %v1669_v46  ;;  %v5355_v20 = vld [vmem:[#allocation23_spill] sm:$0xff]  ;;  %v5359_v34 = vld [vmem:[#allocation10_spill] sm:$0xff]  ;;  %v5368_v46 = vld [vmem:[#allocation28_spill] sm:$0xff] }
 0x3e3   :  { %v1721_v31 = vpack.c.bf16 %v4566_v45, %v4566_v45  ;;  %v1651_v55 = vsel %vm1648_vm4, %v1650_v27, %v1646_v18  ;;  %vm1668_vm8 = vcmp.eq.f32.partialorder %v1667_v19, 8.507059e+37  ;;  %v5360_v27 = vld [vmem:[#allocation24_spill] sm:$0xff]  ;;  %v5361_v18 = vld [vmem:[#allocation43_spill] sm:$0xff] }
 0x3e4   :  { %v1674_v2 = vmul.f32 %v1673_v56, %v1651_v55  ;;  %v1671_v7 = vsel %vm1668_vm8, %v1670_v59, %v1666_v47  ;;  %v5362_v56 = vld [vmem:[#allocation56_spill] sm:$0xff]  ;;  %v5364_v38 = vld [vmem:[#allocation27_spill] sm:$0xff]  ;;  %v5365_v55 = vld [vmem:[#allocation45_spill] sm:$0xff] }
 0x3e5   :  { %1730 = vmatmul.bf16.vlgmr.msrb.gmra.mxu0 %v1721_v31  ;;  %v1677_v3 = vsub.f32 1.0, %v1671_v7  ;;  %v1679_v9 = vmul.f32 %v1671_v7, %v4473_v29  ;;  %v5354_v29 = vld [vmem:[#allocation40_spill] sm:$0xff]  ;;  %v5370_v19 = vld [vmem:[#allocation59_spill] sm:$0xff]  ;;  %v5374_v7 = vld [vmem:[#allocation61_spill] sm:$0xff] }
 0x3e6   :  { %1926 = vmatpush.bf16.msrb.mxu0 %v5214_v28  ;;  %v1675_v23 = vadd.f32 %v1674_v2, %v298_v39  ;;  %v5367_v39 = vld [vmem:[#allocation12_spill] sm:$0xff]  ;;  %v5369_v2 = vld [vmem:[#allocation49_spill] sm:$0xff]  ;;  %v5372_v47 = vld [vmem:[#allocation31_spill] sm:$0xff] }
 0x3e7   :  { %v5373_v59 = vld [vmem:[#allocation51_spill] sm:$0xff] }
 0x3e8   :  { %3121 = vtanh.f32 %v1675_v23  ;;  %v5371_v23 = vld [vmem:[#allocation13_spill] sm:$0xff] }
 0x3ea   :  { %1927 = vmatpush.bf16.msrb.mxu0 %v5215_v57 }
 0x3ee   :  { %1928 = vmatpush.bf16.msrb.mxu0 %v5216_v14  ;;  %v3122_v24 = vpop.eup %3121 }
 0x3ef   :  { %v1678_v42 = vmul.f32 %v3122_v24, %v1677_v3  ;;  %v5375_v3 = vld [vmem:[#allocation33_spill] sm:$0xff] }
 0x3f0   :  { %v5376_v24 = vld [vmem:[#allocation53_spill] sm:$0xff] }
 0x3f1   :  { %v4580_v41 = vadd.f32 %v1679_v9, %v1678_v42  ;;  %v5377_v42 = vld [vmem:[#allocation62_spill] sm:$0xff]  ;;  %v5378_v9 = vld [vmem:[#allocation36_spill] sm:$0xff] }
 0x3f2   :  { %1929 = vmatpush.bf16.msrb.mxu0 %v5217_v52 }
 0x3f3   :  { %v1681_v11 = vpack.c.bf16 %v4580_v41, %v4580_v41 }
 0x3f5   :  { %1690 = vmatmul.bf16.vlgmr.msra.gmra.mxu1 %v1681_v11  ;;  %1703 = vmatmul.bf16.vlgmr.msra.gmra.mxu2 %v1681_v11 }
 0x3f6   :  { %1716 = vmatmul.bf16.vlgmr.msrb.gmra.mxu3 %v1681_v11  ;;  %1833 = vmatmul.bf16.vlgmr.msra.gmra.mxu0 %v1681_v11 }
 0x3f7   :  { %1838 = vmatpush.bf16.msra.mxu1 %v3357_v16  ;;  %1900 = vmatpush.bf16.msra.mxu2 %v3623_v51 }
 0x3f8   :  { %1913 = vmatpush.bf16.msrb.mxu3 %v3755_v8  ;;  %1930 = vmatpush.bf16.msrb.mxu0 %v5218_v40 }
 0x3fb   :  { %1839 = vmatpush.bf16.msra.mxu1 %v3375_v22  ;;  %1901 = vmatpush.bf16.msra.mxu2 %v3644_v63 }
 0x3fc   :  { %1914 = vmatpush.bf16.msrb.mxu3 %v3791_v6  ;;  %1931 = vmatpush.bf16.msrb.mxu0 %v3870_v1 }
 0x3ff   :  { %1840 = vmatpush.bf16.msra.mxu1 %v3399_v30  ;;  %1902 = vmatpush.bf16.msra.mxu2 %v3664_v12 }
 0x400   :  { %1915 = vmatpush.bf16.msrb.mxu3 %v3829_v62  ;;  %1932 = vmatpush.bf16.msrb.mxu0 %v3897_v26 }
 0x403   :  { %1841 = vmatpush.bf16.msra.mxu1 %v3419_v37  ;;  %1903 = vmatpush.bf16.msra.mxu2 %v3685_v25 }
 0x404   :  { %1916 = vmatpush.bf16.msrb.mxu3 %v3858_v13  ;;  %1933 = vmatpush.bf16.msrb.mxu0 %v5262_v32 }
 0x405   :  { %1743 = vmatmul.bf16.vlgmr.msrb.gmra.mxu1 %v1721_v31  ;;  %1756 = vmatmul.bf16.vlgmr.msrb.gmra.mxu2 %v1721_v31  ;;  %v5363_v31 = vld [vmem:[#allocation11_spill] sm:$0xff] }
 0x406   :  { %1820 = vmatmul.bf16.vlgmr.msra.gmra.mxu3 %v1681_v11 }
 0x407   :  { %1842 = vmatpush.bf16.msra.mxu1 %v3439_v43  ;;  %1904 = vmatpush.bf16.msra.mxu2 %v3710_v44 }
 0x408   :  { %2030 = vmatpush.bf16.msra.mxu0 %v5309_v0  ;;  %1917 = vmatpush.bf16.msrb.mxu3 %v3888_v61 }
 0x40b   :  { %1843 = vmatpush.bf16.msra.mxu1 %v3469_v54  ;;  %1905 = vmatpush.bf16.msra.mxu2 %v3742_v5 }
 0x40c   :  { %2031 = vmatpush.bf16.msra.mxu0 %v5313_v58  ;;  %1918 = vmatpush.bf16.msrb.mxu3 %v3920_v48 }
 0x40f   :  { %1844 = vmatpush.bf16.msra.mxu1 %v3510_v4  ;;  %1906 = vmatpush.bf16.msra.mxu2 %v3780_v49 }
 0x410   :  { %2032 = vmatpush.bf16.msra.mxu0 %v5317_v50  ;;  %1919 = vmatpush.bf16.msrb.mxu3 %v3961_v15 }
 0x413   :  { %1845 = vmatpush.bf16.msra.mxu1 %v3523_v10  ;;  %1907 = vmatpush.bf16.msra.mxu2 %v5354_v29 }
 0x414   :  { %2033 = vmatpush.bf16.msra.mxu0 %v5321_v35  ;;  %1920 = vmatpush.bf16.msrb.mxu3 %v5357_v36  ;;  %v5399_v36 = vld [vmem:[#allocation79_spill] sm:$0xff] }
 0x416   :  { %1846 = vmatmul.bf16.vlgmr.msra.gmra.mxu1 %v1681_v11  ;;  %v5379_v11 = vld [vmem:[#allocation55_spill] sm:$0xff] }
 0x417   :  { %1940 = vmatpush.bf16.msrb.mxu1 %v5355_v20  ;;  %1953 = vmatpush.bf16.msrb.mxu2 %v5356_v53 }
 0x418   :  { %1966 = vmatpush.bf16.msra.mxu3 %v5358_v60  ;;  %2034 = vmatpush.bf16.msra.mxu0 %v5359_v34 }
 0x41b   :  { %1941 = vmatpush.bf16.msrb.mxu1 %v5360_v27  ;;  %1954 = vmatpush.bf16.msrb.mxu2 %v5361_v18  ;;  %v5395_v27 = vld [vmem:[#allocation78_spill] sm:$0xff] }
 0x41c   :  { %1967 = vmatpush.bf16.msra.mxu3 %v5362_v56  ;;  %2035 = vmatpush.bf16.msra.mxu0 %v5363_v31  ;;  %v5394_v31 = vld [vmem:[#allocation71_spill] sm:$0xff] }
 0x41f   :  { %1942 = vmatpush.bf16.msrb.mxu1 %v5364_v38  ;;  %1955 = vmatpush.bf16.msrb.mxu2 %v5365_v55 }
 0x420   :  { %1968 = vmatpush.bf16.msra.mxu3 %v5366_v21  ;;  %2036 = vmatpush.bf16.msra.mxu0 %v5367_v39 }
 0x423   :  { %1943 = vmatpush.bf16.msrb.mxu1 %v5368_v46  ;;  %1956 = vmatpush.bf16.msrb.mxu2 %v5369_v2  ;;  %v5380_v2 = vld [vmem:[#allocation63_spill] sm:$0xff] }
 0x424   :  { %1969 = vmatpush.bf16.msra.mxu3 %v5370_v19  ;;  %2037 = vmatpush.bf16.msra.mxu0 %v5371_v23  ;;  %v5381_v19 = vld [vmem:[#allocation39_spill] sm:$0xff]  ;;  %v5382_v23 = vld [vmem:[#allocation57_spill] sm:$0xff] }
 0x427   :  { %1944 = vmatpush.bf16.msrb.mxu1 %v5372_v47  ;;  %1957 = vmatpush.bf16.msrb.mxu2 %v5373_v59  ;;  %v5383_v47 = vld [vmem:[#allocation14_spill] sm:$0xff]  ;;  %v5384_v59 = vld [vmem:[#allocation64_spill] sm:$0xff] }
 0x428   :  { %1970 = vmatpush.bf16.msra.mxu3 %v5374_v7  ;;  %v5385_v7 = vld [vmem:[#allocation15_spill] sm:$0xff] }
 0x42b   :  { %1945 = vmatpush.bf16.msrb.mxu1 %v5375_v3  ;;  %1958 = vmatpush.bf16.msrb.mxu2 %v5376_v24  ;;  %v5386_v3 = vld [vmem:[#allocation16_spill] sm:$0xff]  ;;  %v5387_v24 = vld [vmem:[#allocation17_spill] sm:$0xff] }
 0x42c   :  { %1971 = vmatpush.bf16.msra.mxu3 %v5377_v42  ;;  %v5388_v42 = vld [vmem:[#allocation18_spill] sm:$0xff] }
 0x42f   :  { %1946 = vmatpush.bf16.msrb.mxu1 %v5378_v9  ;;  %1959 = vmatpush.bf16.msrb.mxu2 %v5379_v11  ;;  %v5389_v9 = vld [vmem:[#allocation19_spill] sm:$0xff]  ;;  %v5390_v11 = vld [vmem:[#allocation20_spill] sm:$0xff] }
 0x430   :  { %1972 = vmatpush.bf16.msra.mxu3 %v5380_v2  ;;  %v5391_v2 = vld [vmem:[#allocation21_spill] sm:$0xff] }
 0x433   :  { %1947 = vmatpush.bf16.msrb.mxu1 %v5381_v19  ;;  %1960 = vmatpush.bf16.msrb.mxu2 %v5382_v23 }
 0x434   :  { %1973 = vmatpush.bf16.msra.mxu3 %v5384_v59 }
 0x437   :  { %2043 = vmatpush.bf16.msra.mxu1 %v5383_v47  ;;  %v5392_v47 = vld [vmem:[#allocation77_spill] sm:$0xff] }
 0x43b   :  { %2044 = vmatpush.bf16.msra.mxu1 %v5385_v7 }
 0x43f   :  { %2045 = vmatpush.bf16.msra.mxu1 %v5386_v3 }
 0x443   :  { %2046 = vmatpush.bf16.msra.mxu1 %v5387_v24 }
 0x447   :  { %2047 = vmatpush.bf16.msra.mxu1 %v5388_v42  ;;  %v5393_v42 = vld [vmem:[#allocation50_spill] sm:$0xff] }
 0x44b   :  { %2048 = vmatpush.bf16.msra.mxu1 %v5389_v9  ;;  %v271_v9 = vadd.f32 %v5394_v31, %v5393_v42 }
 0x44f   :  { %2049 = vmatpush.bf16.msra.mxu1 %v5390_v11 }
 0x453   :  { %2050 = vmatpush.bf16.msra.mxu1 %v5391_v2 }
 0x462   :  { %v1731_v19 = vpop.f32.mrf.mxu0 }
 0x46a   :  { %v1733_v23 = vpop.f32.mrf.mxu0 }
 0x472   :  { %v1691_v46 = vpop.f32.mrf.mxu1 }
 0x473   :  { %v1692_v39 = vadd.f32 %v1691_v46, %v5392_v47  ;;  %v1834_v59 = vpop.f32.mrf.mxu0 }
 0x474   :  { %v1871_v56 = vadd.f32 %v1834_v59, %v271_v9 }
 0x475   :  { %v1761_v21 = vadd.f32 %v1731_v19, %v1692_v39 }
 0x476   :  { %v2937_v46 = vmul.f32 -1.442695, %v1871_v56 }
 0x477   :  { %v2934_v7 = vmul.f32 -1.442695, %v1761_v21 }
 0x478   :  { %v1704_v55 = vpop.f32.mrf.mxu2 }
 0x479   :  { %3123 = vpow2.f32 %v2934_v7  ;;  %v1717_v3 = vpop.f32.mrf.mxu3  ;;  %v1705_v23 = vadd.f32 %v1704_v55, %v5395_v27  ;;  %v5396_v7 = vld [vmem:[#allocation25_spill] sm:$0xff] }
 0x47a   :  { %v1693_v24 = vpop.f32.mrf.mxu1 }
 0x47b   :  { %v1836_v38 = vpop.f32.mrf.mxu0 }
 0x47c   :  { %v5397_v38 = vld [vmem:[#allocation38_spill] sm:$0xff] }
 0x47d   :  { %v242_v24 = vadd.f32 %v5397_v38, %v5396_v7 }
 0x47f   :  { %v3124_v11 = vpop.eup %3123 }
 0x480   :  { %v1765_v18 = vadd.f32 1.0, %v3124_v11  ;;  %v1706_v2 = vpop.f32.mrf.mxu2 }
 0x481   :  { %v1719_v34 = vpop.f32.mrf.mxu3 }
 0x482   :  { %3125 = vrcp.f32 %v1765_v18  ;;  %v1744_v47 = vpop.f32.mrf.mxu1  ;;  %v1777_v55 = vand.u32 2147483648, %v1765_v18  ;;  %vm1771_vm10 = vweird.f32 %v1765_v18 }
 0x483   :  { %v1781_v39 = vadd.f32 %v1744_v47, %v1705_v23  ;;  %3127 = vpow2.f32 %v2937_v46  ;;  %v1775_v47 = vand.u32 2147483647, %v1765_v18 }
 0x485   :  { %v2935_v21 = vmul.f32 -1.442695, %v1781_v39  ;;  %vm1776_vm12 = vcmp.eq.f32.partialorder %v1775_v47, 8.507059e+37 }
 0x487   :  { %3129 = vpow2.f32 %v2935_v21  ;;  %v1778_v21 = vor.u32 1.1754944e-38, %v1777_v55 }
 0x488   :  { %v3126_v19 = vpop.eup %3125  ;;  %v1757_v60 = vpop.f32.mrf.mxu2 }
 0x489   :  { %v1767_v31 = vmul.f32 %v3126_v19, %v1765_v18  ;;  %v1821_v59 = vpop.f32.mrf.mxu3  ;;  %v3128_v42 = vpop.eup %3127  ;;  %vm1772_vm9 = vweird.f32 %v3126_v19 }
 0x48a   :  { %v1851_v9 = vadd.f32 %v1821_v59, %v242_v24  ;;  %v1746_v11 = vpop.f32.mrf.mxu1  ;;  %v4659_v46 = vadd.f32 1.0, %v3128_v42  ;;  %vm1773_vm11 = vmor %vm1771_vm10, %vm1772_vm9 }
 0x48b   :  { %v1768_v2 = vsub.f32 1.0, %v1767_v31  ;;  %v5398_v11 = vld [vmem:[#allocation46_spill] sm:$0xff] }
 0x48c   :  { %v2936_v34 = vmul.f32 -1.442695, %v1851_v9  ;;  %v1801_v9 = vadd.f32 %v5398_v11, %v1757_v60  ;;  %vm1881_vm6 = vweird.f32 %v4659_v46 }
 0x48d   :  { %v3130_v27 = vpop.eup %3129  ;;  %v1769_v56 = vmul.f32 %v3126_v19, %v1768_v2 }
 0x48e   :  { %v1785_v23 = vadd.f32 1.0, %v3130_v27  ;;  %3131 = vpow2.f32 %v2936_v34 }
 0x48f   :  { %v1770_v39 = vadd.f32 %v3126_v19, %v1769_v56  ;;  %v1718_v56 = vadd.f32 %v1717_v3, %v5399_v36 }
 0x490   :  { %3133 = vrcp.f32 %v1785_v23  ;;  %v1759_v38 = vpop.f32.mrf.mxu2  ;;  %vm1791_vm14 = vweird.f32 %v1785_v23 }
 0x491   :  { %v1774_v24 = vsel %vm1773_vm11, %v3126_v19, %v1770_v39  ;;  %v1823_v31 = vpop.f32.mrf.mxu3  ;;  %3135 = vrcp.f32 %v4659_v46  ;;  %v1797_v19 = vand.u32 2147483648, %v1785_v23  ;;  %v1795_v39 = vand.u32 2147483647, %v1785_v23 }
 0x492   :  { %v1779_v59 = vsel %vm1776_vm12, %v1778_v21, %v1774_v24 }
 0x493   :  { %v1847_v2 = vpop.f32.mrf.mxu1  ;;  %v1802_v27 = vmul.f32 %v1801_v9, %v1779_v59  ;;  %vm1796_vm0 = vcmp.eq.f32.partialorder %v1795_v39, 8.507059e+37 }
 0x494   :  { %v3132_v7 = vpop.eup %3131  ;;  %v1891_v39 = vadd.f32 %v4461_v17, %v1847_v2 }
 0x495   :  { %v1855_v34 = vadd.f32 1.0, %v3132_v7  ;;  %v1803_v53 = vadd.f32 %v1802_v27, %v1718_v56  ;;  %v1798_v7 = vor.u32 1.1754944e-38, %v1797_v19 }
 0x496   :  { %v3134_v42 = vpop.eup %3133 }
 0x497   :  { %v1787_v18 = vmul.f32 %v3134_v42, %v1785_v23  ;;  %3137 = vrcp.f32 %v1855_v34  ;;  %v3136_v55 = vpop.eup %3135  ;;  %vm1792_vm13 = vweird.f32 %v3134_v42  ;;  %v1867_v11 = vand.u32 2147483648, %v1855_v34 }
 0x498   :  { %v1877_v60 = vmul.f32 %v3136_v55, %v4659_v46  ;;  %3139 = vtanh.f32 %v1803_v53  ;;  %vm1793_vm15 = vmor %vm1791_vm14, %vm1792_vm13  ;;  %vm1861_vm2 = vweird.f32 %v1855_v34  ;;  %vm1882_vm5 = vweird.f32 %v3136_v55 }
 0x499   :  { %v1788_v38 = vsub.f32 1.0, %v1787_v18  ;;  %vm1883_vm7 = vmor %vm1881_vm6, %vm1882_vm5 }
 0x49a   :  { %v1878_v9 = vsub.f32 1.0, %v1877_v60 }
 0x49b   :  { %v1789_v47 = vmul.f32 %v3134_v42, %v1788_v38  ;;  %v1849_v21 = vpop.f32.mrf.mxu1  ;;  %v1865_v38 = vand.u32 2147483647, %v1855_v34 }
 0x49d   :  { %v1790_v24 = vadd.f32 %v3134_v42, %v1789_v47  ;;  %v3138_v31 = vpop.eup %3137  ;;  %v1879_v47 = vmul.f32 %v3136_v55, %v1878_v9  ;;  %vm1866_vm4 = vcmp.eq.f32.partialorder %v1865_v38, 8.507059e+37  ;;  %v5406_v38 = vld [vmem:[#allocation10_spill] sm:$0xff] }
 0x49e   :  { %v1857_v59 = vmul.f32 %v3138_v31, %v1855_v34  ;;  %v3140_v36 = vpop.eup %3139  ;;  %vm1862_vm1 = vweird.f32 %v3138_v31 }
 0x49f   :  { %v1794_v3 = vsel %vm1793_vm15, %v3134_v42, %v1790_v24  ;;  %vm1863_vm3 = vmor %vm1861_vm2, %vm1862_vm1  ;;  %v1868_v42 = vor.u32 1.1754944e-38, %v1867_v11  ;;  %v1880_v24 = vadd.f32 %v3136_v55, %v1879_v47  ;;  %v5410_v47 = vld [vmem:[#allocation11_spill] sm:$0xff] }
 0x4a0   :  { %v1799_v27 = vsel %vm1796_vm0, %v1798_v7, %v1794_v3  ;;  %v1858_v18 = vsub.f32 1.0, %v1857_v59  ;;  %v5400_v7 = vld [vmem:[#allocation72_spill] sm:$0xff]  ;;  %v1887_v3 = vand.u32 2147483648, %v4659_v46 }
 0x4a1   :  { %v1805_v56 = vsub.f32 1.0, %v1799_v27  ;;  %v1807_v53 = vmul.f32 %v1799_v27, %v4566_v45  ;;  %v300_v45 = vadd.f32 %v5400_v7, %v5213_v33  ;;  %v1884_v11 = vsel %vm1883_vm7, %v3136_v55, %v1880_v24  ;;  %v5404_v55 = vld [vmem:[#allocation52_spill] sm:$0xff]  ;;  %v5416_v24 = vld [vmem:[#allocation49_spill] sm:$0xff] }
 0x4a2   :  { %v1859_v21 = vmul.f32 %v3138_v31, %v1858_v18  ;;  %v1888_v2 = vor.u32 1.1754944e-38, %v1887_v3  ;;  %v5418_v7 = vld [vmem:[#allocation13_spill] sm:$0xff]  ;;  %v5420_v3 = vld [vmem:[#allocation51_spill] sm:$0xff] }
 0x4a3   :  { %v1806_v20 = vmul.f32 %v3140_v36, %v1805_v56 }
 0x4a4   :  { %v1860_v23 = vadd.f32 %v3138_v31, %v1859_v21  ;;  %v5407_v21 = vld [vmem:[#allocation24_spill] sm:$0xff] }
 0x4a5   :  { %v4666_v29 = vadd.f32 %v1807_v53, %v1806_v20  ;;  %v1885_v20 = vand.u32 2147483647, %v4659_v46  ;;  %v5408_v53 = vld [vmem:[#allocation43_spill] sm:$0xff] }
 0x4a6   :  { %v1864_v19 = vsel %vm1863_vm3, %v3138_v31, %v1860_v23  ;;  %v5411_v23 = vld [vmem:[#allocation27_spill] sm:$0xff] }
 0x4a7   :  { %v1939_v60 = vpack.c.bf16 %v4666_v29, %v4666_v29  ;;  %v1869_v36 = vsel %vm1866_vm4, %v1868_v42, %v1864_v19  ;;  %vm1886_vm8 = vcmp.eq.f32.partialorder %v1885_v20, 8.507059e+37  ;;  %v5412_v42 = vld [vmem:[#allocation45_spill] sm:$0xff]  ;;  %v5413_v19 = vld [vmem:[#allocation58_spill] sm:$0xff] }
 0x4a8   :  { %v1892_v34 = vmul.f32 %v1891_v39, %v1869_v36  ;;  %v1889_v31 = vsel %vm1886_vm8, %v1888_v2, %v1884_v11  ;;  %v5414_v39 = vld [vmem:[#allocation12_spill] sm:$0xff]  ;;  %v5417_v36 = vld [vmem:[#allocation59_spill] sm:$0xff]  ;;  %v5422_v20 = vld [vmem:[#allocation33_spill] sm:$0xff] }
 0x4a9   :  { %1948 = vmatmul.bf16.vlgmr.msrb.gmra.mxu1 %v1939_v60  ;;  %v1895_v59 = vsub.f32 1.0, %v1889_v31  ;;  %v1897_v56 = vmul.f32 %v1889_v31, %v4580_v41  ;;  %v5403_v41 = vld [vmem:[#allocation42_spill] sm:$0xff]  ;;  %v5425_v2 = vld [vmem:[#allocation36_spill] sm:$0xff]  ;;  %v5426_v31 = vld [vmem:[#allocation55_spill] sm:$0xff] }
 0x4aa   :  { %2144 = vmatpush.bf16.msrb.mxu1 %v5214_v28  ;;  %v1893_v17 = vadd.f32 %v1892_v34, %v300_v45  ;;  %v5419_v45 = vld [vmem:[#allocation31_spill] sm:$0xff]  ;;  %v5421_v34 = vld [vmem:[#allocation61_spill] sm:$0xff]  ;;  %v5424_v11 = vld [vmem:[#allocation62_spill] sm:$0xff] }
 0x4ac   :  { %3141 = vtanh.f32 %v1893_v17  ;;  %v5423_v17 = vld [vmem:[#allocation53_spill] sm:$0xff] }
 0x4ae   :  { %2145 = vmatpush.bf16.msrb.mxu1 %v5215_v57 }
 0x4b2   :  { %2146 = vmatpush.bf16.msrb.mxu1 %v5216_v14  ;;  %v3142_v9 = vpop.eup %3141 }
 0x4b3   :  { %v1896_v27 = vmul.f32 %v3142_v9, %v1895_v59  ;;  %v5427_v59 = vld [vmem:[#allocation63_spill] sm:$0xff] }
 0x4b4   :  { %v5428_v9 = vld [vmem:[#allocation39_spill] sm:$0xff] }
 0x4b5   :  { %v4680_v18 = vadd.f32 %v1897_v56, %v1896_v27  ;;  %v5429_v27 = vld [vmem:[#allocation57_spill] sm:$0xff]  ;;  %v5430_v56 = vld [vmem:[#allocation14_spill] sm:$0xff] }
 0x4b6   :  { %2147 = vmatpush.bf16.msrb.mxu1 %v5217_v52 }
 0x4b7   :  { %v1899_v46 = vpack.c.bf16 %v4680_v18, %v4680_v18 }
 0x4b9   :  { %1908 = vmatmul.bf16.vlgmr.msra.gmra.mxu2 %v1899_v46  ;;  %1921 = vmatmul.bf16.vlgmr.msrb.gmra.mxu3 %v1899_v46 }
 0x4ba   :  { %1934 = vmatmul.bf16.vlgmr.msrb.gmra.mxu0 %v1899_v46  ;;  %2051 = vmatmul.bf16.vlgmr.msra.gmra.mxu1 %v1899_v46 }
 0x4bb   :  { %2056 = vmatpush.bf16.msra.mxu2 %v3357_v16  ;;  %2118 = vmatpush.bf16.msrb.mxu3 %v3623_v51 }
 0x4bc   :  { %2131 = vmatpush.bf16.msrb.mxu0 %v3755_v8  ;;  %2148 = vmatpush.bf16.msrb.mxu1 %v5218_v40 }
 0x4bf   :  { %2057 = vmatpush.bf16.msra.mxu2 %v3375_v22  ;;  %2119 = vmatpush.bf16.msrb.mxu3 %v3644_v63 }
 0x4c0   :  { %2132 = vmatpush.bf16.msrb.mxu0 %v3791_v6  ;;  %2149 = vmatpush.bf16.msrb.mxu1 %v3870_v1 }
 0x4c3   :  { %2058 = vmatpush.bf16.msra.mxu2 %v3399_v30  ;;  %2120 = vmatpush.bf16.msrb.mxu3 %v3664_v12 }
 0x4c4   :  { %2133 = vmatpush.bf16.msrb.mxu0 %v3829_v62  ;;  %2150 = vmatpush.bf16.msrb.mxu1 %v3897_v26 }
 0x4c7   :  { %2059 = vmatpush.bf16.msra.mxu2 %v3419_v37  ;;  %2121 = vmatpush.bf16.msrb.mxu3 %v3685_v25 }
 0x4c8   :  { %2134 = vmatpush.bf16.msrb.mxu0 %v3858_v13  ;;  %2151 = vmatpush.bf16.msrb.mxu1 %v5262_v32 }
 0x4c9   :  { %1961 = vmatmul.bf16.vlgmr.msrb.gmra.mxu2 %v1939_v60  ;;  %1974 = vmatmul.bf16.vlgmr.msra.gmra.mxu3 %v1939_v60  ;;  %v5415_v60 = vld [vmem:[#allocation28_spill] sm:$0xff] }
 0x4ca   :  { %2038 = vmatmul.bf16.vlgmr.msra.gmra.mxu0 %v1899_v46 }
 0x4cb   :  { %2060 = vmatpush.bf16.msra.mxu2 %v3439_v43  ;;  %2122 = vmatpush.bf16.msrb.mxu3 %v3710_v44 }
 0x4cc   :  { %2248 = vmatpush.bf16.msra.mxu1 %v5309_v0  ;;  %2135 = vmatpush.bf16.msrb.mxu0 %v3888_v61  ;;  %v5401_v0 = vld [vmem:[#allocation40_spill] sm:$0xff] }
 0x4cf   :  { %2061 = vmatpush.bf16.msra.mxu2 %v3469_v54  ;;  %2123 = vmatpush.bf16.msrb.mxu3 %v3742_v5 }
 0x4d0   :  { %2249 = vmatpush.bf16.msra.mxu1 %v5313_v58  ;;  %2136 = vmatpush.bf16.msrb.mxu0 %v3920_v48  ;;  %v5402_v58 = vld [vmem:[#allocation23_spill] sm:$0xff] }
 0x4d3   :  { %2062 = vmatpush.bf16.msra.mxu2 %v3510_v4  ;;  %2124 = vmatpush.bf16.msrb.mxu3 %v3780_v49 }
 0x4d4   :  { %2250 = vmatpush.bf16.msra.mxu1 %v5317_v50  ;;  %2137 = vmatpush.bf16.msrb.mxu0 %v3961_v15  ;;  %v5405_v50 = vld [vmem:[#allocation54_spill] sm:$0xff] }
 0x4d7   :  { %2063 = vmatpush.bf16.msra.mxu2 %v3523_v10  ;;  %2125 = vmatpush.bf16.msrb.mxu3 %v5401_v0 }
 0x4d8   :  { %2251 = vmatpush.bf16.msra.mxu1 %v5321_v35  ;;  %2138 = vmatpush.bf16.msrb.mxu0 %v5404_v55  ;;  %v5409_v35 = vld [vmem:[#allocation56_spill] sm:$0xff] }
 0x4da   :  { %2064 = vmatmul.bf16.vlgmr.msra.gmra.mxu2 %v1899_v46  ;;  %v5431_v46 = vld [vmem:[#allocation64_spill] sm:$0xff] }
 0x4db   :  { %2158 = vmatpush.bf16.msrb.mxu2 %v5402_v58  ;;  %2171 = vmatpush.bf16.msra.mxu3 %v5403_v41 }
 0x4dc   :  { %2184 = vmatpush.bf16.msra.mxu0 %v5405_v50  ;;  %2252 = vmatpush.bf16.msra.mxu1 %v5406_v38  ;;  %v5432_v38 = vld [vmem:[#allocation15_spill] sm:$0xff] }
 0x4df   :  { %2159 = vmatpush.bf16.msrb.mxu2 %v5407_v21  ;;  %2172 = vmatpush.bf16.msra.mxu3 %v5408_v53 }
 0x4e0   :  { %2185 = vmatpush.bf16.msra.mxu0 %v5409_v35  ;;  %2253 = vmatpush.bf16.msra.mxu1 %v5410_v47  ;;  %v5433_v47 = vld [vmem:[#allocation16_spill] sm:$0xff] }
 0x4e3   :  { %2160 = vmatpush.bf16.msrb.mxu2 %v5411_v23  ;;  %2173 = vmatpush.bf16.msra.mxu3 %v5412_v42 }
 0x4e4   :  { %2186 = vmatpush.bf16.msra.mxu0 %v5413_v19  ;;  %2254 = vmatpush.bf16.msra.mxu1 %v5414_v39  ;;  %v5434_v39 = vld [vmem:[#allocation17_spill] sm:$0xff]  ;;  %v5442_v19 = vld [vmem:[#allocation44_spill] sm:$0xff] }
 0x4e7   :  { %2161 = vmatpush.bf16.msrb.mxu2 %v5415_v60  ;;  %2174 = vmatpush.bf16.msra.mxu3 %v5416_v24 }
 0x4e8   :  { %2187 = vmatpush.bf16.msra.mxu0 %v5417_v36  ;;  %2255 = vmatpush.bf16.msra.mxu1 %v5418_v7  ;;  %v5435_v7 = vld [vmem:[#allocation18_spill] sm:$0xff] }
 0x4eb   :  { %2162 = vmatpush.bf16.msrb.mxu2 %v5419_v45  ;;  %2175 = vmatpush.bf16.msra.mxu3 %v5420_v3 }
 0x4ec   :  { %2188 = vmatpush.bf16.msra.mxu0 %v5421_v34 }
 0x4ef   :  { %2163 = vmatpush.bf16.msrb.mxu2 %v5422_v20  ;;  %2176 = vmatpush.bf16.msra.mxu3 %v5423_v17  ;;  %v5440_v17 = vld [vmem:[#allocation73_spill] sm:$0xff] }
 0x4f0   :  { %2189 = vmatpush.bf16.msra.mxu0 %v5424_v11 }
 0x4f3   :  { %2164 = vmatpush.bf16.msrb.mxu2 %v5425_v2  ;;  %2177 = vmatpush.bf16.msra.mxu3 %v5426_v31  ;;  %v5436_v2 = vld [vmem:[#allocation19_spill] sm:$0xff]  ;;  %v5437_v31 = vld [vmem:[#allocation20_spill] sm:$0xff] }
 0x4f4   :  { %2190 = vmatpush.bf16.msra.mxu0 %v5427_v59  ;;  %v5438_v59 = vld [vmem:[#allocation21_spill] sm:$0xff] }
 0x4f7   :  { %2165 = vmatpush.bf16.msrb.mxu2 %v5428_v9  ;;  %2178 = vmatpush.bf16.msra.mxu3 %v5429_v27 }
 0x4f8   :  { %2191 = vmatpush.bf16.msra.mxu0 %v5431_v46  ;;  %v5439_v46 = vld [vmem:[#allocation50_spill] sm:$0xff] }
 0x4fb   :  { %2261 = vmatpush.bf16.msra.mxu2 %v5430_v56 }
 0x4ff   :  { %2262 = vmatpush.bf16.msra.mxu2 %v5432_v38  ;;  %v274_v38 = vadd.f32 %v5440_v17, %v5439_v46 }
 0x503   :  { %2263 = vmatpush.bf16.msra.mxu2 %v5433_v47 }
 0x507   :  { %2264 = vmatpush.bf16.msra.mxu2 %v5434_v39  ;;  %v5441_v39 = vld [vmem:[#allocation77_spill] sm:$0xff] }
 0x50b   :  { %2265 = vmatpush.bf16.msra.mxu2 %v5435_v7 }
 0x50f   :  { %2266 = vmatpush.bf16.msra.mxu2 %v5436_v2 }
 0x513   :  { %2267 = vmatpush.bf16.msra.mxu2 %v5437_v31 }
 0x517   :  { %2268 = vmatpush.bf16.msra.mxu2 %v5438_v59 }
 0x526   :  { %v1949_v9 = vpop.f32.mrf.mxu1 }
 0x52e   :  { %v1951_v27 = vpop.f32.mrf.mxu1 }
 0x537   :  { %v4753_v11 = vpop.f32.mrf.mxu0  ;;  %v2052_v56 = vpop.f32.mrf.mxu1 }
 0x538   :  { %v2089_v20 = vadd.f32 %v2052_v56, %v274_v38  ;;  %v5443_v38 = vld [vmem:[#allocation78_spill] sm:$0xff] }
 0x53a   :  { %v2941_v7 = vmul.f32 -1.442695, %v2089_v20 }
 0x53c   :  { %v1909_v47 = vpop.f32.mrf.mxu2  ;;  %v1922_v34 = vpop.f32.mrf.mxu3  ;;  %3143 = vpow2.f32 %v2941_v7 }
 0x53d   :  { %v1910_v3 = vadd.f32 %v1909_v47, %v5441_v39  ;;  %v1923_v46 = vadd.f32 %v1922_v34, %v5443_v38 }
 0x53f   :  { %v1979_v45 = vadd.f32 %v1949_v9, %v1910_v3  ;;  %v1937_v2 = vpop.f32.mrf.mxu0  ;;  %v2054_v36 = vpop.f32.mrf.mxu1 }
 0x541   :  { %v2938_v31 = vmul.f32 -1.442695, %v1979_v45 }
 0x542   :  { %v3144_v60 = vpop.eup %3143 }
 0x543   :  { %3145 = vpow2.f32 %v2938_v31  ;;  %v4760_v35 = vadd.f32 1.0, %v3144_v60 }
 0x544   :  { %v1911_v59 = vpop.f32.mrf.mxu2  ;;  %v1924_v27 = vpop.f32.mrf.mxu3 }
 0x545   :  { %vm2099_vm4 = vweird.f32 %v4760_v35 }
 0x547   :  { %v2039_v24 = vpop.f32.mrf.mxu0 }
 0x548   :  { %v2069_v42 = vadd.f32 %v2039_v24, %v5442_v19 }
 0x549   :  { %v3146_v23 = vpop.eup %3145 }
 0x54a   :  { %v1983_v17 = vadd.f32 1.0, %v3146_v23  ;;  %v2940_v56 = vmul.f32 -1.442695, %v2069_v42 }
 0x54c   :  { %3147 = vrcp.f32 %v1983_v17  ;;  %v1962_v3 = vpop.f32.mrf.mxu2  ;;  %v1975_v20 = vpop.f32.mrf.mxu3  ;;  %v1995_v60 = vand.u32 2147483648, %v1983_v17  ;;  %vm1989_vm10 = vweird.f32 %v1983_v17 }
 0x54d   :  { %3149 = vpow2.f32 %v2940_v56  ;;  %v1999_v36 = vadd.f32 %v1962_v3, %v1923_v46  ;;  %v1993_v46 = vand.u32 2147483647, %v1983_v17 }
 0x54e   :  { %3151 = vrcp.f32 %v4760_v35 }
 0x54f   :  { %v2939_v45 = vmul.f32 -1.442695, %v1999_v36  ;;  %v2041_v9 = vpop.f32.mrf.mxu0  ;;  %v1996_v36 = vor.u32 1.1754944e-38, %v1995_v60  ;;  %vm1994_vm12 = vcmp.eq.f32.partialorder %v1993_v46, 8.507059e+37  ;;  %v5446_v46 = vld [vmem:[#allocation74_spill] sm:$0xff] }
 0x551   :  { %3153 = vpow2.f32 %v2939_v45 }
 0x552   :  { %v3148_v47 = vpop.eup %3147 }
 0x553   :  { %v3150_v7 = vpop.eup %3149  ;;  %v1985_v19 = vmul.f32 %v3148_v47, %v1983_v17  ;;  %vm1990_vm9 = vweird.f32 %v3148_v47 }
 0x554   :  { %v2073_v24 = vadd.f32 1.0, %v3150_v7  ;;  %v1964_v23 = vpop.f32.mrf.mxu2  ;;  %v1977_v42 = vpop.f32.mrf.mxu3  ;;  %vm1991_vm11 = vmor %vm1989_vm10, %vm1990_vm9 }
 0x555   :  { %v1986_v2 = vsub.f32 1.0, %v1985_v19  ;;  %v4763_v34 = vpop.eup %3151  ;;  %v5444_v19 = vld [vmem:[#allocation46_spill] sm:$0xff] }
 0x556   :  { %3155 = vrcp.f32 %v2073_v24  ;;  %v2095_v3 = vmul.f32 %v4763_v34, %v4760_v35  ;;  %v2019_v23 = vadd.f32 %v5444_v19, %v1975_v20  ;;  %v2083_v21 = vand.u32 2147483647, %v2073_v24 }
 0x557   :  { %v3154_v31 = vpop.eup %3153  ;;  %v1987_v59 = vmul.f32 %v3148_v47, %v1986_v2  ;;  %v2085_v32 = vand.u32 2147483648, %v2073_v24  ;;  %v303_v20 = vadd.f32 %v5446_v46, %v5213_v33  ;;  %vm2079_vm14 = vweird.f32 %v2073_v24 }
 0x558   :  { %v2003_v27 = vadd.f32 1.0, %v3154_v31  ;;  %v2096_v2 = vsub.f32 1.0, %v2095_v3  ;;  %vm2084_vm0 = vcmp.eq.f32.partialorder %v2083_v21, 8.507059e+37  ;;  %vm2100_vm2 = vweird.f32 %v4763_v34 }
 0x559   :  { %v1988_v56 = vadd.f32 %v3148_v47, %v1987_v59  ;;  %v5445_v59 = vld [vmem:[#allocation79_spill] sm:$0xff]  ;;  %v2105_v21 = vand.u32 2147483648, %v4760_v35  ;;  %vm2101_vm6 = vmor %vm2099_vm4, %vm2100_vm2 }
 0x55a   :  { %3157 = vrcp.f32 %v2003_v27  ;;  %v1936_v17 = vadd.f32 %v4753_v11, %v5445_v59  ;;  %v2013_v3 = vand.u32 2147483647, %v2003_v27  ;;  %vm2009_vm3 = vweird.f32 %v2003_v27 }
 0x55b   :  { %v1992_v45 = vsel %vm1991_vm11, %v3148_v47, %v1988_v56  ;;  %v2097_v47 = vmul.f32 %v4763_v34, %v2096_v2 }
 0x55c   :  { %v3156_v9 = vpop.eup %3155  ;;  %v1997_v7 = vsel %vm1994_vm12, %v1996_v36, %v1992_v45  ;;  %v2086_v45 = vor.u32 1.1754944e-38, %v2085_v32  ;;  %vm2014_vm7 = vcmp.eq.f32.partialorder %v2013_v3, 8.507059e+37 }
 0x55d   :  { %v2065_v42 = vpop.f32.mrf.mxu2  ;;  %v2075_v38 = vmul.f32 %v3156_v9, %v2073_v24  ;;  %v2020_v39 = vmul.f32 %v2019_v23, %v1997_v7  ;;  %vm2080_vm13 = vweird.f32 %v3156_v9 }
 0x55e   :  { %vm2081_vm15 = vmor %vm2079_vm14, %vm2080_vm13 }
 0x55f   :  { %v2076_v53 = vsub.f32 1.0, %v2075_v38  ;;  %v2021_v60 = vadd.f32 %v2020_v39, %v1936_v17  ;;  %v2015_v38 = vand.u32 2147483648, %v2003_v27 }
 0x560   :  { %v3158_v31 = vpop.eup %3157 }
 0x561   :  { %v2005_v50 = vmul.f32 %v3158_v31, %v2003_v27  ;;  %v2077_v41 = vmul.f32 %v3156_v9, %v2076_v53  ;;  %vm2010_vm1 = vweird.f32 %v3158_v31  ;;  %v4776_v53 = vld [vmem:[%s4981_s5] ss:$0 sm:$0xff]  ;;  %3159 = vtanh.f32 %v2021_v60 }
 0x562   :  { %v2109_v39 = vadd.f32 %v4776_v53, %v2065_v42  ;;  %vm2011_vm5 = vmor %vm2009_vm3, %vm2010_vm1  ;;  %v2016_v23 = vor.u32 1.1754944e-38, %v2015_v38  ;;  %v2106_v60 = vor.u32 1.1754944e-38, %v2105_v21 }
 0x563   :  { %v2006_v56 = vsub.f32 1.0, %v2005_v50  ;;  %v2078_v36 = vadd.f32 %v3156_v9, %v2077_v41  ;;  %v2098_v50 = vadd.f32 %v4763_v34, %v2097_v47 }
 0x565   :  { %v2007_v11 = vmul.f32 %v3158_v31, %v2006_v56  ;;  %v2082_v7 = vsel %vm2081_vm15, %v3156_v9, %v2078_v36  ;;  %v2067_v19 = vpop.f32.mrf.mxu2  ;;  %v2103_v9 = vand.u32 2147483647, %v4760_v35  ;;  %v2102_v47 = vsel %vm2101_vm6, %v4763_v34, %v2098_v50  ;;  %v5472_v50 = vld [vmem:[#allocation25_spill] sm:$0xff] }
 0x566   :  { %v2087_v41 = vsel %vm2084_vm0, %v2086_v45, %v2082_v7 }
 0x567   :  { %v2008_v32 = vadd.f32 %v3158_v31, %v2007_v11  ;;  %v2110_v24 = vmul.f32 %v2109_v39, %v2087_v41  ;;  %v3160_v56 = vpop.eup %3159  ;;  %vm2104_vm8 = vcmp.eq.f32.partialorder %v2103_v9, 8.507059e+37  ;;  %v5473_v41 = vld [vmem:[#allocation48_spill] sm:$0xff] }
 0x568   :  { %v2107_v36 = vsel %vm2104_vm8, %v2106_v60, %v2102_v47  ;;  %v247_v21 = vadd.f32 %v5473_v41, %v5472_v50  ;;  %v5477_v41 = vld [vmem:[#allocation76_spill] sm:$0xff] }
 0x569   :  { %v2012_v42 = vsel %vm2011_vm5, %v3158_v31, %v2008_v32  ;;  %v2111_v2 = vadd.f32 %v2110_v24, %v303_v20  ;;  %v2113_v11 = vsub.f32 1.0, %v2107_v36  ;;  %v2115_v3 = vmul.f32 %v2107_v36, %v4680_v18  ;;  %v5474_v32 = vld [vmem:[#allocation50_spill] sm:$0xff]  ;;  %v5475_v24 = vld [vmem:[#allocation75_spill] sm:$0xff] }
 0x56a   :  { %v2017_v17 = vsel %vm2014_vm7, %v2016_v23, %v2012_v42  ;;  %v276_v9 = vadd.f32 %v5475_v24, %v5474_v32  ;;  %v5476_v36 = vld [vmem:[#allocation78_spill] sm:$0xff] }
 0x56b   :  { %v2023_v46 = vsub.f32 1.0, %v2017_v17  ;;  %3161 = vtanh.f32 %v2111_v2  ;;  %v2025_v45 = vmul.f32 %v2017_v17, %v4666_v29 }
 0x56d   :  { %v2024_v27 = vmul.f32 %v3160_v56, %v2023_v46 }
 0x56f   :  { %v4787_v35 = vadd.f32 %v2025_v45, %v2024_v27 }
 0x571   :  { %v3162_v38 = vpop.eup %3161  ;;  %v2157_v31 = vpack.c.bf16 %v4787_v35, %v4787_v35 }
 0x572   :  { %v2114_v20 = vmul.f32 %v3162_v38, %v2113_v11 }
 0x573   :  { %2166 = vmatmul.bf16.vlgmr.msrb.gmra.mxu2 %v2157_v31 }
 0x574   :  { %v4792_v34 = vadd.f32 %v2115_v3, %v2114_v20  ;;  %2362 = vmatpush.bf16.msrb.mxu2 %v5214_v28 }
 0x576   :  { %v2117_v7 = vpack.c.bf16 %v4792_v34, %v4792_v34 }
 0x578   :  { %2126 = vmatmul.bf16.vlgmr.msrb.gmra.mxu3 %v2117_v7  ;;  %2139 = vmatmul.bf16.vlgmr.msrb.gmra.mxu0 %v2117_v7 }
 0x579   :  { %2152 = vmatmul.bf16.vlgmr.msrb.gmra.mxu1 %v2117_v7  ;;  %2274 = vmatpush.bf16.msrb.mxu3 %v3357_v16  ;;  %v5447_v16 = vld [vmem:[#allocation42_spill] sm:$0xff] }
 0x57a   :  { %2336 = vmatpush.bf16.msrb.mxu0 %v3623_v51  ;;  %2349 = vmatpush.bf16.msrb.mxu1 %v3755_v8  ;;  %v5455_v51 = vld [vmem:[#allocation58_spill] sm:$0xff]  ;;  %v5462_v8 = vld [vmem:[#allocation33_spill] sm:$0xff] }
 0x57b   :  { %2363 = vmatpush.bf16.msrb.mxu2 %v5215_v57 }
 0x57d   :  { %2275 = vmatpush.bf16.msrb.mxu3 %v3375_v22  ;;  %v5448_v22 = vld [vmem:[#allocation54_spill] sm:$0xff] }
 0x57e   :  { %2337 = vmatpush.bf16.msrb.mxu0 %v3644_v63  ;;  %2350 = vmatpush.bf16.msrb.mxu1 %v3791_v6  ;;  %v5456_v63 = vld [vmem:[#allocation28_spill] sm:$0xff]  ;;  %v5464_v6 = vld [vmem:[#allocation62_spill] sm:$0xff] }
 0x57f   :  { %2364 = vmatpush.bf16.msrb.mxu2 %v5216_v14 }
 0x581   :  { %2276 = vmatpush.bf16.msrb.mxu3 %v3399_v30  ;;  %v5449_v30 = vld [vmem:[#allocation47_spill] sm:$0xff] }
 0x582   :  { %2338 = vmatpush.bf16.msrb.mxu0 %v3664_v12  ;;  %2351 = vmatpush.bf16.msrb.mxu1 %v3829_v62  ;;  %v5457_v12 = vld [vmem:[#allocation49_spill] sm:$0xff]  ;;  %v5465_v62 = vld [vmem:[#allocation36_spill] sm:$0xff] }
 0x583   :  { %2269 = vmatmul.bf16.vlgmr.msra.gmra.mxu2 %v2117_v7 }
 0x584   :  { %2365 = vmatpush.bf16.msrb.mxu2 %v5217_v52 }
 0x585   :  { %2277 = vmatpush.bf16.msrb.mxu3 %v3419_v37  ;;  %v5450_v37 = vld [vmem:[#allocation24_spill] sm:$0xff] }
 0x586   :  { %2339 = vmatpush.bf16.msrb.mxu0 %v3685_v25  ;;  %2352 = vmatpush.bf16.msrb.mxu1 %v3858_v13  ;;  %v5458_v25 = vld [vmem:[#allocation59_spill] sm:$0xff] }
 0x587   :  { %v5466_v13 = vld [vmem:[#allocation55_spill] sm:$0xff] }
 0x588   :  { %2179 = vmatmul.bf16.vlgmr.msra.gmra.mxu3 %v2157_v31  ;;  %2192 = vmatmul.bf16.vlgmr.msra.gmra.mxu0 %v2157_v31 }
 0x589   :  { %2256 = vmatmul.bf16.vlgmr.msra.gmra.mxu1 %v2117_v7  ;;  %2278 = vmatpush.bf16.msrb.mxu3 %v3439_v43  ;;  %v5451_v43 = vld [vmem:[#allocation43_spill] sm:$0xff] }
 0x58a   :  { %2340 = vmatpush.bf16.msrb.mxu0 %v3710_v44  ;;  %2353 = vmatpush.bf16.msrb.mxu1 %v3888_v61  ;;  %v5459_v44 = vld [vmem:[#allocation31_spill] sm:$0xff] }
 0x58b   :  { %2366 = vmatpush.bf16.msrb.mxu2 %v5218_v40  ;;  %v5467_v61 = vld [vmem:[#allocation63_spill] sm:$0xff]  ;;  %v5471_v40 = vld [vmem:[#allocation77_spill] sm:$0xff] }
 0x58d   :  { %2279 = vmatpush.bf16.msrb.mxu3 %v3469_v54  ;;  %v5452_v54 = vld [vmem:[#allocation56_spill] sm:$0xff] }
 0x58e   :  { %2341 = vmatpush.bf16.msrb.mxu0 %v3742_v5  ;;  %2354 = vmatpush.bf16.msrb.mxu1 %v3920_v48  ;;  %v5461_v5 = vld [vmem:[#allocation61_spill] sm:$0xff] }
 0x58f   :  { %2367 = vmatpush.bf16.msrb.mxu2 %v3870_v1  ;;  %v5460_v1 = vld [vmem:[#allocation51_spill] sm:$0xff]  ;;  %v5469_v48 = vld [vmem:[#allocation57_spill] sm:$0xff] }
 0x591   :  { %2280 = vmatpush.bf16.msrb.mxu3 %v3510_v4  ;;  %v5453_v4 = vld [vmem:[#allocation27_spill] sm:$0xff] }
 0x592   :  { %2342 = vmatpush.bf16.msrb.mxu0 %v3780_v49  ;;  %2355 = vmatpush.bf16.msrb.mxu1 %v3961_v15  ;;  %v5463_v49 = vld [vmem:[#allocation53_spill] sm:$0xff]  ;;  %v5470_v15 = vld [vmem:[#allocation64_spill] sm:$0xff] }
 0x593   :  { %2368 = vmatpush.bf16.msrb.mxu2 %v3897_v26  ;;  %v5468_v26 = vld [vmem:[#allocation39_spill] sm:$0xff] }
 0x595   :  { %2281 = vmatpush.bf16.msrb.mxu3 %v3523_v10  ;;  %v5454_v10 = vld [vmem:[#allocation45_spill] sm:$0xff] }
 0x596   :  { %2343 = vmatpush.bf16.msrb.mxu0 %v5401_v0  ;;  %2356 = vmatpush.bf16.msrb.mxu1 %v5404_v55 }
 0x597   :  { %2369 = vmatpush.bf16.msrb.mxu2 %v5449_v30 }
 0x598   :  { %2282 = vmatmul.bf16.vlgmr.msrb.gmra.mxu3 %v2117_v7 }
 0x599   :  { %2376 = vmatpush.bf16.msra.mxu3 %v5402_v58 }
 0x59a   :  { %2389 = vmatpush.bf16.msra.mxu0 %v5447_v16  ;;  %2402 = vmatpush.bf16.msra.mxu1 %v5448_v22 }
 0x59d   :  { %2377 = vmatpush.bf16.msra.mxu3 %v5450_v37 }
 0x59e   :  { %2390 = vmatpush.bf16.msra.mxu0 %v5451_v43  ;;  %2403 = vmatpush.bf16.msra.mxu1 %v5452_v54 }
 0x5a1   :  { %2378 = vmatpush.bf16.msra.mxu3 %v5453_v4 }
 0x5a2   :  { %2391 = vmatpush.bf16.msra.mxu0 %v5454_v10  ;;  %2404 = vmatpush.bf16.msra.mxu1 %v5455_v51 }
 0x5a5   :  { %2379 = vmatpush.bf16.msra.mxu3 %v5456_v63 }
 0x5a6   :  { %2392 = vmatpush.bf16.msra.mxu0 %v5457_v12  ;;  %2405 = vmatpush.bf16.msra.mxu1 %v5458_v25 }
 0x5a9   :  { %2380 = vmatpush.bf16.msra.mxu3 %v5459_v44 }
 0x5aa   :  { %2393 = vmatpush.bf16.msra.mxu0 %v5460_v1  ;;  %2406 = vmatpush.bf16.msra.mxu1 %v5461_v5 }
 0x5ad   :  { %2381 = vmatpush.bf16.msra.mxu3 %v5462_v8 }
 0x5ae   :  { %2394 = vmatpush.bf16.msra.mxu0 %v5463_v49  ;;  %2407 = vmatpush.bf16.msra.mxu1 %v5464_v6 }
 0x5b1   :  { %2382 = vmatpush.bf16.msra.mxu3 %v5465_v62  ;;  %v4866_v62 = vld [vmem:[%s4985_s9] ss:$0 sm:$0xff] }
 0x5b2   :  { %2395 = vmatpush.bf16.msra.mxu0 %v5466_v13  ;;  %2408 = vmatpush.bf16.msra.mxu1 %v5467_v61 }
 0x5b5   :  { %2383 = vmatpush.bf16.msra.mxu3 %v5468_v26 }
 0x5b6   :  { %2396 = vmatpush.bf16.msra.mxu0 %v5469_v48  ;;  %2409 = vmatpush.bf16.msra.mxu1 %v5470_v15 }
 0x5f5   :  { %v2140_v28 = vpop.f32.mrf.mxu0 }
 0x5f6   :  { %v4852_v57 = vpop.f32.mrf.mxu1  ;;  %v2167_v14 = vpop.f32.mrf.mxu2  ;;  %v2141_v45 = vadd.f32 %v2140_v28, %v5476_v36 }
 0x5fb   :  { %v2127_v52 = vpop.f32.mrf.mxu3 }
 0x5fc   :  { %v2128_v29 = vadd.f32 %v2127_v52, %v5471_v40 }
 0x5fd   :  { %v2142_v18 = vpop.f32.mrf.mxu0 }
 0x5fe   :  { %v2197_v0 = vadd.f32 %v2167_v14, %v2128_v29  ;;  %v2155_v58 = vpop.f32.mrf.mxu1  ;;  %v2169_v55 = vpop.f32.mrf.mxu2  ;;  %v2154_v29 = vadd.f32 %v4852_v57, %v5445_v59 }
 0x600   :  { %v2942_v39 = vmul.f32 -1.442695, %v2197_v0 }
 0x602   :  { %3163 = vpow2.f32 %v2942_v39 }
 0x603   :  { %v2129_v19 = vpop.f32.mrf.mxu3 }
 0x605   :  { %v2193_v23 = vpop.f32.mrf.mxu0 }
 0x606   :  { %v2257_v42 = vpop.f32.mrf.mxu1  ;;  %v2270_v2 = vpop.f32.mrf.mxu2  ;;  %v2237_v13 = vadd.f32 %v4866_v62, %v2193_v23 }
 0x607   :  { %v2287_v17 = vadd.f32 %v2257_v42, %v247_v21  ;;  %v2307_v47 = vadd.f32 %v2270_v2, %v276_v9  ;;  %v305_v21 = vadd.f32 %v5477_v41, %v5213_v33 }
 0x608   :  { %v3164_v60 = vpop.eup %3163 }
 0x609   :  { %v2201_v46 = vadd.f32 1.0, %v3164_v60  ;;  %v2944_v56 = vmul.f32 -1.442695, %v2287_v17  ;;  %v2945_v27 = vmul.f32 -1.442695, %v2307_v47 }
 0x60b   :  { %3165 = vrcp.f32 %v2201_v46  ;;  %v2180_v11 = vpop.f32.mrf.mxu3  ;;  %v2213_v51 = vand.u32 2147483648, %v2201_v46  ;;  %v2211_v25 = vand.u32 2147483647, %v2201_v46  ;;  %vm2207_vm10 = vweird.f32 %v2201_v46 }
 0x60c   :  { %3167 = vpow2.f32 %v2944_v56  ;;  %v2217_v38 = vadd.f32 %v2180_v11, %v2141_v45 }
 0x60d   :  { %3169 = vpow2.f32 %v2945_v27  ;;  %v2195_v31 = vpop.f32.mrf.mxu0  ;;  %v2214_v5 = vor.u32 1.1754944e-38, %v2213_v51  ;;  %vm2212_vm12 = vcmp.eq.f32.partialorder %v2211_v25, 8.507059e+37 }
 0x60e   :  { %v2943_v20 = vmul.f32 -1.442695, %v2217_v38  ;;  %v2259_v3 = vpop.f32.mrf.mxu1  ;;  %v2272_v7 = vpop.f32.mrf.mxu2 }
 0x610   :  { %3171 = vpow2.f32 %v2943_v20 }
 0x611   :  { %v3166_v16 = vpop.eup %3165 }
 0x612   :  { %v3168_v22 = vpop.eup %3167  ;;  %v2203_v30 = vmul.f32 %v3166_v16, %v2201_v46  ;;  %vm2208_vm9 = vweird.f32 %v3166_v16 }
 0x613   :  { %v3170_v37 = vpop.eup %3169  ;;  %v2291_v43 = vadd.f32 1.0, %v3168_v22  ;;  %v2182_v54 = vpop.f32.mrf.mxu3  ;;  %vm2209_vm11 = vmor %vm2207_vm10, %vm2208_vm9 }
 0x614   :  { %v2204_v4 = vsub.f32 1.0, %v2203_v30  ;;  %v4860_v10 = vadd.f32 1.0, %v3170_v37 }
 0x615   :  { %3173 = vrcp.f32 %v2291_v43  ;;  %v2301_v0 = vand.u32 2147483647, %v2291_v43  ;;  %v2303_v58 = vand.u32 2147483648, %v2291_v43  ;;  %vm2297_vm14 = vweird.f32 %v2291_v43 }
 0x616   :  { %v3172_v63 = vpop.eup %3171  ;;  %v2205_v12 = vmul.f32 %v3166_v16, %v2204_v4  ;;  %3175 = vrcp.f32 %v4860_v10  ;;  %v2323_v33 = vand.u32 2147483648, %v4860_v10  ;;  %vm2317_vm4 = vweird.f32 %v4860_v10 }
 0x617   :  { %v2221_v44 = vadd.f32 1.0, %v3172_v63  ;;  %vm2302_vm0 = vcmp.eq.f32.partialorder %v2301_v0, 8.507059e+37  ;;  %v2304_v42 = vor.u32 1.1754944e-38, %v2303_v58  ;;  %v2321_v45 = vand.u32 2147483647, %v4860_v10 }
 0x618   :  { %v2206_v1 = vadd.f32 %v3166_v16, %v2205_v12  ;;  %v2324_v3 = vor.u32 1.1754944e-38, %v2323_v33  ;;  %v2463_v33 = vlaneseq }
 0x619   :  { %3177 = vrcp.f32 %v2221_v44  ;;  %v2231_v9 = vand.u32 2147483647, %v2221_v44  ;;  %v2233_v23 = vand.u32 2147483648, %v2221_v44  ;;  %vm2227_vm3 = vweird.f32 %v2221_v44 }
 0x61a   :  { %v2210_v8 = vsel %vm2209_vm11, %v3166_v16, %v2206_v1  ;;  %vm2322_vm8 = vcmp.eq.f32.partialorder %v2321_v45, 8.507059e+37 }
 0x61b   :  { %v3174_v49 = vpop.eup %3173  ;;  %v2215_v6 = vsel %vm2212_vm12, %v2214_v5, %v2210_v8  ;;  %v2283_v61 = vpop.f32.mrf.mxu3  ;;  %v2234_v11 = vor.u32 1.1754944e-38, %v2233_v23  ;;  %vm2232_vm7 = vcmp.eq.f32.partialorder %v2231_v9, 8.507059e+37 }
 0x61c   :  { %v3176_v26 = vpop.eup %3175  ;;  %v2293_v48 = vmul.f32 %v3174_v49, %v2291_v43  ;;  %v2238_v15 = vmul.f32 %v2237_v13, %v2215_v6  ;;  %vm2298_vm13 = vweird.f32 %v3174_v49  ;;  %v2327_v47 = vadd.f32 %v4776_v53, %v2283_v61 }
 0x61d   :  { %v2313_v28 = vmul.f32 %v3176_v26, %v4860_v10  ;;  %vm2299_vm15 = vmor %vm2297_vm14, %vm2298_vm13  ;;  %vm2318_vm2 = vweird.f32 %v3176_v26 }
 0x61e   :  { %v2294_v14 = vsub.f32 1.0, %v2293_v48  ;;  %v2239_v19 = vadd.f32 %v2238_v15, %v2154_v29  ;;  %vm2319_vm6 = vmor %vm2317_vm4, %vm2318_vm2 }
 0x61f   :  { %v3178_v52 = vpop.eup %3177  ;;  %v2314_v18 = vsub.f32 1.0, %v2313_v28 }
 0x620   :  { %v2223_v55 = vmul.f32 %v3178_v52, %v2221_v44  ;;  %v2295_v39 = vmul.f32 %v3174_v49, %v2294_v14  ;;  %vm2228_vm1 = vweird.f32 %v3178_v52  ;;  %3179 = vtanh.f32 %v2239_v19 }
 0x621   :  { %v2315_v50 = vmul.f32 %v3176_v26, %v2314_v18  ;;  %vm2229_vm5 = vmor %vm2227_vm3, %vm2228_vm1 }
 0x622   :  { %v2224_v32 = vsub.f32 1.0, %v2223_v55  ;;  %v2296_v24 = vadd.f32 %v3174_v49, %v2295_v39 }
 0x623   :  { %v2285_v57 = vpop.f32.mrf.mxu3  ;;  %v2316_v60 = vadd.f32 %v3176_v26, %v2315_v50 }
 0x624   :  { %v2225_v2 = vmul.f32 %v3178_v52, %v2224_v32  ;;  %v2300_v17 = vsel %vm2299_vm15, %v3174_v49, %v2296_v24 }
 0x625   :  { %v2305_v46 = vsel %vm2302_vm0, %v2304_v42, %v2300_v17  ;;  %v2320_v53 = vsel %vm2319_vm6, %v3176_v26, %v2316_v60  ;;  %vm2585_vm6 = vcmask 27648  }
 0x626   :  { %v2226_v56 = vadd.f32 %v3178_v52, %v2225_v2  ;;  %v2328_v27 = vmul.f32 %v2327_v47, %v2305_v46  ;;  %v3180_v16 = vpop.eup %3179  ;;  %v2325_v22 = vsel %vm2322_vm8, %v2324_v3, %v2320_v53 }
 0x627   :  { %v2331_v54 = vsub.f32 1.0, %v2325_v22  ;;  %v2333_v63 = vmul.f32 %v2325_v22, %v4792_v34 }
 0x628   :  { %v2230_v38 = vsel %vm2229_vm5, %v3178_v52, %v2226_v56  ;;  %v2329_v31 = vadd.f32 %v2328_v27, %v305_v21  ;;  %vm2561_vm5 = vcmask 523264  }
 0x629   :  { %v2235_v20 = vsel %vm2232_vm7, %v2234_v11, %v2230_v38  ;;  %v2464_v38 = vshrl.u32 %v2463_v33, 7 }
 0x62a   :  { %3181 = vtanh.f32 %v2329_v31  ;;  %v2241_v7 = vsub.f32 1.0, %v2235_v20  ;;  %v2243_v37 = vmul.f32 %v2235_v20, %v4787_v35 }
 0x62b   :  { %vm2465_vm1 = vcmp.lt.s32.totalorder %v2464_v38, 4  ;;  %v2550_v38 = vld [vmem:[%s4990_s14 + $0x8] sm:$0xff] }
 0x62c   :  { %v2242_v30 = vmul.f32 %v3180_v16, %v2241_v7  ;;  %v3225_v16 = vmov 0.0  }
 0x62d   :  { %v2948_v22 = vsel %vm2465_vm1, 1.0, %v3225_v16 }
 0x62e   :  { %v4879_v43 = vadd.f32 %v2243_v37, %v2242_v30  ;;  %v2523_v37 = vld [vmem:[%s4988_s12 + $0x78] sm:$0xff] }
 0x62f   :  { %2528 = vmatpush.msra.mxu2 %v2523_v37 }
 0x630   :  { %v3182_v4 = vpop.eup %3181  ;;  %v2375_v10 = vpack.c.bf16 %v4879_v43, %v4879_v43 }
 0x631   :  { %v2332_v51 = vmul.f32 %v3182_v4, %v2331_v54  ;;  %v2522_v4 = vld [vmem:[%s4988_s12 + $0x70] sm:$0xff] }
 0x632   :  { %2384 = vmatmul.bf16.vlgmr.msra.gmra.mxu3 %v2375_v10  ;;  %2529 = vmatpush.msra.mxu2 %v2522_v4 }
 0x633   :  { %v2334_v12 = vadd.f32 %v2333_v63, %v2332_v51  ;;  %v2521_v51 = vld [vmem:[%s4988_s12 + $0x68] sm:$0xff] }
 0x634   :  { %2530 = vmatpush.msra.mxu2 %v2521_v51 }
 0x635   :  { %v2335_v25 = vpack.c.bf16 %v2334_v12, %v2334_v12  ;;  %v2519_v12 = vld [vmem:[%s4988_s12 + $0x58] sm:$0xff] }
 0x637   :  { %2344 = vmatmul.bf16.vlgmr.msrb.gmra.mxu0 %v2335_v25  ;;  %2357 = vmatmul.bf16.vlgmr.msrb.gmra.mxu1 %v2335_v25 }
 0x638   :  { %2370 = vmatmul.bf16.vlgmr.msrb.gmra.mxu2 %v2335_v25 }
 0x647   :  { %2397 = vmatmul.bf16.vlgmr.msra.gmra.mxu0 %v2375_v10  ;;  %2410 = vmatmul.bf16.vlgmr.msra.gmra.mxu1 %v2375_v10 }
 0x6b4   :  { %v2345_v44 = vpop.f32.mrf.mxu0  ;;  %v2358_v35 = vpop.f32.mrf.mxu1 }
 0x6b5   :  { %v2346_v1 = vadd.f32 %v2345_v44, %v5471_v40  ;;  %v2385_v5 = vpop.f32.mrf.mxu3  ;;  %v2359_v15 = vadd.f32 %v2358_v35, %v5476_v36  ;;  %v2518_v44 = vld [vmem:[%s4988_s12 + $0x50] sm:$0xff] }
 0x6b7   :  { %v2415_v8 = vadd.f32 %v2385_v5, %v2346_v1  ;;  %v2517_v1 = vld [vmem:[%s4988_s12 + $0x48] sm:$0xff] }
 0x6b9   :  { %v2946_v49 = vmul.f32 -1.442695, %v2415_v8  ;;  %v2516_v8 = vld [vmem:[%s4988_s12 + $0x40] sm:$0xff] }
 0x6bb   :  { %3183 = vpow2.f32 %v2946_v49  ;;  %v2371_v6 = vpop.f32.mrf.mxu2 }
 0x6bc   :  { %v2347_v13 = vpop.f32.mrf.mxu0  ;;  %v2360_v61 = vpop.f32.mrf.mxu1  ;;  %v2372_v17 = vadd.f32 %v2371_v6, %v5445_v59  ;;  %v2515_v6 = vld [vmem:[%s4988_s12 + $0x38] sm:$0xff] }
 0x6bd   :  { %v2387_v34 = vpop.f32.mrf.mxu3  ;;  %v2514_v61 = vld [vmem:[%s4988_s12 + $0x30] sm:$0xff] }
 0x6c1   :  { %v3184_v26 = vpop.eup %3183 }
 0x6c2   :  { %v2419_v48 = vadd.f32 1.0, %v3184_v26  ;;  %v2513_v26 = vld [vmem:[%s4988_s12 + $0x28] sm:$0xff] }
 0x6c3   :  { %v2373_v28 = vpop.f32.mrf.mxu2 }
 0x6c4   :  { %3185 = vrcp.f32 %v2419_v48  ;;  %v2398_v14 = vpop.f32.mrf.mxu0  ;;  %v2411_v52 = vpop.f32.mrf.mxu1  ;;  %v2431_v19 = vand.u32 2147483648, %v2419_v48  ;;  %v2429_v21 = vand.u32 2147483647, %v2419_v48  ;;  %vm2425_vm10 = vweird.f32 %v2419_v48 }
 0x6c5   :  { %v2435_v29 = vadd.f32 %v2398_v14, %v2359_v15  ;;  %v2455_v42 = vadd.f32 %v4866_v62, %v2411_v52  ;;  %v2512_v15 = vld [vmem:[%s4988_s12 + $0x20] sm:$0xff]  ;;  %v2511_v14 = vld [vmem:[%s4988_s12 + $0x18] sm:$0xff] }
 0x6c6   :  { %v2432_v36 = vor.u32 1.1754944e-38, %v2431_v19  ;;  %vm2430_vm12 = vcmp.eq.f32.partialorder %v2429_v21, 8.507059e+37  ;;  %v2556_v19 = vld [vmem:[%s4990_s14 + $0x38] sm:$0xff]  ;;  %v2554_v21 = vld [vmem:[%s4990_s14 + $0x28] sm:$0xff] }
 0x6c7   :  { %v2947_v18 = vmul.f32 -1.442695, %v2435_v29  ;;  %v2510_v29 = vld [vmem:[%s4988_s12 + $0x10] sm:$0xff]  ;;  %2573 = vmatpush.msrb.mxu3 %v2556_v19 }
 0x6c9   :  { %3187 = vpow2.f32 %v2947_v18 }
 0x6ca   :  { %v3186_v40 = vpop.eup %3185 }
 0x6cb   :  { %v2421_v0 = vmul.f32 %v3186_v40, %v2419_v48  ;;  %vm2426_vm9 = vweird.f32 %v3186_v40 }
 0x6cc   :  { %v2400_v58 = vpop.f32.mrf.mxu0  ;;  %v2413_v55 = vpop.f32.mrf.mxu1  ;;  %vm2427_vm11 = vmor %vm2425_vm10, %vm2426_vm9 }
 0x6cd   :  { %v2422_v39 = vsub.f32 1.0, %v2421_v0  ;;  %v2508_v58 = vld [vmem:[%s4988_s12] sm:$0xff] }
 0x6cf   :  { %v3188_v50 = vpop.eup %3187  ;;  %v2423_v41 = vmul.f32 %v3186_v40, %v2422_v39 }
 0x6d0   :  { %v2439_v32 = vadd.f32 1.0, %v3188_v50  ;;  %v2555_v50 = vld [vmem:[%s4990_s14 + $0x30] sm:$0xff] }
 0x6d1   :  { %v2424_v24 = vadd.f32 %v3186_v40, %v2423_v41  ;;  %2574 = vmatpush.msrb.mxu3 %v2555_v50 }
 0x6d2   :  { %3189 = vrcp.f32 %v2439_v32  ;;  %v2451_v56 = vand.u32 2147483648, %v2439_v32  ;;  %v2449_v45 = vand.u32 2147483647, %v2439_v32  ;;  %vm2445_vm14 = vweird.f32 %v2439_v32 }
 0x6d3   :  { %v2428_v9 = vsel %vm2427_vm11, %v3186_v40, %v2424_v24  ;;  %v2509_v40 = vld [vmem:[%s4988_s12 + $0x8] sm:$0xff]  ;;  %v2553_v24 = vld [vmem:[%s4990_s14 + $0x20] sm:$0xff]  ;;  %2575 = vmatpush.msrb.mxu3 %v2554_v21 }
 0x6d4   :  { %v2433_v23 = vsel %vm2430_vm12, %v2432_v36, %v2428_v9  ;;  %v2452_v31 = vor.u32 1.1754944e-38, %v2451_v56  ;;  %vm2450_vm0 = vcmp.eq.f32.partialorder %v2449_v45, 8.507059e+37  ;;  %v2552_v9 = vld [vmem:[%s4990_s14 + $0x18] sm:$0xff] }
 0x6d5   :  { %v2456_v57 = vmul.f32 %v2455_v42, %v2433_v23  ;;  %2576 = vmatpush.msrb.mxu3 %v2553_v24  ;;  %v2551_v23 = vld [vmem:[%s4990_s14 + $0x10] sm:$0xff] }
 0x6d7   :  { %v2457_v60 = vadd.f32 %v2456_v57, %v2372_v17  ;;  %2577 = vmatpush.msrb.mxu3 %v2552_v9 }
 0x6d8   :  { %v3190_v2 = vpop.eup %3189 }
 0x6d9   :  { %v2441_v47 = vmul.f32 %v3190_v2, %v2439_v32  ;;  %vm2446_vm13 = vweird.f32 %v3190_v2  ;;  %3191 = vtanh.f32 %v2457_v60  ;;  %2578 = vmatpush.msrb.mxu3 %v2551_v23 }
 0x6da   :  { %vm2447_vm15 = vmor %vm2445_vm14, %vm2446_vm13 }
 0x6db   :  { %v2442_v46 = vsub.f32 1.0, %v2441_v47  ;;  %2579 = vmatpush.msrb.mxu3 %v2550_v38 }
 0x6dd   :  { %v2443_v27 = vmul.f32 %v3190_v2, %v2442_v46  ;;  %v3029_v46 = vld [vmem:[%s4986_s10] ss:$0 sm:$0xff] }
 0x6df   :  { %v2444_v11 = vadd.f32 %v3190_v2, %v2443_v27  ;;  %v3192_v59 = vpop.eup %3191  ;;  %v3030_v27 = vld [vmem:[%s4987_s11] ss:$0 sm:$0xff] }
 0x6e1   :  { %v2448_v62 = vsel %vm2447_vm15, %v3190_v2, %v2444_v11 }
 0x6e2   :  { %v2453_v53 = vsel %vm2450_vm0, %v2452_v31, %v2448_v62  ;;  %v2549_v31 = vld [vmem:[%s4990_s14] sm:$0xff]  ;;  %s2594_s14 = sshll.u32 %s4992_s16, 4  ;;  %s2595_s14 = int_to_ptr.hbm [resolvable:$true] %s2594_s14 }
 0x6e3   :  { %v2459_v20 = vsub.f32 1.0, %v2453_v53  ;;  %v2461_v7 = vmul.f32 %v2453_v53, %v4879_v43  ;;  %v2520_v43 = vld [vmem:[%s4988_s12 + $0x60] sm:$0xff]  ;;  %2580 = vmatpush.msrb.mxu3 %v2549_v31 }
 0x6e4   :  { %2531 = vmatpush.msra.mxu2 %v2520_v43  ;;  %v3031_v62 = vld [vmem:[%s4989_s13] ss:$0 sm:$0xff] }
 0x6e5   :  { %v2460_v3 = vmul.f32 %v3192_v59, %v2459_v20 }
 0x6e6   :  { %2532 = vmatpush.msra.mxu2 %v2519_v12 }
 0x6e7   :  { %v2462_v30 = vadd.f32 %v2461_v7, %v2460_v3  ;;  %v3032_v3 = vld [vmem:[%s4991_s15] ss:$0 sm:$0xff] }
 0x6e8   :  { %2533 = vmatpush.msra.mxu2 %v2518_v44 }
 0x6e9   :  { %v2468_v54 = vmul.f32 %v2948_v22, %v2462_v30 }
 0x6ea   :  { %2534 = vmatpush.msra.mxu2 %v2517_v1 }
 0x6eb   :  { %v2469_v10 = vrot.slane %v2468_v54, 4 }
 0x6ec   :  { %2535 = vmatpush.msra.mxu2 %v2516_v8 }
 0x6ed   :  { %v2470_v63 = vadd.f32 %v2469_v10, %v2468_v54 }
 0x6ee   :  { %2536 = vmatpush.msra.mxu2 %v2515_v6 }
 0x6ef   :  { %v2471_v25 = vrot.slane %v2470_v63, 2 }
 0x6f0   :  { %2537 = vmatpush.msra.mxu2 %v2514_v61 }
 0x6f1   :  { %v2472_v35 = vadd.f32 %v2471_v25, %v2470_v63 }
 0x6f2   :  { %2538 = vmatpush.msra.mxu2 %v2513_v26 }
 0x6f3   :  { %v2473_v5 = vrot.slane %v2472_v35, 1 }
 0x6f4   :  { %2539 = vmatpush.msra.mxu2 %v2512_v15 }
 0x6f5   :  { %v2474_v49 = vadd.f32 %v2473_v5, %v2472_v35 }
 0x6f6   :  { %2540 = vmatpush.msra.mxu2 %v2511_v14 }
 0x6f7   :  { %v2475_v13 = vmul.f32 0.25, %v2474_v49 }
 0x6f8   :  { %2541 = vmatpush.msra.mxu2 %v2510_v29 }
 0x6f9   :  { %v2476_v34 = vsub.f32 %v2462_v30, %v2475_v13 }
 0x6fa   :  { %2542 = vmatpush.msra.mxu2 %v2509_v40 }
 0x6fb   :  { %v2477_v48 = vmul.f32 %v2948_v22, %v2476_v34 }
 0x6fc   :  { %2543 = vmatpush.msra.mxu2 %v2508_v58 }
 0x6fd   :  { %v2478_v28 = vmul.f32 %v2477_v48, %v2477_v48 }
 0x6ff   :  { %v2479_v52 = vrot.slane %v2478_v28, 4 }
 0x701   :  { %v2480_v18 = vadd.f32 %v2479_v52, %v2478_v28 }
 0x703   :  { %v2481_v0 = vrot.slane %v2480_v18, 2 }
 0x705   :  { %v2482_v55 = vadd.f32 %v2481_v0, %v2480_v18 }
 0x707   :  { %v2483_v39 = vrot.slane %v2482_v55, 1 }
 0x709   :  { %v2484_v41 = vadd.f32 %v2483_v39, %v2482_v55 }
 0x70b   :  { %v2485_v32 = vmul.f32 0.25, %v2484_v41 }
 0x70d   :  { %v2486_v36 = vadd.f32 1e-05, %v2485_v32 }
 0x70f   :  { %3193 = vrsqrt.f32 %v2486_v36  ;;  %vm2493_vm3 = vweird.f32 %v2486_v36 }
 0x715   :  { %v3194_v42 = vpop.eup %3193 }
 0x716   :  { %v2488_v57 = vmul.f32 %v3194_v42, %v2486_v36  ;;  %vm2494_vm2 = vweird.f32 %v3194_v42 }
 0x717   :  { %vm2495_vm4 = vmor %vm2493_vm3, %vm2494_vm2 }
 0x718   :  { %v2489_v2 = vmul.f32 %v3194_v42, %v2488_v57 }
 0x71a   :  { %v2490_v17 = vmul.f32 0.5, %v2489_v2 }
 0x71c   :  { %v2491_v47 = vsub.f32 1.5, %v2490_v17 }
 0x71e   :  { %v2492_v60 = vmul.f32 %v3194_v42, %v2491_v47 }
 0x720   :  { %v2496_v33 = vsel %vm2495_vm4, %v3194_v42, %v2492_v60 }
 0x721   :  { %v2497_v56 = vmul.f32 %v2496_v33, %v2476_v34 }
 0x723   :  { %v2502_v45 = vmul.f32 %v3029_v46, %v2497_v56 }
 0x725   :  { %v2507_v11 = vadd.f32 %v3030_v27, %v2502_v45 }
 0x727   :  { %2544 = vmatmul.f32.vlgmr.msra.gmra.mxu2 %v2507_v11 }
 0x7aa   :  { %v2545_v53 = vpop.f32.mrf.mxu2 }
 0x7ab   :  { %v2546_v20 = vadd.f32 %v3031_v62, %v2545_v53 }
 0x7ad   :  { %v2548_v59 = vmax.f32 %v2546_v20, 0.0 }
 0x7af   :  { %2949 = vmatmul.msk.f32.vlgmr.msrb.gmra.mxu3 %vm2561_vm5, %v2548_v59 }
 0x832   :  { %v2582_v7 = vpop.f32.mrf.mxu3 }
 0x833   :  { %v2583_v16 = vadd.f32 %v3032_v3, %v2582_v7 }
 0x835   :  { %2586 = vst.msk [vmem:[#allocation3] sm:$0xf] %vm2585_vm6, %v2583_v16 }
 0x836   :  { %2597 = dma.vmem_to_hbm [thread:$0]  %s2593_s23, 64, %s2595_s14, [#allocation4]  }
 0x837   :  { %3223 = dma.done.wait [#allocation4], 64  }
 0x838   :  { %3224 = vsyncadd [#allocation4], 4294967232 }
 0x839   :  { %2602 = vsyncpa [#allocation4], 1 }

</bundles_post_ra>
